<compile_context>
chip_gen: v7x
topology: tpu7x:2x2x1
jax: 0.10.0
libtpu: 0.0.40
codegen_flags: <defaults>
</compile_context>

<pallas_src>
import functools

import jax
import jax.numpy as jnp
from jax import lax
from jax.experimental import pallas as pl
from jax.experimental.pallas import tpu as pltpu

UNROLL = 8   # scan steps per unrolled group (one f32 sublane tile of rows)


def mamba_block_kernel(
    x_ref, xb_ref,                       # (1, TL, d_model), (1, 8, d_model) next-tile boundary rows
    w_in_ref, b_in_ref,                  # (d_model, d_inner) bf16, (1, d_inner) f32
    conv_w_ref, conv_b_ref,              # (3, d_inner), (1, d_inner)
    a_t_ref, d_ref,                      # (n, d_inner) = (-exp(A_log)).T, (1, d_inner)
    w_xp_ref, b_xp_ref,                  # (d_inner, dt_pad + n_pad) bf16, (1, dt_pad + n_pad)
    w_dt_ref, b_dt_ref,                  # (dt_pad, d_inner) bf16, (1, d_inner)
    w_out_ref, b_out_ref,                # (d_inner, d_model) bf16, (1, d_model)
    o_ref,                               # (1, TL, d_model)
    u_scr,                               # VMEM (TL, d_inner)   conv+silu output
    delta_scr,                           # VMEM (TL, d_inner)   softplus(dt_proj)
    b_scr,                               # VMEM (TL, n_pad)     B values
    y_scr,                               # VMEM (TL, d_inner)   scan output
    state_scr,                           # VMEM (n, d_inner)    scan state carry
    hlast_scr,                           # VMEM (1, d_inner)    conv left-boundary carry
    *, dc, exp_dtype,
):
    t = pl.program_id(1)
    nt = pl.num_programs(1)
    tl = x_ref.shape[1]
    n, d_inner = a_t_ref.shape
    n_pad = b_scr.shape[1]
    dt_pad = w_dt_ref.shape[0]

    # Reset the carried state at the start of every sequence.
    @pl.when(t == 0)
    def _():
        state_scr[...] = jnp.zeros_like(state_scr)
        hlast_scr[...] = jnp.zeros_like(hlast_scr)

    # ---- in_proj: fold the next-tile boundary rows into one matmul ----
    x = x_ref[0]                                            # (tl, d_model) f32
    xb = xb_ref[0]                                          # (8, d_model)  first rows of tile t+1
    x_all = jnp.concatenate([x, xb], axis=0).astype(jnp.bfloat16)
    h_all = (jnp.dot(x_all, w_in_ref[...], preferred_element_type=jnp.float32)
             + b_in_ref[...])                               # (tl+8, d_inner) f32
    h = h_all[:tl, :]
    not_last = (t < nt - 1).astype(jnp.float32)
    h_next = h_all[tl:tl + 1, :] * not_last                 # conv right boundary (0 on last tile)

    # ---- depthwise conv1d (k=3, 'same') via XLU rolls + boundary fixups ----
    row = lax.broadcasted_iota(jnp.int32, (tl, 1), 0)
    h_prev_row = jnp.broadcast_to(hlast_scr[...], h.shape)  # h[-1] of previous tile (0 at t==0)
    h_next_row = jnp.broadcast_to(h_next, h.shape)
    h_left = jnp.where(row == 0, h_prev_row, pltpu.roll(h, shift=1, axis=0))
    h_right = jnp.where(row == tl - 1, h_next_row, pltpu.roll(h, shift=tl - 1, axis=0))
    hlast_scr[...] = h[tl - 1:tl, :]                        # carry for the next tile
    hc = (h_left * conv_w_ref[0:1, :] + h * conv_w_ref[1:2, :]
          + h_right * conv_w_ref[2:3, :] + conv_b_ref[...])

    # ---- SiLU ----
    # TODO(synk): nn.Dropout treated as identity (eval-mode semantics).
    u = hc * jax.nn.sigmoid(hc)
    u_scr[...] = u
    u_bf = u.astype(jnp.bfloat16)

    # ---- fused, lane-dense x_proj (delta lanes [0:dt_pad], B lanes [dt_pad:]) ----
    x_dbl = (jnp.dot(u_bf, w_xp_ref[...], preferred_element_type=jnp.float32)
             + b_xp_ref[...])                               # (tl, dt_pad + n_pad)
    delta_lr = x_dbl[:, :dt_pad]
    b_scr[...] = x_dbl[:, dt_pad:]

    # ---- dt_proj + softplus (padded rows of w_dt are zero -> exact) ----
    delta_scr[...] = jax.nn.softplus(
        jnp.dot(delta_lr.astype(jnp.bfloat16), w_dt_ref[...],
                preferred_element_type=jnp.float32) + b_dt_ref[...])

    # ---- selective scan: fused discretization, chunked over d_inner, 8-step unroll ----
    # One-hot matrix moves B from lanes to sublanes via a tiny bf16 MXU
    # contraction once per 8-step group (avoids per-step relayouts).
    eye_bf = (lax.broadcasted_iota(jnp.int32, (n, n_pad), 0)
              == lax.broadcasted_iota(jnp.int32, (n, n_pad), 1)).astype(jnp.bfloat16)
    n_groups = tl // UNROLL

    for c0 in range(0, d_inner, dc):                        # static channel-chunk loop
        a_c = a_t_ref[:, c0:c0 + dc]                        # (n, dc), loop-invariant

        def group_body(g, state_c, c0=c0, a_c=a_c):
            i0 = pl.multiple_of(g * UNROLL, UNROLL)
            d8 = delta_scr[pl.ds(i0, UNROLL), c0:c0 + dc]   # (8, dc)
            u8 = u_scr[pl.ds(i0, UNROLL), c0:c0 + dc]       # (8, dc)
            b8 = b_scr[pl.ds(i0, UNROLL), :].astype(jnp.bfloat16)       # (8, n_pad)
            bt8 = lax.dot_general(eye_bf, b8, (((1,), (1,)), ((), ())),
                                  preferred_element_type=jnp.float32)   # (n, 8)
            du8 = d8 * u8
            ys = []
            for k in range(UNROLL):
                da = jnp.exp((d8[k:k + 1, :] * a_c).astype(exp_dtype))  # (n, dc)
                dbu = bt8[:, k:k + 1] * du8[k:k + 1, :]                 # (n, dc)
                state_c = da * state_c + dbu                            # f32 accumulate
                ys.append(jnp.sum(state_c, axis=0, keepdims=True))
            y_scr[pl.ds(i0, UNROLL), c0:c0 + dc] = jnp.concatenate(ys, axis=0)
            return state_c

        state_c = lax.fori_loop(0, n_groups, group_body, state_scr[:, c0:c0 + dc])
        state_scr[:, c0:c0 + dc] = state_c                  # carry across seq tiles

    # ---- skip connection + out_proj ----
    y = y_scr[...] + u_scr[...] * d_ref[...]
    out = (jnp.dot(y.astype(jnp.bfloat16), w_out_ref[...],
                   preferred_element_type=jnp.float32) + b_out_ref[...])
    o_ref[0] = out.astype(o_ref.dtype)


def mamba_block(x, params, seq_tile=256, scan_chunk=512, exp_dtype=jnp.bfloat16):
    """MambaBlock forward.  Pass exp_dtype=jnp.float32 for strict numerics / v5e."""
    B, L, d_model = x.shape
    d_inner = params["w_in"].shape[1]
    n = params["a_t"].shape[0]
    dt_rank = params["w_dt"].shape[0]

    tl = min(seq_tile, L)
    if tl % UNROLL != 0 or L % tl != 0:
        raise ValueError(f"seq tile {tl} must be a multiple of {UNROLL} and divide L={L}")
    nt = L // tl
    n_pad = -(-n // 128) * 128
    dt_pad = -(-dt_rank // 128) * 128

    # Channel chunk for the scan: small enough that per-chunk state + temporaries
    # live in vregs, lane-aligned (multiple of 128) whenever d_inner allows.
    if d_inner <= scan_chunk:
        dc = d_inner
    else:
        dc = next((c for c in (512, 256, 128) if c <= scan_chunk and d_inner % c == 0),
                  d_inner)

    # ---- weight preprocessing: fused lane-padded x_proj, padded dt_proj, bf16 MXU weights ----
    bf = jnp.bfloat16
    w_xp, b_xp = params["w_xp"], params["b_xp"]
    w_xpf = jnp.zeros((d_inner, dt_pad + n_pad), jnp.float32)
    w_xpf = w_xpf.at[:, :dt_rank].set(w_xp[:, :dt_rank])
    w_xpf = w_xpf.at[:, dt_pad:dt_pad + n].set(w_xp[:, dt_rank:])
    b_xpf = jnp.zeros((1, dt_pad + n_pad), jnp.float32)
    b_xpf = b_xpf.at[:, :dt_rank].set(b_xp[:, :dt_rank])
    b_xpf = b_xpf.at[:, dt_pad:dt_pad + n].set(b_xp[:, dt_rank:])
    w_dtp = jnp.zeros((dt_pad, d_inner), jnp.float32).at[:dt_rank, :].set(params["w_dt"])

    weights = [
        params["w_in"].astype(bf), params["b_in"],
        params["conv_w"], params["conv_b"],
        params["a_t"], params["d"],
        w_xpf.astype(bf), b_xpf,
        w_dtp.astype(bf), params["b_dt"],
        params["w_out"].astype(bf), params["b_out"],
    ]
    weight_bytes = sum(int(w.size) * w.dtype.itemsize for w in weights)

    # ---- VMEM budget: cap by physical VMEM with headroom ----
    f32b = 4
    io_item = x.dtype.itemsize
    scratch_bytes = f32b * (3 * tl * d_inner + tl * n_pad + n * d_inner + d_inner)
    io_bytes = io_item * (2 * tl * d_model + 2 * 8 * d_model + 2 * tl * d_model)
    headroom = 8 << 20
    try:
        vmem_cap = int(pltpu.get_tpu_info().vmem_capacity_bytes)
    except Exception:
        vmem_cap = 64 << 20            # conservative (v7x-sized) default
    usable_vmem = vmem_cap - (8 << 20)

    # ---- cost estimate ----
    tokens = B * L
    flops = (2 * tokens * d_inner * (2 * d_model + 2 * dt_pad + n_pad)
             + 6 * tokens * n * d_inner)
    transcendentals = tokens * d_inner * (n + 3)
    bytes_accessed = int(weight_bytes + x.size * io_item * (1 + 8 / tl)
                         + B * L * d_model * io_item)

    kernel = functools.partial(mamba_block_kernel, dc=dc, exp_dtype=exp_dtype)
    tpb = tl // 8                      # 8-row blocks per seq tile
    last_blk = L // 8 - 1

    def build(weight_mode, needed_bytes):
        if weight_mode is None:
            w_specs = [pl.BlockSpec(w.shape, lambda b, t: (0, 0)) for w in weights]
        else:
            w_specs = [pl.BlockSpec(w.shape, lambda b, t: (0, 0),
                                    pipeline_mode=weight_mode) for w in weights]
        grid_spec = pltpu.PrefetchScalarGridSpec(
            num_scalar_prefetch=0,
            grid=(B, nt),
            in_specs=[
                pl.BlockSpec((1, tl, d_model), lambda b, t: (b, t, 0)),
                # 8-row boundary block: first rows of seq tile t+1 (clamped; the
                # kernel zeroes its contribution on the last tile).
                pl.BlockSpec((1, 8, d_model),
                             lambda b, t: (b, jnp.minimum((t + 1) * tpb, last_blk), 0)),
            ] + w_specs,
            out_specs=pl.BlockSpec((1, tl, d_model), lambda b, t: (b, t, 0)),
            scratch_shapes=[
                pltpu.VMEM((tl, d_inner), jnp.float32),   # u
                pltpu.VMEM((tl, d_inner), jnp.float32),   # delta
                pltpu.VMEM((tl, n_pad), jnp.float32),     # B
                pltpu.VMEM((tl, d_inner), jnp.float32),   # y
                pltpu.VMEM((n, d_inner), jnp.float32),    # scan state carry
                pltpu.VMEM((1, d_inner), jnp.float32),    # conv boundary carry
            ],
        )
        vmem_limit = int(min(max(needed_bytes + headroom, 32 << 20), usable_vmem))
        return pl.pallas_call(
            kernel,
            out_shape=jax.ShapeDtypeStruct((B, L, d_model), x.dtype),
            grid_spec=grid_spec,
            compiler_params=pltpu.CompilerParams(
                dimension_semantics=("parallel", "arbitrary"),
                vmem_limit_bytes=vmem_limit),
            cost_estimate=pl.CostEstimate(flops=int(flops),
                                          transcendentals=int(transcendentals),
                                          bytes_accessed=int(bytes_accessed)),
        )

    needed_single = scratch_bytes + weight_bytes + io_bytes
    needed_double = scratch_bytes + 2 * weight_bytes + io_bytes
    try:
        return build(pl.Buffered(1), needed_single)(x, x, *weights)
    except Exception:
        # pl.Buffered(1) single-buffering of constant-index weights may be
        # unavailable on some jax versions.  Only retry with default
        # double-buffered weight specs if that provably fits physical VMEM
        # (never exceed v7x's 64 MiB); a genuine kernel bug fails again below
        # and surfaces normally.
        if needed_double + headroom > usable_vmem:
            raise
        return build(None, needed_double)(x, x, *weights)


def init_params(key, d_model, d_inner, n_ssm, dt_rank):
    ks = jax.random.split(key, 12)

    def rnd(k, shape, scale=0.1):
        return scale * jax.random.normal(k, shape, dtype=jnp.float32)

    a_log = jax.random.normal(ks[4], (d_inner, n_ssm), dtype=jnp.float32)
    return dict(
        w_in=rnd(ks[0], (d_model, d_inner)),
        b_in=rnd(ks[1], (1, d_inner)),
        conv_w=rnd(ks[2], (3, d_inner)),          # [k, c] == torch weight[c, 0, k]
        conv_b=rnd(ks[3], (1, d_inner)),
        a_t=(-jnp.exp(a_log)).T,                  # (n_ssm, d_inner)
        d=jax.random.normal(ks[5], (1, d_inner), dtype=jnp.float32),
        w_xp=rnd(ks[6], (d_inner, dt_rank + n_ssm)),
        b_xp=rnd(ks[7], (1, dt_rank + n_ssm)),
        w_dt=rnd(ks[8], (dt_rank, d_inner)),
        b_dt=rnd(ks[9], (1, d_inner)),
        w_out=rnd(ks[10], (d_inner, d_model)),
        b_out=rnd(ks[11], (1, d_model)),
    )


def mamba_block_ref(x, p):
    """Pure-JAX reference replicating the PyTorch forward semantics (f32)."""
    b, l, _ = x.shape
    dt_rank = p["w_dt"].shape[0]
    h = x @ p["w_in"] + p["b_in"]
    hp = jnp.pad(h, ((0, 0), (1, 1), (0, 0)))
    h = (hp[:, :-2] * p["conv_w"][0] + hp[:, 1:-1] * p["conv_w"][1]
         + hp[:, 2:] * p["conv_w"][2] + p["conv_b"])
    h = h * jax.nn.sigmoid(h)
    x_dbl = h @ p["w_xp"] + p["b_xp"]
    delta = jax.nn.softplus(x_dbl[..., :dt_rank] @ p["w_dt"] + p["b_dt"])
    b_mat = x_dbl[..., dt_rank:]
    A = p["a_t"].T                                     # (d_inner, n)
    dA = jnp.exp(delta[..., None] * A[None, None])     # (b, l, d_inner, n)
    dBu = delta[..., None] * b_mat[:, :, None, :] * h[..., None]
    state = jnp.zeros((b, A.shape[0], A.shape[1]), jnp.float32)
    ys = []
    for i in range(l):
        state = dA[:, i] * state + dBu[:, i]
        ys.append(state.sum(-1))
    y = jnp.stack(ys, axis=1) + h * p["d"]
    return y @ p["w_out"] + p["b_out"]


if __name__ == "__main__":
    d_model, d_inner, n_ssm, dt_rank = 32, 64, 8, 4
    B, L, TL = 2, 32, 16   # two seq tiles per batch -> exercises cross-tile carries

    key = jax.random.PRNGKey(0)
    kx, kp = jax.random.split(key)
    x = jax.random.normal(kx, (B, L, d_model), dtype=jnp.float32)
    params = init_params(kp, d_model, d_inner, n_ssm, dt_rank)

    out = jax.block_until_ready(mamba_block(x, params, seq_tile=TL))
    ref = jax.block_until_ready(mamba_block_ref(x, params))

    assert out.shape == (B, L, d_model)
    err = float(jnp.max(jnp.abs(out - ref)))
    assert jnp.allclose(out, ref, atol=5e-2, rtol=5e-2), err
    print("KERNEL_OK")
</pallas_src>

<mosaic_0001>
module attributes {stable_mosaic.version = 11 : i64} {
  func.func @mamba_block_kernel(%arg0: i32, %arg1: i32, %arg2: memref<1x16x32xf32, #tpu.memory_space<vmem>>, %arg3: memref<1x8x32xf32, #tpu.memory_space<vmem>>, %arg4: memref<32x64xbf16, #tpu.memory_space<vmem>>, %arg5: memref<1x64xf32, #tpu.memory_space<vmem>>, %arg6: memref<3x64xf32, #tpu.memory_space<vmem>>, %arg7: memref<1x64xf32, #tpu.memory_space<vmem>>, %arg8: memref<8x64xf32, #tpu.memory_space<vmem>>, %arg9: memref<1x64xf32, #tpu.memory_space<vmem>>, %arg10: memref<64x256xbf16, #tpu.memory_space<vmem>>, %arg11: memref<1x256xf32, #tpu.memory_space<vmem>>, %arg12: memref<128x64xbf16, #tpu.memory_space<vmem>>, %arg13: memref<1x64xf32, #tpu.memory_space<vmem>>, %arg14: memref<64x32xbf16, #tpu.memory_space<vmem>>, %arg15: memref<1x32xf32, #tpu.memory_space<vmem>>, %arg16: memref<1x16x32xf32, #tpu.memory_space<vmem>>, %arg17: memref<16x64xf32, #tpu.memory_space<vmem>>, %arg18: memref<16x64xf32, #tpu.memory_space<vmem>>, %arg19: memref<16x128xf32, #tpu.memory_space<vmem>>, %arg20: memref<16x64xf32, #tpu.memory_space<vmem>>, %arg21: memref<8x64xf32, #tpu.memory_space<vmem>>, %arg22: memref<1x64xf32, #tpu.memory_space<vmem>>) attributes {dimension_semantics = [#tpu.dimension_semantics<parallel>, #tpu.dimension_semantics<arbitrary>], iteration_bounds = array<i64: 2, 2>, scalar_prefetch = 0 : i64, scratch_operands = 6 : i64, tpu.core_type = #tpu.core_type<tc>, window_params = [{transform_indices = @transform_0, window_bounds = array<i64: 1, 16, 32>}, {transform_indices = @transform_1, window_bounds = array<i64: 1, 8, 32>}, {pipeline_mode = #tpu.pipeline_mode<synchronous>, transform_indices = @transform_2, window_bounds = array<i64: 32, 64>}, {pipeline_mode = #tpu.pipeline_mode<synchronous>, transform_indices = @transform_3, window_bounds = array<i64: 1, 64>}, {pipeline_mode = #tpu.pipeline_mode<synchronous>, transform_indices = @transform_4, window_bounds = array<i64: 3, 64>}, {pipeline_mode = #tpu.pipeline_mode<synchronous>, transform_indices = @transform_5, window_bounds = array<i64: 1, 64>}, {pipeline_mode = #tpu.pipeline_mode<synchronous>, transform_indices = @transform_6, window_bounds = array<i64: 8, 64>}, {pipeline_mode = #tpu.pipeline_mode<synchronous>, transform_indices = @transform_7, window_bounds = array<i64: 1, 64>}, {pipeline_mode = #tpu.pipeline_mode<synchronous>, transform_indices = @transform_8, window_bounds = array<i64: 64, 256>}, {pipeline_mode = #tpu.pipeline_mode<synchronous>, transform_indices = @transform_9, window_bounds = array<i64: 1, 256>}, {pipeline_mode = #tpu.pipeline_mode<synchronous>, transform_indices = @transform_10, window_bounds = array<i64: 128, 64>}, {pipeline_mode = #tpu.pipeline_mode<synchronous>, transform_indices = @transform_11, window_bounds = array<i64: 1, 64>}, {pipeline_mode = #tpu.pipeline_mode<synchronous>, transform_indices = @transform_12, window_bounds = array<i64: 64, 32>}, {pipeline_mode = #tpu.pipeline_mode<synchronous>, transform_indices = @transform_13, window_bounds = array<i64: 1, 32>}, {transform_indices = @transform_14, window_bounds = array<i64: 1, 16, 32>}]} {
    %c0_i32 = arith.constant 0 : i32
    %0 = arith.cmpi eq, %arg1, %c0_i32 : i32
    %1 = arith.extui %0 : i1 to i32
    %c0_i32_0 = arith.constant 0 : i32
    %2 = arith.cmpi ne, %1, %c0_i32_0 : i32
    scf.if %2 {
      %cst_65 = arith.constant 0.000000e+00 : f32
      %118 = vector.broadcast %cst_65 : f32 to vector<8x64xf32>
      %c0_66 = arith.constant 0 : index
      %c0_67 = arith.constant 0 : index
      %119 = vector.load %arg21[%c0_66, %c0_67] : memref<8x64xf32, #tpu.memory_space<vmem>>, vector<8x64xf32>
      tpu.vector_store %arg21[%c0_66, %c0_67], %118 {strides = array<i32>} : memref<8x64xf32, #tpu.memory_space<vmem>>, vector<8x64xf32>,
      %cst_68 = arith.constant 0.000000e+00 : f32
      %120 = vector.broadcast %cst_68 : f32 to vector<1x64xf32>
      %c0_69 = arith.constant 0 : index
      %c0_70 = arith.constant 0 : index
      %121 = vector.load %arg22[%c0_69, %c0_70] : memref<1x64xf32, #tpu.memory_space<vmem>>, vector<1x64xf32>
      tpu.vector_store %arg22[%c0_69, %c0_70], %120 {strides = array<i32>} : memref<1x64xf32, #tpu.memory_space<vmem>>, vector<1x64xf32>,
    } else {
    }
    %c0 = arith.constant 0 : index
    %c0_1 = arith.constant 0 : index
    %c0_2 = arith.constant 0 : index
    %3 = vector.load %arg2[%c0, %c0_1, %c0_2] : memref<1x16x32xf32, #tpu.memory_space<vmem>>, vector<1x16x32xf32>
    %4 = vector.shape_cast %3 : vector<1x16x32xf32> to vector<16x32xf32>
    %c0_3 = arith.constant 0 : index
    %c0_4 = arith.constant 0 : index
    %c0_5 = arith.constant 0 : index
    %5 = vector.load %arg3[%c0_3, %c0_4, %c0_5] : memref<1x8x32xf32, #tpu.memory_space<vmem>>, vector<1x8x32xf32>
    %6 = vector.shape_cast %5 : vector<1x8x32xf32> to vector<8x32xf32>
    %7 = tpu.concatenate %4, %6 in 0 : vector<16x32xf32>, vector<8x32xf32> -> vector<24x32xf32>
    %8 = arith.truncf %7 : vector<24x32xf32> to vector<24x32xbf16>
    %c0_6 = arith.constant 0 : index
    %c0_7 = arith.constant 0 : index
    %9 = vector.load %arg4[%c0_6, %c0_7] : memref<32x64xbf16, #tpu.memory_space<vmem>>, vector<32x64xbf16>
    %cst = arith.constant dense<0.000000e+00> : vector<24x64xf32>
    %10 = tpu.matmul %8, %9, %cst {dimension_numbers = #tpu.dot_dimension_numbers<[1], [0], [0], [1], [0, 0, 1, 1], [], []>} : vector<24x32xbf16>, vector<32x64xbf16>, vector<24x64xf32> -> vector<24x64xf32>
    %c0_8 = arith.constant 0 : index
    %c0_9 = arith.constant 0 : index
    %11 = vector.load %arg5[%c0_8, %c0_9] : memref<1x64xf32, #tpu.memory_space<vmem>>, vector<1x64xf32>
    %12 = vector.broadcast %11 : vector<1x64xf32> to vector<24x64xf32>
    %13 = arith.addf %10, %12 : vector<24x64xf32>
    %14 = vector.extract_strided_slice %13 {offsets = [0, 0], sizes = [16, 64], strides = [1, 1]} : vector<24x64xf32> to vector<16x64xf32>
    %c1_i32 = arith.constant 1 : i32
    %15 = arith.cmpi slt, %arg1, %c1_i32 : i32
    %16 = arith.extui %15 : i1 to i32
    %17 = arith.sitofp %16 : i32 to f32
    %18 = vector.extract_strided_slice %13 {offsets = [16, 0], sizes = [1, 64], strides = [1, 1]} : vector<24x64xf32> to vector<1x64xf32>
    %19 = vector.broadcast %17 : f32 to vector<1x64xf32>
    %20 = arith.mulf %18, %19 : vector<1x64xf32>
    %21 = tpu.iota {dimensions = array<i32: 0>} : vector<16x1xi32>
    %c0_10 = arith.constant 0 : index
    %c0_11 = arith.constant 0 : index
    %22 = vector.load %arg22[%c0_10, %c0_11] : memref<1x64xf32, #tpu.memory_space<vmem>>, vector<1x64xf32>
    %23 = vector.shape_cast %22 : vector<1x64xf32> to vector<1x64xf32>
    %24 = vector.broadcast %23 : vector<1x64xf32> to vector<16x64xf32>
    %25 = vector.shape_cast %20 : vector<1x64xf32> to vector<1x64xf32>
    %26 = vector.broadcast %25 : vector<1x64xf32> to vector<16x64xf32>
    %c0_i32_12 = arith.constant 0 : i32
    %27 = vector.broadcast %c0_i32_12 : i32 to vector<16x1xi32>
    %28 = arith.cmpi eq, %21, %27 : vector<16x1xi32>
    %c1_i32_13 = arith.constant 1 : i32
    %29 = tpu.dynamic_rotate %14 by %c1_i32_13 dim 0 : vector<16x64xf32>, i32 -> vector<16x64xf32>
    %30 = vector.shape_cast %28 : vector<16x1xi1> to vector<16x1xi1>
    %31 = vector.broadcast %30 : vector<16x1xi1> to vector<16x64xi1>
    %32 = arith.select %31, %24, %29 : vector<16x64xi1>, vector<16x64xf32>
    %c15_i32 = arith.constant 15 : i32
    %33 = vector.broadcast %c15_i32 : i32 to vector<16x1xi32>
    %34 = arith.cmpi eq, %21, %33 : vector<16x1xi32>
    %c15_i32_14 = arith.constant 15 : i32
    %35 = tpu.dynamic_rotate %14 by %c15_i32_14 dim 0 : vector<16x64xf32>, i32 -> vector<16x64xf32>
    %36 = vector.shape_cast %34 : vector<16x1xi1> to vector<16x1xi1>
    %37 = vector.broadcast %36 : vector<16x1xi1> to vector<16x64xi1>
    %38 = arith.select %37, %26, %35 : vector<16x64xi1>, vector<16x64xf32>
    %39 = vector.extract_strided_slice %14 {offsets = [15, 0], sizes = [1, 64], strides = [1, 1]} : vector<16x64xf32> to vector<1x64xf32>
    %c0_15 = arith.constant 0 : index
    %c0_16 = arith.constant 0 : index
    %40 = vector.load %arg22[%c0_15, %c0_16] : memref<1x64xf32, #tpu.memory_space<vmem>>, vector<1x64xf32>
    tpu.vector_store %arg22[%c0_15, %c0_16], %39 {strides = array<i32>} : memref<1x64xf32, #tpu.memory_space<vmem>>, vector<1x64xf32>,
    %c0_17 = arith.constant 0 : index
    %c0_18 = arith.constant 0 : index
    %41 = vector.load %arg6[%c0_17, %c0_18] : memref<3x64xf32, #tpu.memory_space<vmem>>, vector<1x64xf32>
    %42 = vector.broadcast %41 : vector<1x64xf32> to vector<16x64xf32>
    %43 = arith.mulf %32, %42 : vector<16x64xf32>
    %c1 = arith.constant 1 : index
    %c0_19 = arith.constant 0 : index
    %44 = vector.load %arg6[%c1, %c0_19] : memref<3x64xf32, #tpu.memory_space<vmem>>, vector<1x64xf32>
    %45 = vector.broadcast %44 : vector<1x64xf32> to vector<16x64xf32>
    %46 = arith.mulf %14, %45 : vector<16x64xf32>
    %47 = arith.addf %43, %46 : vector<16x64xf32>
    %c2 = arith.constant 2 : index
    %c0_20 = arith.constant 0 : index
    %48 = vector.load %arg6[%c2, %c0_20] : memref<3x64xf32, #tpu.memory_space<vmem>>, vector<1x64xf32>
    %49 = vector.broadcast %48 : vector<1x64xf32> to vector<16x64xf32>
    %50 = arith.mulf %38, %49 : vector<16x64xf32>
    %51 = arith.addf %47, %50 : vector<16x64xf32>
    %c0_21 = arith.constant 0 : index
    %c0_22 = arith.constant 0 : index
    %52 = vector.load %arg7[%c0_21, %c0_22] : memref<1x64xf32, #tpu.memory_space<vmem>>, vector<1x64xf32>
    %53 = vector.broadcast %52 : vector<1x64xf32> to vector<16x64xf32>
    %54 = arith.addf %51, %53 : vector<16x64xf32>
    %55 = arith.negf %54 : vector<16x64xf32>
    %56 = math.exp %55 : vector<16x64xf32>
    %cst_23 = arith.constant 1.000000e+00 : f32
    %57 = vector.broadcast %cst_23 : f32 to vector<16x64xf32>
    %58 = arith.addf %57, %56 : vector<16x64xf32>
    %59 = arith.divf %57, %58 : vector<16x64xf32>
    %60 = arith.mulf %54, %59 : vector<16x64xf32>
    %c0_24 = arith.constant 0 : index
    %c0_25 = arith.constant 0 : index
    %61 = vector.load %arg17[%c0_24, %c0_25] : memref<16x64xf32, #tpu.memory_space<vmem>>, vector<16x64xf32>
    tpu.vector_store %arg17[%c0_24, %c0_25], %60 {strides = array<i32>} : memref<16x64xf32, #tpu.memory_space<vmem>>, vector<16x64xf32>,
    %62 = arith.truncf %60 : vector<16x64xf32> to vector<16x64xbf16>
    %c0_26 = arith.constant 0 : index
    %c0_27 = arith.constant 0 : index
    %63 = vector.load %arg10[%c0_26, %c0_27] : memref<64x256xbf16, #tpu.memory_space<vmem>>, vector<64x256xbf16>
    %cst_28 = arith.constant dense<0.000000e+00> : vector<16x256xf32>
    %64 = tpu.matmul %62, %63, %cst_28 {dimension_numbers = #tpu.dot_dimension_numbers<[1], [0], [0], [1], [0, 0, 1, 1], [], []>} : vector<16x64xbf16>, vector<64x256xbf16>, vector<16x256xf32> -> vector<16x256xf32>
    %c0_29 = arith.constant 0 : index
    %c0_30 = arith.constant 0 : index
    %65 = vector.load %arg11[%c0_29, %c0_30] : memref<1x256xf32, #tpu.memory_space<vmem>>, vector<1x256xf32>
    %66 = vector.broadcast %65 : vector<1x256xf32> to vector<16x256xf32>
    %67 = arith.addf %64, %66 : vector<16x256xf32>
    %68 = vector.extract_strided_slice %67 {offsets = [0, 0], sizes = [16, 128], strides = [1, 1]} : vector<16x256xf32> to vector<16x128xf32>
    %69 = vector.extract_strided_slice %67 {offsets = [0, 128], sizes = [16, 128], strides = [1, 1]} : vector<16x256xf32> to vector<16x128xf32>
    %c0_31 = arith.constant 0 : index
    %c0_32 = arith.constant 0 : index
    %70 = vector.load %arg19[%c0_31, %c0_32] : memref<16x128xf32, #tpu.memory_space<vmem>>, vector<16x128xf32>
    tpu.vector_store %arg19[%c0_31, %c0_32], %69 {strides = array<i32>} : memref<16x128xf32, #tpu.memory_space<vmem>>, vector<16x128xf32>,
    %71 = arith.truncf %68 : vector<16x128xf32> to vector<16x128xbf16>
    %c0_33 = arith.constant 0 : index
    %c0_34 = arith.constant 0 : index
    %72 = vector.load %arg12[%c0_33, %c0_34] : memref<128x64xbf16, #tpu.memory_space<vmem>>, vector<128x64xbf16>
    %cst_35 = arith.constant dense<0.000000e+00> : vector<16x64xf32>
    %73 = tpu.matmul %71, %72, %cst_35 {dimension_numbers = #tpu.dot_dimension_numbers<[1], [0], [0], [1], [0, 0, 1, 1], [], []>} : vector<16x128xbf16>, vector<128x64xbf16>, vector<16x64xf32> -> vector<16x64xf32>
    %c0_36 = arith.constant 0 : index
    %c0_37 = arith.constant 0 : index
    %74 = vector.load %arg13[%c0_36, %c0_37] : memref<1x64xf32, #tpu.memory_space<vmem>>, vector<1x64xf32>
    %75 = vector.broadcast %74 : vector<1x64xf32> to vector<16x64xf32>
    %76 = arith.addf %73, %75 : vector<16x64xf32>
    %cst_38 = arith.constant 0.000000e+00 : f32
    %77 = vector.broadcast %cst_38 : f32 to vector<16x64xf32>
    %78 = arith.maximumf %76, %77 : vector<16x64xf32>
    %79 = vector.broadcast %cst_38 : f32 to vector<16x64xf32>
    %80 = arith.subf %76, %79 : vector<16x64xf32>
    %81 = arith.cmpf one, %80, %80 : vector<16x64xf32>
    %82 = vector.broadcast %cst_38 : f32 to vector<16x64xf32>
    %83 = arith.addf %76, %82 : vector<16x64xf32>
    %84 = math.absf %80 : vector<16x64xf32>
    %cst_39 = arith.constant 0.000000e+00 : f32
    %85 = vector.broadcast %cst_39 : f32 to vector<16x64xf32>
    %86 = arith.subf %85, %84 : vector<16x64xf32>
    %87 = math.exp %86 : vector<16x64xf32>
    %88 = math.log1p %87 : vector<16x64xf32>
    %89 = arith.addf %78, %88 : vector<16x64xf32>
    %90 = arith.select %81, %83, %89 : vector<16x64xi1>, vector<16x64xf32>
    %c0_40 = arith.constant 0 : index
    %c0_41 = arith.constant 0 : index
    %91 = vector.load %arg18[%c0_40, %c0_41] : memref<16x64xf32, #tpu.memory_space<vmem>>, vector<16x64xf32>
    tpu.vector_store %arg18[%c0_40, %c0_41], %90 {strides = array<i32>} : memref<16x64xf32, #tpu.memory_space<vmem>>, vector<16x64xf32>,
    %92 = tpu.iota {dimensions = array<i32: 0>} : vector<8x128xi32>
    %93 = tpu.iota {dimensions = array<i32: 1>} : vector<8x128xi32>
    %94 = arith.cmpi eq, %92, %93 : vector<8x128xi32>
    %95 = arith.extui %94 : vector<8x128xi1> to vector<8x128xi32>
    %96 = arith.sitofp %95 : vector<8x128xi32> to vector<8x128xf32>
    %97 = arith.truncf %96 : vector<8x128xf32> to vector<8x128xbf16>
    %c0_42 = arith.constant 0 : index
    %c0_43 = arith.constant 0 : index
    %98 = vector.load %arg8[%c0_42, %c0_43] : memref<8x64xf32, #tpu.memory_space<vmem>>, vector<8x64xf32>
    %c0_44 = arith.constant 0 : index
    %c0_45 = arith.constant 0 : index
    %99 = vector.load %arg21[%c0_44, %c0_45] : memref<8x64xf32, #tpu.memory_space<vmem>>, vector<8x64xf32>
    %c0_i32_46 = arith.constant 0 : i32
    %c2_i32 = arith.constant 2 : i32
    %100 = arith.addi %c0_i32_46, %c2_i32 : i32
    %c1_i32_47 = arith.constant 1 : i32
    %101 = scf.for %arg23 = %c0_i32_46 to %100 step %c1_i32_47 iter_args(%arg24 = %99) -> (vector<8x64xf32>)  : i32 {
      %c8_i32 = arith.constant 8 : i32
      %118 = arith.muli %arg23, %c8_i32 : i32
      %119 = tpu.assume_multiple %118, 8 : i32
      %120 = arith.index_cast %119 : i32 to index
      %c0_65 = arith.constant 0 : index
      %121 = vector.load %arg18[%120, %c0_65] : memref<16x64xf32, #tpu.memory_space<vmem>>, vector<8x64xf32>
      %122 = arith.index_cast %119 : i32 to index
      %c0_66 = arith.constant 0 : index
      %123 = vector.load %arg17[%122, %c0_66] : memref<16x64xf32, #tpu.memory_space<vmem>>, vector<8x64xf32>
      %124 = arith.index_cast %119 : i32 to index
      %c0_67 = arith.constant 0 : index
      %125 = vector.load %arg19[%124, %c0_67] : memref<16x128xf32, #tpu.memory_space<vmem>>, vector<8x128xf32>
      %126 = arith.truncf %125 : vector<8x128xf32> to vector<8x128xbf16>
      %cst_68 = arith.constant dense<0.000000e+00> : vector<8x8xf32>
      %127 = tpu.matmul %97, %126, %cst_68 {dimension_numbers = #tpu.dot_dimension_numbers<[1], [1], [0], [0], [0, 0, 1, 0], [], []>} : vector<8x128xbf16>, vector<8x128xbf16>, vector<8x8xf32> -> vector<8x8xf32>
      %128 = arith.mulf %121, %123 : vector<8x64xf32>
      %129 = vector.extract_strided_slice %121 {offsets = [0, 0], sizes = [1, 64], strides = [1, 1]} : vector<8x64xf32> to vector<1x64xf32>
      %130 = vector.broadcast %129 : vector<1x64xf32> to vector<8x64xf32>
      %131 = arith.mulf %130, %98 : vector<8x64xf32>
      %132 = arith.truncf %131 : vector<8x64xf32> to vector<8x64xbf16>
      %133 = math.exp %132 : vector<8x64xbf16>
      %134 = vector.extract_strided_slice %127 {offsets = [0, 0], sizes = [8, 1], strides = [1, 1]} : vector<8x8xf32> to vector<8x1xf32>
      %135 = vector.extract_strided_slice %128 {offsets = [0, 0], sizes = [1, 64], strides = [1, 1]} : vector<8x64xf32> to vector<1x64xf32>
      %136 = vector.broadcast %134 : vector<8x1xf32> to vector<8x64xf32>
      %137 = vector.broadcast %135 : vector<1x64xf32> to vector<8x64xf32>
      %138 = arith.mulf %136, %137 : vector<8x64xf32>
      %139 = arith.extf %133 : vector<8x64xbf16> to vector<8x64xf32>
      %140 = arith.mulf %139, %arg24 : vector<8x64xf32>
      %141 = arith.addf %140, %138 : vector<8x64xf32>
      %cst_69 = arith.constant dense<0.000000e+00> : vector<64xf32>
      %142 = vector.multi_reduction <add>, %141, %cst_69 [0] : vector<8x64xf32> to vector<64xf32>
      %143 = vector.shape_cast %142 : vector<64xf32> to vector<1x64xf32>
      %144 = vector.extract_strided_slice %121 {offsets = [1, 0], sizes = [1, 64], strides = [1, 1]} : vector<8x64xf32> to vector<1x64xf32>
      %145 = vector.broadcast %144 : vector<1x64xf32> to vector<8x64xf32>
      %146 = arith.mulf %145, %98 : vector<8x64xf32>
      %147 = arith.truncf %146 : vector<8x64xf32> to vector<8x64xbf16>
      %148 = math.exp %147 : vector<8x64xbf16>
      %149 = vector.extract_strided_slice %127 {offsets = [0, 1], sizes = [8, 1], strides = [1, 1]} : vector<8x8xf32> to vector<8x1xf32>
      %150 = vector.extract_strided_slice %128 {offsets = [1, 0], sizes = [1, 64], strides = [1, 1]} : vector<8x64xf32> to vector<1x64xf32>
      %151 = vector.broadcast %149 : vector<8x1xf32> to vector<8x64xf32>
      %152 = vector.broadcast %150 : vector<1x64xf32> to vector<8x64xf32>
      %153 = arith.mulf %151, %152 : vector<8x64xf32>
      %154 = arith.extf %148 : vector<8x64xbf16> to vector<8x64xf32>
      %155 = arith.mulf %154, %141 : vector<8x64xf32>
      %156 = arith.addf %155, %153 : vector<8x64xf32>
      %cst_70 = arith.constant dense<0.000000e+00> : vector<64xf32>
      %157 = vector.multi_reduction <add>, %156, %cst_70 [0] : vector<8x64xf32> to vector<64xf32>
      %158 = vector.shape_cast %157 : vector<64xf32> to vector<1x64xf32>
      %159 = vector.extract_strided_slice %121 {offsets = [2, 0], sizes = [1, 64], strides = [1, 1]} : vector<8x64xf32> to vector<1x64xf32>
      %160 = vector.broadcast %159 : vector<1x64xf32> to vector<8x64xf32>
      %161 = arith.mulf %160, %98 : vector<8x64xf32>
      %162 = arith.truncf %161 : vector<8x64xf32> to vector<8x64xbf16>
      %163 = math.exp %162 : vector<8x64xbf16>
      %164 = vector.extract_strided_slice %127 {offsets = [0, 2], sizes = [8, 1], strides = [1, 1]} : vector<8x8xf32> to vector<8x1xf32>
      %165 = vector.extract_strided_slice %128 {offsets = [2, 0], sizes = [1, 64], strides = [1, 1]} : vector<8x64xf32> to vector<1x64xf32>
      %166 = vector.broadcast %164 : vector<8x1xf32> to vector<8x64xf32>
      %167 = vector.broadcast %165 : vector<1x64xf32> to vector<8x64xf32>
      %168 = arith.mulf %166, %167 : vector<8x64xf32>
      %169 = arith.extf %163 : vector<8x64xbf16> to vector<8x64xf32>
      %170 = arith.mulf %169, %156 : vector<8x64xf32>
      %171 = arith.addf %170, %168 : vector<8x64xf32>
      %cst_71 = arith.constant dense<0.000000e+00> : vector<64xf32>
      %172 = vector.multi_reduction <add>, %171, %cst_71 [0] : vector<8x64xf32> to vector<64xf32>
      %173 = vector.shape_cast %172 : vector<64xf32> to vector<1x64xf32>
      %174 = vector.extract_strided_slice %121 {offsets = [3, 0], sizes = [1, 64], strides = [1, 1]} : vector<8x64xf32> to vector<1x64xf32>
      %175 = vector.broadcast %174 : vector<1x64xf32> to vector<8x64xf32>
      %176 = arith.mulf %175, %98 : vector<8x64xf32>
      %177 = arith.truncf %176 : vector<8x64xf32> to vector<8x64xbf16>
      %178 = math.exp %177 : vector<8x64xbf16>
      %179 = vector.extract_strided_slice %127 {offsets = [0, 3], sizes = [8, 1], strides = [1, 1]} : vector<8x8xf32> to vector<8x1xf32>
      %180 = vector.extract_strided_slice %128 {offsets = [3, 0], sizes = [1, 64], strides = [1, 1]} : vector<8x64xf32> to vector<1x64xf32>
      %181 = vector.broadcast %179 : vector<8x1xf32> to vector<8x64xf32>
      %182 = vector.broadcast %180 : vector<1x64xf32> to vector<8x64xf32>
      %183 = arith.mulf %181, %182 : vector<8x64xf32>
      %184 = arith.extf %178 : vector<8x64xbf16> to vector<8x64xf32>
      %185 = arith.mulf %184, %171 : vector<8x64xf32>
      %186 = arith.addf %185, %183 : vector<8x64xf32>
      %cst_72 = arith.constant dense<0.000000e+00> : vector<64xf32>
      %187 = vector.multi_reduction <add>, %186, %cst_72 [0] : vector<8x64xf32> to vector<64xf32>
      %188 = vector.shape_cast %187 : vector<64xf32> to vector<1x64xf32>
      %189 = vector.extract_strided_slice %121 {offsets = [4, 0], sizes = [1, 64], strides = [1, 1]} : vector<8x64xf32> to vector<1x64xf32>
      %190 = vector.broadcast %189 : vector<1x64xf32> to vector<8x64xf32>
      %191 = arith.mulf %190, %98 : vector<8x64xf32>
      %192 = arith.truncf %191 : vector<8x64xf32> to vector<8x64xbf16>
      %193 = math.exp %192 : vector<8x64xbf16>
      %194 = vector.extract_strided_slice %127 {offsets = [0, 4], sizes = [8, 1], strides = [1, 1]} : vector<8x8xf32> to vector<8x1xf32>
      %195 = vector.extract_strided_slice %128 {offsets = [4, 0], sizes = [1, 64], strides = [1, 1]} : vector<8x64xf32> to vector<1x64xf32>
      %196 = vector.broadcast %194 : vector<8x1xf32> to vector<8x64xf32>
      %197 = vector.broadcast %195 : vector<1x64xf32> to vector<8x64xf32>
      %198 = arith.mulf %196, %197 : vector<8x64xf32>
      %199 = arith.extf %193 : vector<8x64xbf16> to vector<8x64xf32>
      %200 = arith.mulf %199, %186 : vector<8x64xf32>
      %201 = arith.addf %200, %198 : vector<8x64xf32>
      %cst_73 = arith.constant dense<0.000000e+00> : vector<64xf32>
      %202 = vector.multi_reduction <add>, %201, %cst_73 [0] : vector<8x64xf32> to vector<64xf32>
      %203 = vector.shape_cast %202 : vector<64xf32> to vector<1x64xf32>
      %204 = vector.extract_strided_slice %121 {offsets = [5, 0], sizes = [1, 64], strides = [1, 1]} : vector<8x64xf32> to vector<1x64xf32>
      %205 = vector.broadcast %204 : vector<1x64xf32> to vector<8x64xf32>
      %206 = arith.mulf %205, %98 : vector<8x64xf32>
      %207 = arith.truncf %206 : vector<8x64xf32> to vector<8x64xbf16>
      %208 = math.exp %207 : vector<8x64xbf16>
      %209 = vector.extract_strided_slice %127 {offsets = [0, 5], sizes = [8, 1], strides = [1, 1]} : vector<8x8xf32> to vector<8x1xf32>
      %210 = vector.extract_strided_slice %128 {offsets = [5, 0], sizes = [1, 64], strides = [1, 1]} : vector<8x64xf32> to vector<1x64xf32>
      %211 = vector.broadcast %209 : vector<8x1xf32> to vector<8x64xf32>
      %212 = vector.broadcast %210 : vector<1x64xf32> to vector<8x64xf32>
      %213 = arith.mulf %211, %212 : vector<8x64xf32>
      %214 = arith.extf %208 : vector<8x64xbf16> to vector<8x64xf32>
      %215 = arith.mulf %214, %201 : vector<8x64xf32>
      %216 = arith.addf %215, %213 : vector<8x64xf32>
      %cst_74 = arith.constant dense<0.000000e+00> : vector<64xf32>
      %217 = vector.multi_reduction <add>, %216, %cst_74 [0] : vector<8x64xf32> to vector<64xf32>
      %218 = vector.shape_cast %217 : vector<64xf32> to vector<1x64xf32>
      %219 = vector.extract_strided_slice %121 {offsets = [6, 0], sizes = [1, 64], strides = [1, 1]} : vector<8x64xf32> to vector<1x64xf32>
      %220 = vector.broadcast %219 : vector<1x64xf32> to vector<8x64xf32>
      %221 = arith.mulf %220, %98 : vector<8x64xf32>
      %222 = arith.truncf %221 : vector<8x64xf32> to vector<8x64xbf16>
      %223 = math.exp %222 : vector<8x64xbf16>
      %224 = vector.extract_strided_slice %127 {offsets = [0, 6], sizes = [8, 1], strides = [1, 1]} : vector<8x8xf32> to vector<8x1xf32>
      %225 = vector.extract_strided_slice %128 {offsets = [6, 0], sizes = [1, 64], strides = [1, 1]} : vector<8x64xf32> to vector<1x64xf32>
      %226 = vector.broadcast %224 : vector<8x1xf32> to vector<8x64xf32>
      %227 = vector.broadcast %225 : vector<1x64xf32> to vector<8x64xf32>
      %228 = arith.mulf %226, %227 : vector<8x64xf32>
      %229 = arith.extf %223 : vector<8x64xbf16> to vector<8x64xf32>
      %230 = arith.mulf %229, %216 : vector<8x64xf32>
      %231 = arith.addf %230, %228 : vector<8x64xf32>
      %cst_75 = arith.constant dense<0.000000e+00> : vector<64xf32>
      %232 = vector.multi_reduction <add>, %231, %cst_75 [0] : vector<8x64xf32> to vector<64xf32>
      %233 = vector.shape_cast %232 : vector<64xf32> to vector<1x64xf32>
      %234 = vector.extract_strided_slice %121 {offsets = [7, 0], sizes = [1, 64], strides = [1, 1]} : vector<8x64xf32> to vector<1x64xf32>
      %235 = vector.broadcast %234 : vector<1x64xf32> to vector<8x64xf32>
      %236 = arith.mulf %235, %98 : vector<8x64xf32>
      %237 = arith.truncf %236 : vector<8x64xf32> to vector<8x64xbf16>
      %238 = math.exp %237 : vector<8x64xbf16>
      %239 = vector.extract_strided_slice %127 {offsets = [0, 7], sizes = [8, 1], strides = [1, 1]} : vector<8x8xf32> to vector<8x1xf32>
      %240 = vector.extract_strided_slice %128 {offsets = [7, 0], sizes = [1, 64], strides = [1, 1]} : vector<8x64xf32> to vector<1x64xf32>
      %241 = vector.broadcast %239 : vector<8x1xf32> to vector<8x64xf32>
      %242 = vector.broadcast %240 : vector<1x64xf32> to vector<8x64xf32>
      %243 = arith.mulf %241, %242 : vector<8x64xf32>
      %244 = arith.extf %238 : vector<8x64xbf16> to vector<8x64xf32>
      %245 = arith.mulf %244, %231 : vector<8x64xf32>
      %246 = arith.addf %245, %243 : vector<8x64xf32>
      %cst_76 = arith.constant dense<0.000000e+00> : vector<64xf32>
      %247 = vector.multi_reduction <add>, %246, %cst_76 [0] : vector<8x64xf32> to vector<64xf32>
      %248 = vector.shape_cast %247 : vector<64xf32> to vector<1x64xf32>
      %249 = tpu.concatenate %143, %158, %173, %188, %203, %218, %233, %248 in 0 : vector<1x64xf32>, vector<1x64xf32>, vector<1x64xf32>, vector<1x64xf32>, vector<1x64xf32>, vector<1x64xf32>, vector<1x64xf32>, vector<1x64xf32> -> vector<8x64xf32>
      %250 = arith.index_cast %119 : i32 to index
      %c0_77 = arith.constant 0 : index
      %251 = vector.load %arg20[%250, %c0_77] : memref<16x64xf32, #tpu.memory_space<vmem>>, vector<8x64xf32>
      tpu.vector_store %arg20[%250, %c0_77], %249 {strides = array<i32>} : memref<16x64xf32, #tpu.memory_space<vmem>>, vector<8x64xf32>,
      scf.yield %246 : vector<8x64xf32>
    }
    %c2_i32_48 = arith.constant 2 : i32
    %c0_49 = arith.constant 0 : index
    %c0_50 = arith.constant 0 : index
    %102 = vector.load %arg21[%c0_49, %c0_50] : memref<8x64xf32, #tpu.memory_space<vmem>>, vector<8x64xf32>
    tpu.vector_store %arg21[%c0_49, %c0_50], %101 {strides = array<i32>} : memref<8x64xf32, #tpu.memory_space<vmem>>, vector<8x64xf32>,
    %c0_51 = arith.constant 0 : index
    %c0_52 = arith.constant 0 : index
    %103 = vector.load %arg20[%c0_51, %c0_52] : memref<16x64xf32, #tpu.memory_space<vmem>>, vector<16x64xf32>
    %c0_53 = arith.constant 0 : index
    %c0_54 = arith.constant 0 : index
    %104 = vector.load %arg17[%c0_53, %c0_54] : memref<16x64xf32, #tpu.memory_space<vmem>>, vector<16x64xf32>
    %c0_55 = arith.constant 0 : index
    %c0_56 = arith.constant 0 : index
    %105 = vector.load %arg9[%c0_55, %c0_56] : memref<1x64xf32, #tpu.memory_space<vmem>>, vector<1x64xf32>
    %106 = vector.broadcast %105 : vector<1x64xf32> to vector<16x64xf32>
    %107 = arith.mulf %104, %106 : vector<16x64xf32>
    %108 = arith.addf %103, %107 : vector<16x64xf32>
    %109 = arith.truncf %108 : vector<16x64xf32> to vector<16x64xbf16>
    %c0_57 = arith.constant 0 : index
    %c0_58 = arith.constant 0 : index
    %110 = vector.load %arg14[%c0_57, %c0_58] : memref<64x32xbf16, #tpu.memory_space<vmem>>, vector<64x32xbf16>
    %cst_59 = arith.constant dense<0.000000e+00> : vector<16x32xf32>
    %111 = tpu.matmul %109, %110, %cst_59 {dimension_numbers = #tpu.dot_dimension_numbers<[1], [0], [0], [1], [0, 0, 1, 1], [], []>} : vector<16x64xbf16>, vector<64x32xbf16>, vector<16x32xf32> -> vector<16x32xf32>
    %c0_60 = arith.constant 0 : index
    %c0_61 = arith.constant 0 : index
    %112 = vector.load %arg15[%c0_60, %c0_61] : memref<1x32xf32, #tpu.memory_space<vmem>>, vector<1x32xf32>
    %113 = vector.broadcast %112 : vector<1x32xf32> to vector<16x32xf32>
    %114 = arith.addf %111, %113 : vector<16x32xf32>
    %c0_62 = arith.constant 0 : index
    %c0_63 = arith.constant 0 : index
    %c0_64 = arith.constant 0 : index
    %115 = vector.load %arg16[%c0_62, %c0_63, %c0_64] : memref<1x16x32xf32, #tpu.memory_space<vmem>>, vector<1x16x32xf32>
    %116 = vector.shape_cast %115 : vector<1x16x32xf32> to vector<16x32xf32>
    %117 = vector.shape_cast %114 : vector<16x32xf32> to vector<1x16x32xf32>
    tpu.vector_store %arg16[%c0_62, %c0_63, %c0_64], %117 {strides = array<i32>} : memref<1x16x32xf32, #tpu.memory_space<vmem>>, vector<1x16x32xf32>,
    return
  }
  func.func @transform_0(%arg0: i32, %arg1: i32) -> (i32, i32, i32) {
    %c0_i32 = arith.constant 0 : i32
    %c0_i32_0 = arith.constant 0 : i32
    return %arg0, %arg1, %c0_i32 : i32, i32, i32
  }
  func.func @transform_1(%arg0: i32, %arg1: i32) -> (i32, i32, i32) {
    %c1_i32 = arith.constant 1 : i32
    %0 = arith.addi %arg1, %c1_i32 : i32
    %c2_i32 = arith.constant 2 : i32
    %1 = arith.muli %0, %c2_i32 : i32
    %c3_i32 = arith.constant 3 : i32
    %2 = arith.minsi %1, %c3_i32 : i32
    %c0_i32 = arith.constant 0 : i32
    %c0_i32_0 = arith.constant 0 : i32
    return %arg0, %2, %c0_i32 : i32, i32, i32
  }
  func.func @transform_2(%arg0: i32, %arg1: i32) -> (i32, i32) {
    %c0_i32 = arith.constant 0 : i32
    %c0_i32_0 = arith.constant 0 : i32
    %c0_i32_1 = arith.constant 0 : i32
    return %c0_i32, %c0_i32_0 : i32, i32
  }
  func.func @transform_3(%arg0: i32, %arg1: i32) -> (i32, i32) {
    %c0_i32 = arith.constant 0 : i32
    %c0_i32_0 = arith.constant 0 : i32
    %c0_i32_1 = arith.constant 0 : i32
    return %c0_i32, %c0_i32_0 : i32, i32
  }
  func.func @transform_4(%arg0: i32, %arg1: i32) -> (i32, i32) {
    %c0_i32 = arith.constant 0 : i32
    %c0_i32_0 = arith.constant 0 : i32
    %c0_i32_1 = arith.constant 0 : i32
    return %c0_i32, %c0_i32_0 : i32, i32
  }
  func.func @transform_5(%arg0: i32, %arg1: i32) -> (i32, i32) {
    %c0_i32 = arith.constant 0 : i32
    %c0_i32_0 = arith.constant 0 : i32
    %c0_i32_1 = arith.constant 0 : i32
    return %c0_i32, %c0_i32_0 : i32, i32
  }
  func.func @transform_6(%arg0: i32, %arg1: i32) -> (i32, i32) {
    %c0_i32 = arith.constant 0 : i32
    %c0_i32_0 = arith.constant 0 : i32
    %c0_i32_1 = arith.constant 0 : i32
    return %c0_i32, %c0_i32_0 : i32, i32
  }
  func.func @transform_7(%arg0: i32, %arg1: i32) -> (i32, i32) {
    %c0_i32 = arith.constant 0 : i32
    %c0_i32_0 = arith.constant 0 : i32
    %c0_i32_1 = arith.constant 0 : i32
    return %c0_i32, %c0_i32_0 : i32, i32
  }
  func.func @transform_8(%arg0: i32, %arg1: i32) -> (i32, i32) {
    %c0_i32 = arith.constant 0 : i32
    %c0_i32_0 = arith.constant 0 : i32
    %c0_i32_1 = arith.constant 0 : i32
    return %c0_i32, %c0_i32_0 : i32, i32
  }
  func.func @transform_9(%arg0: i32, %arg1: i32) -> (i32, i32) {
    %c0_i32 = arith.constant 0 : i32
    %c0_i32_0 = arith.constant 0 : i32
    %c0_i32_1 = arith.constant 0 : i32
    return %c0_i32, %c0_i32_0 : i32, i32
  }
  func.func @transform_10(%arg0: i32, %arg1: i32) -> (i32, i32) {
    %c0_i32 = arith.constant 0 : i32
    %c0_i32_0 = arith.constant 0 : i32
    %c0_i32_1 = arith.constant 0 : i32
    return %c0_i32, %c0_i32_0 : i32, i32
  }
  func.func @transform_11(%arg0: i32, %arg1: i32) -> (i32, i32) {
    %c0_i32 = arith.constant 0 : i32
    %c0_i32_0 = arith.constant 0 : i32
    %c0_i32_1 = arith.constant 0 : i32
    return %c0_i32, %c0_i32_0 : i32, i32
  }
  func.func @transform_12(%arg0: i32, %arg1: i32) -> (i32, i32) {
    %c0_i32 = arith.constant 0 : i32
    %c0_i32_0 = arith.constant 0 : i32
    %c0_i32_1 = arith.constant 0 : i32
    return %c0_i32, %c0_i32_0 : i32, i32
  }
  func.func @transform_13(%arg0: i32, %arg1: i32) -> (i32, i32) {
    %c0_i32 = arith.constant 0 : i32
    %c0_i32_0 = arith.constant 0 : i32
    %c0_i32_1 = arith.constant 0 : i32
    return %c0_i32, %c0_i32_0 : i32, i32
  }
  func.func @transform_14(%arg0: i32, %arg1: i32) -> (i32, i32, i32) {
    %c0_i32 = arith.constant 0 : i32
    %c0_i32_0 = arith.constant 0 : i32
    return %arg0, %arg1, %c0_i32 : i32, i32, i32
  }
}

module attributes {stable_mosaic.version = 11 : i64} {
  func.func @mamba_block_kernel(%arg0: i32, %arg1: i32, %arg2: memref<1x16x32xf32, #tpu.memory_space<vmem>>, %arg3: memref<1x8x32xf32, #tpu.memory_space<vmem>>, %arg4: memref<32x64xbf16, #tpu.memory_space<vmem>>, %arg5: memref<1x64xf32, #tpu.memory_space<vmem>>, %arg6: memref<3x64xf32, #tpu.memory_space<vmem>>, %arg7: memref<1x64xf32, #tpu.memory_space<vmem>>, %arg8: memref<8x64xf32, #tpu.memory_space<vmem>>, %arg9: memref<1x64xf32, #tpu.memory_space<vmem>>, %arg10: memref<64x256xbf16, #tpu.memory_space<vmem>>, %arg11: memref<1x256xf32, #tpu.memory_space<vmem>>, %arg12: memref<128x64xbf16, #tpu.memory_space<vmem>>, %arg13: memref<1x64xf32, #tpu.memory_space<vmem>>, %arg14: memref<64x32xbf16, #tpu.memory_space<vmem>>, %arg15: memref<1x32xf32, #tpu.memory_space<vmem>>, %arg16: memref<1x16x32xf32, #tpu.memory_space<vmem>>, %arg17: memref<16x64xf32, #tpu.memory_space<vmem>>, %arg18: memref<16x64xf32, #tpu.memory_space<vmem>>, %arg19: memref<16x128xf32, #tpu.memory_space<vmem>>, %arg20: memref<16x64xf32, #tpu.memory_space<vmem>>, %arg21: memref<8x64xf32, #tpu.memory_space<vmem>>, %arg22: memref<1x64xf32, #tpu.memory_space<vmem>>) attributes {dimension_semantics = [#tpu.dimension_semantics<parallel>, #tpu.dimension_semantics<arbitrary>], iteration_bounds = array<i64: 2, 2>, scalar_prefetch = 0 : i64, scratch_operands = 6 : i64, tpu.core_type = #tpu.core_type<tc>, window_params = [{transform_indices = @transform_0, window_bounds = array<i64: 1, 16, 32>}, {transform_indices = @transform_1, window_bounds = array<i64: 1, 8, 32>}, {pipeline_mode = #tpu.pipeline_mode<synchronous>, transform_indices = @transform_2, window_bounds = array<i64: 32, 64>}, {pipeline_mode = #tpu.pipeline_mode<synchronous>, transform_indices = @transform_3, window_bounds = array<i64: 1, 64>}, {pipeline_mode = #tpu.pipeline_mode<synchronous>, transform_indices = @transform_4, window_bounds = array<i64: 3, 64>}, {pipeline_mode = #tpu.pipeline_mode<synchronous>, transform_indices = @transform_5, window_bounds = array<i64: 1, 64>}, {pipeline_mode = #tpu.pipeline_mode<synchronous>, transform_indices = @transform_6, window_bounds = array<i64: 8, 64>}, {pipeline_mode = #tpu.pipeline_mode<synchronous>, transform_indices = @transform_7, window_bounds = array<i64: 1, 64>}, {pipeline_mode = #tpu.pipeline_mode<synchronous>, transform_indices = @transform_8, window_bounds = array<i64: 64, 256>}, {pipeline_mode = #tpu.pipeline_mode<synchronous>, transform_indices = @transform_9, window_bounds = array<i64: 1, 256>}, {pipeline_mode = #tpu.pipeline_mode<synchronous>, transform_indices = @transform_10, window_bounds = array<i64: 128, 64>}, {pipeline_mode = #tpu.pipeline_mode<synchronous>, transform_indices = @transform_11, window_bounds = array<i64: 1, 64>}, {pipeline_mode = #tpu.pipeline_mode<synchronous>, transform_indices = @transform_12, window_bounds = array<i64: 64, 32>}, {pipeline_mode = #tpu.pipeline_mode<synchronous>, transform_indices = @transform_13, window_bounds = array<i64: 1, 32>}, {transform_indices = @transform_14, window_bounds = array<i64: 1, 16, 32>}]} {
    %c0_i32 = arith.constant 0 : i32
    %0 = arith.cmpi eq, %arg1, %c0_i32 : i32
    %1 = arith.extui %0 : i1 to i32
    %c0_i32_0 = arith.constant 0 : i32
    %2 = arith.cmpi ne, %1, %c0_i32_0 : i32
    scf.if %2 {
      %cst_65 = arith.constant 0.000000e+00 : f32
      %118 = vector.broadcast %cst_65 : f32 to vector<8x64xf32>
      %c0_66 = arith.constant 0 : index
      %c0_67 = arith.constant 0 : index
      %119 = vector.load %arg21[%c0_66, %c0_67] : memref<8x64xf32, #tpu.memory_space<vmem>>, vector<8x64xf32>
      tpu.vector_store %arg21[%c0_66, %c0_67], %118 {strides = array<i32>} : memref<8x64xf32, #tpu.memory_space<vmem>>, vector<8x64xf32>,
      %cst_68 = arith.constant 0.000000e+00 : f32
      %120 = vector.broadcast %cst_68 : f32 to vector<1x64xf32>
      %c0_69 = arith.constant 0 : index
      %c0_70 = arith.constant 0 : index
      %121 = vector.load %arg22[%c0_69, %c0_70] : memref<1x64xf32, #tpu.memory_space<vmem>>, vector<1x64xf32>
      tpu.vector_store %arg22[%c0_69, %c0_70], %120 {strides = array<i32>} : memref<1x64xf32, #tpu.memory_space<vmem>>, vector<1x64xf32>,
    } else {
    }
    %c0 = arith.constant 0 : index
    %c0_1 = arith.constant 0 : index
    %c0_2 = arith.constant 0 : index
    %3 = vector.load %arg2[%c0, %c0_1, %c0_2] : memref<1x16x32xf32, #tpu.memory_space<vmem>>, vector<1x16x32xf32>
    %4 = vector.shape_cast %3 : vector<1x16x32xf32> to vector<16x32xf32>
    %c0_3 = arith.constant 0 : index
    %c0_4 = arith.constant 0 : index
    %c0_5 = arith.constant 0 : index
    %5 = vector.load %arg3[%c0_3, %c0_4, %c0_5] : memref<1x8x32xf32, #tpu.memory_space<vmem>>, vector<1x8x32xf32>
    %6 = vector.shape_cast %5 : vector<1x8x32xf32> to vector<8x32xf32>
    %7 = tpu.concatenate %4, %6 in 0 : vector<16x32xf32>, vector<8x32xf32> -> vector<24x32xf32>
    %8 = arith.truncf %7 : vector<24x32xf32> to vector<24x32xbf16>
    %c0_6 = arith.constant 0 : index
    %c0_7 = arith.constant 0 : index
    %9 = vector.load %arg4[%c0_6, %c0_7] : memref<32x64xbf16, #tpu.memory_space<vmem>>, vector<32x64xbf16>
    %cst = arith.constant dense<0.000000e+00> : vector<24x64xf32>
    %10 = tpu.matmul %8, %9, %cst {dimension_numbers = #tpu.dot_dimension_numbers<[1], [0], [0], [1], [0, 0, 1, 1], [], []>} : vector<24x32xbf16>, vector<32x64xbf16>, vector<24x64xf32> -> vector<24x64xf32>
    %c0_8 = arith.constant 0 : index
    %c0_9 = arith.constant 0 : index
    %11 = vector.load %arg5[%c0_8, %c0_9] : memref<1x64xf32, #tpu.memory_space<vmem>>, vector<1x64xf32>
    %12 = vector.broadcast %11 : vector<1x64xf32> to vector<24x64xf32>
    %13 = arith.addf %10, %12 : vector<24x64xf32>
    %14 = vector.extract_strided_slice %13 {offsets = [0, 0], sizes = [16, 64], strides = [1, 1]} : vector<24x64xf32> to vector<16x64xf32>
    %c1_i32 = arith.constant 1 : i32
    %15 = arith.cmpi slt, %arg1, %c1_i32 : i32
    %16 = arith.extui %15 : i1 to i32
    %17 = arith.sitofp %16 : i32 to f32
    %18 = vector.extract_strided_slice %13 {offsets = [16, 0], sizes = [1, 64], strides = [1, 1]} : vector<24x64xf32> to vector<1x64xf32>
    %19 = vector.broadcast %17 : f32 to vector<1x64xf32>
    %20 = arith.mulf %18, %19 : vector<1x64xf32>
    %21 = tpu.iota {dimensions = array<i32: 0>} : vector<16x1xi32>
    %c0_10 = arith.constant 0 : index
    %c0_11 = arith.constant 0 : index
    %22 = vector.load %arg22[%c0_10, %c0_11] : memref<1x64xf32, #tpu.memory_space<vmem>>, vector<1x64xf32>
    %23 = vector.shape_cast %22 : vector<1x64xf32> to vector<1x64xf32>
    %24 = vector.broadcast %23 : vector<1x64xf32> to vector<16x64xf32>
    %25 = vector.shape_cast %20 : vector<1x64xf32> to vector<1x64xf32>
    %26 = vector.broadcast %25 : vector<1x64xf32> to vector<16x64xf32>
    %c0_i32_12 = arith.constant 0 : i32
    %27 = vector.broadcast %c0_i32_12 : i32 to vector<16x1xi32>
    %28 = arith.cmpi eq, %21, %27 : vector<16x1xi32>
    %c1_i32_13 = arith.constant 1 : i32
    %29 = tpu.dynamic_rotate %14 by %c1_i32_13 dim 0 : vector<16x64xf32>, i32 -> vector<16x64xf32>
    %30 = vector.shape_cast %28 : vector<16x1xi1> to vector<16x1xi1>
    %31 = vector.broadcast %30 : vector<16x1xi1> to vector<16x64xi1>
    %32 = arith.select %31, %24, %29 : vector<16x64xi1>, vector<16x64xf32>
    %c15_i32 = arith.constant 15 : i32
    %33 = vector.broadcast %c15_i32 : i32 to vector<16x1xi32>
    %34 = arith.cmpi eq, %21, %33 : vector<16x1xi32>
    %c15_i32_14 = arith.constant 15 : i32
    %35 = tpu.dynamic_rotate %14 by %c15_i32_14 dim 0 : vector<16x64xf32>, i32 -> vector<16x64xf32>
    %36 = vector.shape_cast %34 : vector<16x1xi1> to vector<16x1xi1>
    %37 = vector.broadcast %36 : vector<16x1xi1> to vector<16x64xi1>
    %38 = arith.select %37, %26, %35 : vector<16x64xi1>, vector<16x64xf32>
    %39 = vector.extract_strided_slice %14 {offsets = [15, 0], sizes = [1, 64], strides = [1, 1]} : vector<16x64xf32> to vector<1x64xf32>
    %c0_15 = arith.constant 0 : index
    %c0_16 = arith.constant 0 : index
    %40 = vector.load %arg22[%c0_15, %c0_16] : memref<1x64xf32, #tpu.memory_space<vmem>>, vector<1x64xf32>
    tpu.vector_store %arg22[%c0_15, %c0_16], %39 {strides = array<i32>} : memref<1x64xf32, #tpu.memory_space<vmem>>, vector<1x64xf32>,
    %c0_17 = arith.constant 0 : index
    %c0_18 = arith.constant 0 : index
    %41 = vector.load %arg6[%c0_17, %c0_18] : memref<3x64xf32, #tpu.memory_space<vmem>>, vector<1x64xf32>
    %42 = vector.broadcast %41 : vector<1x64xf32> to vector<16x64xf32>
    %43 = arith.mulf %32, %42 : vector<16x64xf32>
    %c1 = arith.constant 1 : index
    %c0_19 = arith.constant 0 : index
    %44 = vector.load %arg6[%c1, %c0_19] : memref<3x64xf32, #tpu.memory_space<vmem>>, vector<1x64xf32>
    %45 = vector.broadcast %44 : vector<1x64xf32> to vector<16x64xf32>
    %46 = arith.mulf %14, %45 : vector<16x64xf32>
    %47 = arith.addf %43, %46 : vector<16x64xf32>
    %c2 = arith.constant 2 : index
    %c0_20 = arith.constant 0 : index
    %48 = vector.load %arg6[%c2, %c0_20] : memref<3x64xf32, #tpu.memory_space<vmem>>, vector<1x64xf32>
    %49 = vector.broadcast %48 : vector<1x64xf32> to vector<16x64xf32>
    %50 = arith.mulf %38, %49 : vector<16x64xf32>
    %51 = arith.addf %47, %50 : vector<16x64xf32>
    %c0_21 = arith.constant 0 : index
    %c0_22 = arith.constant 0 : index
    %52 = vector.load %arg7[%c0_21, %c0_22] : memref<1x64xf32, #tpu.memory_space<vmem>>, vector<1x64xf32>
    %53 = vector.broadcast %52 : vector<1x64xf32> to vector<16x64xf32>
    %54 = arith.addf %51, %53 : vector<16x64xf32>
    %55 = arith.negf %54 : vector<16x64xf32>
    %56 = math.exp %55 : vector<16x64xf32>
    %cst_23 = arith.constant 1.000000e+00 : f32
    %57 = vector.broadcast %cst_23 : f32 to vector<16x64xf32>
    %58 = arith.addf %57, %56 : vector<16x64xf32>
    %59 = arith.divf %57, %58 : vector<16x64xf32>
    %60 = arith.mulf %54, %59 : vector<16x64xf32>
    %c0_24 = arith.constant 0 : index
    %c0_25 = arith.constant 0 : index
    %61 = vector.load %arg17[%c0_24, %c0_25] : memref<16x64xf32, #tpu.memory_space<vmem>>, vector<16x64xf32>
    tpu.vector_store %arg17[%c0_24, %c0_25], %60 {strides = array<i32>} : memref<16x64xf32, #tpu.memory_space<vmem>>, vector<16x64xf32>,
    %62 = arith.truncf %60 : vector<16x64xf32> to vector<16x64xbf16>
    %c0_26 = arith.constant 0 : index
    %c0_27 = arith.constant 0 : index
    %63 = vector.load %arg10[%c0_26, %c0_27] : memref<64x256xbf16, #tpu.memory_space<vmem>>, vector<64x256xbf16>
    %cst_28 = arith.constant dense<0.000000e+00> : vector<16x256xf32>
    %64 = tpu.matmul %62, %63, %cst_28 {dimension_numbers = #tpu.dot_dimension_numbers<[1], [0], [0], [1], [0, 0, 1, 1], [], []>} : vector<16x64xbf16>, vector<64x256xbf16>, vector<16x256xf32> -> vector<16x256xf32>
    %c0_29 = arith.constant 0 : index
    %c0_30 = arith.constant 0 : index
    %65 = vector.load %arg11[%c0_29, %c0_30] : memref<1x256xf32, #tpu.memory_space<vmem>>, vector<1x256xf32>
    %66 = vector.broadcast %65 : vector<1x256xf32> to vector<16x256xf32>
    %67 = arith.addf %64, %66 : vector<16x256xf32>
    %68 = vector.extract_strided_slice %67 {offsets = [0, 0], sizes = [16, 128], strides = [1, 1]} : vector<16x256xf32> to vector<16x128xf32>
    %69 = vector.extract_strided_slice %67 {offsets = [0, 128], sizes = [16, 128], strides = [1, 1]} : vector<16x256xf32> to vector<16x128xf32>
    %c0_31 = arith.constant 0 : index
    %c0_32 = arith.constant 0 : index
    %70 = vector.load %arg19[%c0_31, %c0_32] : memref<16x128xf32, #tpu.memory_space<vmem>>, vector<16x128xf32>
    tpu.vector_store %arg19[%c0_31, %c0_32], %69 {strides = array<i32>} : memref<16x128xf32, #tpu.memory_space<vmem>>, vector<16x128xf32>,
    %71 = arith.truncf %68 : vector<16x128xf32> to vector<16x128xbf16>
    %c0_33 = arith.constant 0 : index
    %c0_34 = arith.constant 0 : index
    %72 = vector.load %arg12[%c0_33, %c0_34] : memref<128x64xbf16, #tpu.memory_space<vmem>>, vector<128x64xbf16>
    %cst_35 = arith.constant dense<0.000000e+00> : vector<16x64xf32>
    %73 = tpu.matmul %71, %72, %cst_35 {dimension_numbers = #tpu.dot_dimension_numbers<[1], [0], [0], [1], [0, 0, 1, 1], [], []>} : vector<16x128xbf16>, vector<128x64xbf16>, vector<16x64xf32> -> vector<16x64xf32>
    %c0_36 = arith.constant 0 : index
    %c0_37 = arith.constant 0 : index
    %74 = vector.load %arg13[%c0_36, %c0_37] : memref<1x64xf32, #tpu.memory_space<vmem>>, vector<1x64xf32>
    %75 = vector.broadcast %74 : vector<1x64xf32> to vector<16x64xf32>
    %76 = arith.addf %73, %75 : vector<16x64xf32>
    %cst_38 = arith.constant 0.000000e+00 : f32
    %77 = vector.broadcast %cst_38 : f32 to vector<16x64xf32>
    %78 = arith.maximumf %76, %77 : vector<16x64xf32>
    %79 = vector.broadcast %cst_38 : f32 to vector<16x64xf32>
    %80 = arith.subf %76, %79 : vector<16x64xf32>
    %81 = arith.cmpf one, %80, %80 : vector<16x64xf32>
    %82 = vector.broadcast %cst_38 : f32 to vector<16x64xf32>
    %83 = arith.addf %76, %82 : vector<16x64xf32>
    %84 = math.absf %80 : vector<16x64xf32>
    %cst_39 = arith.constant 0.000000e+00 : f32
    %85 = vector.broadcast %cst_39 : f32 to vector<16x64xf32>
    %86 = arith.subf %85, %84 : vector<16x64xf32>
    %87 = math.exp %86 : vector<16x64xf32>
    %88 = math.log1p %87 : vector<16x64xf32>
    %89 = arith.addf %78, %88 : vector<16x64xf32>
    %90 = arith.select %81, %83, %89 : vector<16x64xi1>, vector<16x64xf32>
    %c0_40 = arith.constant 0 : index
    %c0_41 = arith.constant 0 : index
    %91 = vector.load %arg18[%c0_40, %c0_41] : memref<16x64xf32, #tpu.memory_space<vmem>>, vector<16x64xf32>
    tpu.vector_store %arg18[%c0_40, %c0_41], %90 {strides = array<i32>} : memref<16x64xf32, #tpu.memory_space<vmem>>, vector<16x64xf32>,
    %92 = tpu.iota {dimensions = array<i32: 0>} : vector<8x128xi32>
    %93 = tpu.iota {dimensions = array<i32: 1>} : vector<8x128xi32>
    %94 = arith.cmpi eq, %92, %93 : vector<8x128xi32>
    %95 = arith.extui %94 : vector<8x128xi1> to vector<8x128xi32>
    %96 = arith.sitofp %95 : vector<8x128xi32> to vector<8x128xf32>
    %97 = arith.truncf %96 : vector<8x128xf32> to vector<8x128xbf16>
    %c0_42 = arith.constant 0 : index
    %c0_43 = arith.constant 0 : index
    %98 = vector.load %arg8[%c0_42, %c0_43] : memref<8x64xf32, #tpu.memory_space<vmem>>, vector<8x64xf32>
    %c0_44 = arith.constant 0 : index
    %c0_45 = arith.constant 0 : index
    %99 = vector.load %arg21[%c0_44, %c0_45] : memref<8x64xf32, #tpu.memory_space<vmem>>, vector<8x64xf32>
    %c0_i32_46 = arith.constant 0 : i32
    %c2_i32 = arith.constant 2 : i32
    %100 = arith.addi %c0_i32_46, %c2_i32 : i32
    %c1_i32_47 = arith.constant 1 : i32
    %101 = scf.for %arg23 = %c0_i32_46 to %100 step %c1_i32_47 iter_args(%arg24 = %99) -> (vector<8x64xf32>)  : i32 {
      %c8_i32 = arith.constant 8 : i32
      %118 = arith.muli %arg23, %c8_i32 : i32
      %119 = tpu.assume_multiple %118, 8 : i32
      %120 = arith.index_cast %119 : i32 to index
      %c0_65 = arith.constant 0 : index
      %121 = vector.load %arg18[%120, %c0_65] : memref<16x64xf32, #tpu.memory_space<vmem>>, vector<8x64xf32>
      %122 = arith.index_cast %119 : i32 to index
      %c0_66 = arith.constant 0 : index
      %123 = vector.load %arg17[%122, %c0_66] : memref<16x64xf32, #tpu.memory_space<vmem>>, vector<8x64xf32>
      %124 = arith.index_cast %119 : i32 to index
      %c0_67 = arith.constant 0 : index
      %125 = vector.load %arg19[%124, %c0_67] : memref<16x128xf32, #tpu.memory_space<vmem>>, vector<8x128xf32>
      %126 = arith.truncf %125 : vector<8x128xf32> to vector<8x128xbf16>
      %cst_68 = arith.constant dense<0.000000e+00> : vector<8x8xf32>
      %127 = tpu.matmul %97, %126, %cst_68 {dimension_numbers = #tpu.dot_dimension_numbers<[1], [1], [0], [0], [0, 0, 1, 0], [], []>} : vector<8x128xbf16>, vector<8x128xbf16>, vector<8x8xf32> -> vector<8x8xf32>
      %128 = arith.mulf %121, %123 : vector<8x64xf32>
      %129 = vector.extract_strided_slice %121 {offsets = [0, 0], sizes = [1, 64], strides = [1, 1]} : vector<8x64xf32> to vector<1x64xf32>
      %130 = vector.broadcast %129 : vector<1x64xf32> to vector<8x64xf32>
      %131 = arith.mulf %130, %98 : vector<8x64xf32>
      %132 = arith.truncf %131 : vector<8x64xf32> to vector<8x64xbf16>
      %133 = math.exp %132 : vector<8x64xbf16>
      %134 = vector.extract_strided_slice %127 {offsets = [0, 0], sizes = [8, 1], strides = [1, 1]} : vector<8x8xf32> to vector<8x1xf32>
      %135 = vector.extract_strided_slice %128 {offsets = [0, 0], sizes = [1, 64], strides = [1, 1]} : vector<8x64xf32> to vector<1x64xf32>
      %136 = vector.broadcast %134 : vector<8x1xf32> to vector<8x64xf32>
      %137 = vector.broadcast %135 : vector<1x64xf32> to vector<8x64xf32>
      %138 = arith.mulf %136, %137 : vector<8x64xf32>
      %139 = arith.extf %133 : vector<8x64xbf16> to vector<8x64xf32>
      %140 = arith.mulf %139, %arg24 : vector<8x64xf32>
      %141 = arith.addf %140, %138 : vector<8x64xf32>
      %cst_69 = arith.constant dense<0.000000e+00> : vector<64xf32>
      %142 = vector.multi_reduction <add>, %141, %cst_69 [0] : vector<8x64xf32> to vector<64xf32>
      %143 = vector.shape_cast %142 : vector<64xf32> to vector<1x64xf32>
      %144 = vector.extract_strided_slice %121 {offsets = [1, 0], sizes = [1, 64], strides = [1, 1]} : vector<8x64xf32> to vector<1x64xf32>
      %145 = vector.broadcast %144 : vector<1x64xf32> to vector<8x64xf32>
      %146 = arith.mulf %145, %98 : vector<8x64xf32>
      %147 = arith.truncf %146 : vector<8x64xf32> to vector<8x64xbf16>
      %148 = math.exp %147 : vector<8x64xbf16>
      %149 = vector.extract_strided_slice %127 {offsets = [0, 1], sizes = [8, 1], strides = [1, 1]} : vector<8x8xf32> to vector<8x1xf32>
      %150 = vector.extract_strided_slice %128 {offsets = [1, 0], sizes = [1, 64], strides = [1, 1]} : vector<8x64xf32> to vector<1x64xf32>
      %151 = vector.broadcast %149 : vector<8x1xf32> to vector<8x64xf32>
      %152 = vector.broadcast %150 : vector<1x64xf32> to vector<8x64xf32>
      %153 = arith.mulf %151, %152 : vector<8x64xf32>
      %154 = arith.extf %148 : vector<8x64xbf16> to vector<8x64xf32>
      %155 = arith.mulf %154, %141 : vector<8x64xf32>
      %156 = arith.addf %155, %153 : vector<8x64xf32>
      %cst_70 = arith.constant dense<0.000000e+00> : vector<64xf32>
      %157 = vector.multi_reduction <add>, %156, %cst_70 [0] : vector<8x64xf32> to vector<64xf32>
      %158 = vector.shape_cast %157 : vector<64xf32> to vector<1x64xf32>
      %159 = vector.extract_strided_slice %121 {offsets = [2, 0], sizes = [1, 64], strides = [1, 1]} : vector<8x64xf32> to vector<1x64xf32>
      %160 = vector.broadcast %159 : vector<1x64xf32> to vector<8x64xf32>
      %161 = arith.mulf %160, %98 : vector<8x64xf32>
      %162 = arith.truncf %161 : vector<8x64xf32> to vector<8x64xbf16>
      %163 = math.exp %162 : vector<8x64xbf16>
      %164 = vector.extract_strided_slice %127 {offsets = [0, 2], sizes = [8, 1], strides = [1, 1]} : vector<8x8xf32> to vector<8x1xf32>
      %165 = vector.extract_strided_slice %128 {offsets = [2, 0], sizes = [1, 64], strides = [1, 1]} : vector<8x64xf32> to vector<1x64xf32>
      %166 = vector.broadcast %164 : vector<8x1xf32> to vector<8x64xf32>
      %167 = vector.broadcast %165 : vector<1x64xf32> to vector<8x64xf32>
      %168 = arith.mulf %166, %167 : vector<8x64xf32>
      %169 = arith.extf %163 : vector<8x64xbf16> to vector<8x64xf32>
      %170 = arith.mulf %169, %156 : vector<8x64xf32>
      %171 = arith.addf %170, %168 : vector<8x64xf32>
      %cst_71 = arith.constant dense<0.000000e+00> : vector<64xf32>
      %172 = vector.multi_reduction <add>, %171, %cst_71 [0] : vector<8x64xf32> to vector<64xf32>
      %173 = vector.shape_cast %172 : vector<64xf32> to vector<1x64xf32>
      %174 = vector.extract_strided_slice %121 {offsets = [3, 0], sizes = [1, 64], strides = [1, 1]} : vector<8x64xf32> to vector<1x64xf32>
      %175 = vector.broadcast %174 : vector<1x64xf32> to vector<8x64xf32>
      %176 = arith.mulf %175, %98 : vector<8x64xf32>
      %177 = arith.truncf %176 : vector<8x64xf32> to vector<8x64xbf16>
      %178 = math.exp %177 : vector<8x64xbf16>
      %179 = vector.extract_strided_slice %127 {offsets = [0, 3], sizes = [8, 1], strides = [1, 1]} : vector<8x8xf32> to vector<8x1xf32>
      %180 = vector.extract_strided_slice %128 {offsets = [3, 0], sizes = [1, 64], strides = [1, 1]} : vector<8x64xf32> to vector<1x64xf32>
      %181 = vector.broadcast %179 : vector<8x1xf32> to vector<8x64xf32>
      %182 = vector.broadcast %180 : vector<1x64xf32> to vector<8x64xf32>
      %183 = arith.mulf %181, %182 : vector<8x64xf32>
      %184 = arith.extf %178 : vector<8x64xbf16> to vector<8x64xf32>
      %185 = arith.mulf %184, %171 : vector<8x64xf32>
      %186 = arith.addf %185, %183 : vector<8x64xf32>
      %cst_72 = arith.constant dense<0.000000e+00> : vector<64xf32>
      %187 = vector.multi_reduction <add>, %186, %cst_72 [0] : vector<8x64xf32> to vector<64xf32>
      %188 = vector.shape_cast %187 : vector<64xf32> to vector<1x64xf32>
      %189 = vector.extract_strided_slice %121 {offsets = [4, 0], sizes = [1, 64], strides = [1, 1]} : vector<8x64xf32> to vector<1x64xf32>
      %190 = vector.broadcast %189 : vector<1x64xf32> to vector<8x64xf32>
      %191 = arith.mulf %190, %98 : vector<8x64xf32>
      %192 = arith.truncf %191 : vector<8x64xf32> to vector<8x64xbf16>
      %193 = math.exp %192 : vector<8x64xbf16>
      %194 = vector.extract_strided_slice %127 {offsets = [0, 4], sizes = [8, 1], strides = [1, 1]} : vector<8x8xf32> to vector<8x1xf32>
      %195 = vector.extract_strided_slice %128 {offsets = [4, 0], sizes = [1, 64], strides = [1, 1]} : vector<8x64xf32> to vector<1x64xf32>
      %196 = vector.broadcast %194 : vector<8x1xf32> to vector<8x64xf32>
      %197 = vector.broadcast %195 : vector<1x64xf32> to vector<8x64xf32>
      %198 = arith.mulf %196, %197 : vector<8x64xf32>
      %199 = arith.extf %193 : vector<8x64xbf16> to vector<8x64xf32>
      %200 = arith.mulf %199, %186 : vector<8x64xf32>
      %201 = arith.addf %200, %198 : vector<8x64xf32>
      %cst_73 = arith.constant dense<0.000000e+00> : vector<64xf32>
      %202 = vector.multi_reduction <add>, %201, %cst_73 [0] : vector<8x64xf32> to vector<64xf32>
      %203 = vector.shape_cast %202 : vector<64xf32> to vector<1x64xf32>
      %204 = vector.extract_strided_slice %121 {offsets = [5, 0], sizes = [1, 64], strides = [1, 1]} : vector<8x64xf32> to vector<1x64xf32>
      %205 = vector.broadcast %204 : vector<1x64xf32> to vector<8x64xf32>
      %206 = arith.mulf %205, %98 : vector<8x64xf32>
      %207 = arith.truncf %206 : vector<8x64xf32> to vector<8x64xbf16>
      %208 = math.exp %207 : vector<8x64xbf16>
      %209 = vector.extract_strided_slice %127 {offsets = [0, 5], sizes = [8, 1], strides = [1, 1]} : vector<8x8xf32> to vector<8x1xf32>
      %210 = vector.extract_strided_slice %128 {offsets = [5, 0], sizes = [1, 64], strides = [1, 1]} : vector<8x64xf32> to vector<1x64xf32>
      %211 = vector.broadcast %209 : vector<8x1xf32> to vector<8x64xf32>
      %212 = vector.broadcast %210 : vector<1x64xf32> to vector<8x64xf32>
      %213 = arith.mulf %211, %212 : vector<8x64xf32>
      %214 = arith.extf %208 : vector<8x64xbf16> to vector<8x64xf32>
      %215 = arith.mulf %214, %201 : vector<8x64xf32>
      %216 = arith.addf %215, %213 : vector<8x64xf32>
      %cst_74 = arith.constant dense<0.000000e+00> : vector<64xf32>
      %217 = vector.multi_reduction <add>, %216, %cst_74 [0] : vector<8x64xf32> to vector<64xf32>
      %218 = vector.shape_cast %217 : vector<64xf32> to vector<1x64xf32>
      %219 = vector.extract_strided_slice %121 {offsets = [6, 0], sizes = [1, 64], strides = [1, 1]} : vector<8x64xf32> to vector<1x64xf32>
      %220 = vector.broadcast %219 : vector<1x64xf32> to vector<8x64xf32>
      %221 = arith.mulf %220, %98 : vector<8x64xf32>
      %222 = arith.truncf %221 : vector<8x64xf32> to vector<8x64xbf16>
      %223 = math.exp %222 : vector<8x64xbf16>
      %224 = vector.extract_strided_slice %127 {offsets = [0, 6], sizes = [8, 1], strides = [1, 1]} : vector<8x8xf32> to vector<8x1xf32>
      %225 = vector.extract_strided_slice %128 {offsets = [6, 0], sizes = [1, 64], strides = [1, 1]} : vector<8x64xf32> to vector<1x64xf32>
      %226 = vector.broadcast %224 : vector<8x1xf32> to vector<8x64xf32>
      %227 = vector.broadcast %225 : vector<1x64xf32> to vector<8x64xf32>
      %228 = arith.mulf %226, %227 : vector<8x64xf32>
      %229 = arith.extf %223 : vector<8x64xbf16> to vector<8x64xf32>
      %230 = arith.mulf %229, %216 : vector<8x64xf32>
      %231 = arith.addf %230, %228 : vector<8x64xf32>
      %cst_75 = arith.constant dense<0.000000e+00> : vector<64xf32>
      %232 = vector.multi_reduction <add>, %231, %cst_75 [0] : vector<8x64xf32> to vector<64xf32>
      %233 = vector.shape_cast %232 : vector<64xf32> to vector<1x64xf32>
      %234 = vector.extract_strided_slice %121 {offsets = [7, 0], sizes = [1, 64], strides = [1, 1]} : vector<8x64xf32> to vector<1x64xf32>
      %235 = vector.broadcast %234 : vector<1x64xf32> to vector<8x64xf32>
      %236 = arith.mulf %235, %98 : vector<8x64xf32>
      %237 = arith.truncf %236 : vector<8x64xf32> to vector<8x64xbf16>
      %238 = math.exp %237 : vector<8x64xbf16>
      %239 = vector.extract_strided_slice %127 {offsets = [0, 7], sizes = [8, 1], strides = [1, 1]} : vector<8x8xf32> to vector<8x1xf32>
      %240 = vector.extract_strided_slice %128 {offsets = [7, 0], sizes = [1, 64], strides = [1, 1]} : vector<8x64xf32> to vector<1x64xf32>
      %241 = vector.broadcast %239 : vector<8x1xf32> to vector<8x64xf32>
      %242 = vector.broadcast %240 : vector<1x64xf32> to vector<8x64xf32>
      %243 = arith.mulf %241, %242 : vector<8x64xf32>
      %244 = arith.extf %238 : vector<8x64xbf16> to vector<8x64xf32>
      %245 = arith.mulf %244, %231 : vector<8x64xf32>
      %246 = arith.addf %245, %243 : vector<8x64xf32>
      %cst_76 = arith.constant dense<0.000000e+00> : vector<64xf32>
      %247 = vector.multi_reduction <add>, %246, %cst_76 [0] : vector<8x64xf32> to vector<64xf32>
      %248 = vector.shape_cast %247 : vector<64xf32> to vector<1x64xf32>
      %249 = tpu.concatenate %143, %158, %173, %188, %203, %218, %233, %248 in 0 : vector<1x64xf32>, vector<1x64xf32>, vector<1x64xf32>, vector<1x64xf32>, vector<1x64xf32>, vector<1x64xf32>, vector<1x64xf32>, vector<1x64xf32> -> vector<8x64xf32>
      %250 = arith.index_cast %119 : i32 to index
      %c0_77 = arith.constant 0 : index
      %251 = vector.load %arg20[%250, %c0_77] : memref<16x64xf32, #tpu.memory_space<vmem>>, vector<8x64xf32>
      tpu.vector_store %arg20[%250, %c0_77], %249 {strides = array<i32>} : memref<16x64xf32, #tpu.memory_space<vmem>>, vector<8x64xf32>,
      scf.yield %246 : vector<8x64xf32>
    }
    %c2_i32_48 = arith.constant 2 : i32
    %c0_49 = arith.constant 0 : index
    %c0_50 = arith.constant 0 : index
    %102 = vector.load %arg21[%c0_49, %c0_50] : memref<8x64xf32, #tpu.memory_space<vmem>>, vector<8x64xf32>
    tpu.vector_store %arg21[%c0_49, %c0_50], %101 {strides = array<i32>} : memref<8x64xf32, #tpu.memory_space<vmem>>, vector<8x64xf32>,
    %c0_51 = arith.constant 0 : index
    %c0_52 = arith.constant 0 : index
    %103 = vector.load %arg20[%c0_51, %c0_52] : memref<16x64xf32, #tpu.memory_space<vmem>>, vector<16x64xf32>
    %c0_53 = arith.constant 0 : index
    %c0_54 = arith.constant 0 : index
    %104 = vector.load %arg17[%c0_53, %c0_54] : memref<16x64xf32, #tpu.memory_space<vmem>>, vector<16x64xf32>
    %c0_55 = arith.constant 0 : index
    %c0_56 = arith.constant 0 : index
    %105 = vector.load %arg9[%c0_55, %c0_56] : memref<1x64xf32, #tpu.memory_space<vmem>>, vector<1x64xf32>
    %106 = vector.broadcast %105 : vector<1x64xf32> to vector<16x64xf32>
    %107 = arith.mulf %104, %106 : vector<16x64xf32>
    %108 = arith.addf %103, %107 : vector<16x64xf32>
    %109 = arith.truncf %108 : vector<16x64xf32> to vector<16x64xbf16>
    %c0_57 = arith.constant 0 : index
    %c0_58 = arith.constant 0 : index
    %110 = vector.load %arg14[%c0_57, %c0_58] : memref<64x32xbf16, #tpu.memory_space<vmem>>, vector<64x32xbf16>
    %cst_59 = arith.constant dense<0.000000e+00> : vector<16x32xf32>
    %111 = tpu.matmul %109, %110, %cst_59 {dimension_numbers = #tpu.dot_dimension_numbers<[1], [0], [0], [1], [0, 0, 1, 1], [], []>} : vector<16x64xbf16>, vector<64x32xbf16>, vector<16x32xf32> -> vector<16x32xf32>
    %c0_60 = arith.constant 0 : index
    %c0_61 = arith.constant 0 : index
    %112 = vector.load %arg15[%c0_60, %c0_61] : memref<1x32xf32, #tpu.memory_space<vmem>>, vector<1x32xf32>
    %113 = vector.broadcast %112 : vector<1x32xf32> to vector<16x32xf32>
    %114 = arith.addf %111, %113 : vector<16x32xf32>
    %c0_62 = arith.constant 0 : index
    %c0_63 = arith.constant 0 : index
    %c0_64 = arith.constant 0 : index
    %115 = vector.load %arg16[%c0_62, %c0_63, %c0_64] : memref<1x16x32xf32, #tpu.memory_space<vmem>>, vector<1x16x32xf32>
    %116 = vector.shape_cast %115 : vector<1x16x32xf32> to vector<16x32xf32>
    %117 = vector.shape_cast %114 : vector<16x32xf32> to vector<1x16x32xf32>
    tpu.vector_store %arg16[%c0_62, %c0_63, %c0_64], %117 {strides = array<i32>} : memref<1x16x32xf32, #tpu.memory_space<vmem>>, vector<1x16x32xf32>,
    return
  }
  func.func @transform_0(%arg0: i32, %arg1: i32) -> (i32, i32, i32) {
    %c0_i32 = arith.constant 0 : i32
    %c0_i32_0 = arith.constant 0 : i32
    return %arg0, %arg1, %c0_i32 : i32, i32, i32
  }
  func.func @transform_1(%arg0: i32, %arg1: i32) -> (i32, i32, i32) {
    %c1_i32 = arith.constant 1 : i32
    %0 = arith.addi %arg1, %c1_i32 : i32
    %c2_i32 = arith.constant 2 : i32
    %1 = arith.muli %0, %c2_i32 : i32
    %c3_i32 = arith.constant 3 : i32
    %2 = arith.minsi %1, %c3_i32 : i32
    %c0_i32 = arith.constant 0 : i32
    %c0_i32_0 = arith.constant 0 : i32
    return %arg0, %2, %c0_i32 : i32, i32, i32
  }
  func.func @transform_2(%arg0: i32, %arg1: i32) -> (i32, i32) {
    %c0_i32 = arith.constant 0 : i32
    %c0_i32_0 = arith.constant 0 : i32
    %c0_i32_1 = arith.constant 0 : i32
    return %c0_i32, %c0_i32_0 : i32, i32
  }
  func.func @transform_3(%arg0: i32, %arg1: i32) -> (i32, i32) {
    %c0_i32 = arith.constant 0 : i32
    %c0_i32_0 = arith.constant 0 : i32
    %c0_i32_1 = arith.constant 0 : i32
    return %c0_i32, %c0_i32_0 : i32, i32
  }
  func.func @transform_4(%arg0: i32, %arg1: i32) -> (i32, i32) {
    %c0_i32 = arith.constant 0 : i32
    %c0_i32_0 = arith.constant 0 : i32
    %c0_i32_1 = arith.constant 0 : i32
    return %c0_i32, %c0_i32_0 : i32, i32
  }
  func.func @transform_5(%arg0: i32, %arg1: i32) -> (i32, i32) {
    %c0_i32 = arith.constant 0 : i32
    %c0_i32_0 = arith.constant 0 : i32
    %c0_i32_1 = arith.constant 0 : i32
    return %c0_i32, %c0_i32_0 : i32, i32
  }
  func.func @transform_6(%arg0: i32, %arg1: i32) -> (i32, i32) {
    %c0_i32 = arith.constant 0 : i32
    %c0_i32_0 = arith.constant 0 : i32
    %c0_i32_1 = arith.constant 0 : i32
    return %c0_i32, %c0_i32_0 : i32, i32
  }
  func.func @transform_7(%arg0: i32, %arg1: i32) -> (i32, i32) {
    %c0_i32 = arith.constant 0 : i32
    %c0_i32_0 = arith.constant 0 : i32
    %c0_i32_1 = arith.constant 0 : i32
    return %c0_i32, %c0_i32_0 : i32, i32
  }
  func.func @transform_8(%arg0: i32, %arg1: i32) -> (i32, i32) {
    %c0_i32 = arith.constant 0 : i32
    %c0_i32_0 = arith.constant 0 : i32
    %c0_i32_1 = arith.constant 0 : i32
    return %c0_i32, %c0_i32_0 : i32, i32
  }
  func.func @transform_9(%arg0: i32, %arg1: i32) -> (i32, i32) {
    %c0_i32 = arith.constant 0 : i32
    %c0_i32_0 = arith.constant 0 : i32
    %c0_i32_1 = arith.constant 0 : i32
    return %c0_i32, %c0_i32_0 : i32, i32
  }
  func.func @transform_10(%arg0: i32, %arg1: i32) -> (i32, i32) {
    %c0_i32 = arith.constant 0 : i32
    %c0_i32_0 = arith.constant 0 : i32
    %c0_i32_1 = arith.constant 0 : i32
    return %c0_i32, %c0_i32_0 : i32, i32
  }
  func.func @transform_11(%arg0: i32, %arg1: i32) -> (i32, i32) {
    %c0_i32 = arith.constant 0 : i32
    %c0_i32_0 = arith.constant 0 : i32
    %c0_i32_1 = arith.constant 0 : i32
    return %c0_i32, %c0_i32_0 : i32, i32
  }
  func.func @transform_12(%arg0: i32, %arg1: i32) -> (i32, i32) {
    %c0_i32 = arith.constant 0 : i32
    %c0_i32_0 = arith.constant 0 : i32
    %c0_i32_1 = arith.constant 0 : i32
    return %c0_i32, %c0_i32_0 : i32, i32
  }
  func.func @transform_13(%arg0: i32, %arg1: i32) -> (i32, i32) {
    %c0_i32 = arith.constant 0 : i32
    %c0_i32_0 = arith.constant 0 : i32
    %c0_i32_1 = arith.constant 0 : i32
    return %c0_i32, %c0_i32_0 : i32, i32
  }
  func.func @transform_14(%arg0: i32, %arg1: i32) -> (i32, i32, i32) {
    %c0_i32 = arith.constant 0 : i32
    %c0_i32_0 = arith.constant 0 : i32
    return %arg0, %arg1, %c0_i32 : i32, i32, i32
  }
}

</mosaic_0001>

<bundles_post_ra>
// kernel: tpu_custom_call.1
= control target key start
LH: loop header
LB: loop body
LE: loop exit
PB: predicated region body
PF: predicated region fallthrough
CT: control target
= control target key end

     0   :  { %s3031_s0 = inlined_call_operand.vmem [shape: f32[2,32,32], index: 0, kind: input, shape index: {}]   ;;  %s3032_s1 = inlined_call_operand.vmem [shape: f32[2,32,32], index: 1, kind: input, shape index: {}]   ;;  %s3033_s2 = inlined_call_operand.hbm [shape: bf16[32,64], index: 2, kind: input, shape index: {}]   ;;  %s3034_s3 = inlined_call_operand.hbm [shape: f32[1,64], index: 3, kind: input, shape index: {}]   ;;  %s3035_s4 = inlined_call_operand.hbm [shape: f32[3,64], index: 4, kind: input, shape index: {}]   ;;  %s3036_s5 = inlined_call_operand.hbm [shape: f32[1,64], index: 5, kind: input, shape index: {}]   ;;  %s3037_s6 = inlined_call_operand.hbm [shape: f32[8,64], index: 6, kind: input, shape index: {}]   ;;  %s3038_s7 = inlined_call_operand.hbm [shape: f32[1,64], index: 7, kind: input, shape index: {}]   ;;  %s3039_s8 = inlined_call_operand.hbm [shape: bf16[64,256], index: 8, kind: input, shape index: {}]   ;;  %s3040_s9 = inlined_call_operand.vmem [shape: f32[1,256], index: 9, kind: input, shape index: {}]   ;;  %s3041_s10 = inlined_call_operand.vmem [shape: bf16[128,64], index: 10, kind: input, shape index: {}]   ;;  %s3042_s11 = inlined_call_operand.vmem [shape: f32[1,64], index: 11, kind: input, shape index: {}]   ;;  %s3043_s12 = inlined_call_operand.vmem [shape: bf16[64,32], index: 12, kind: input, shape index: {}]   ;;  %s3044_s13 = inlined_call_operand.vmem [shape: f32[1,32], index: 13, kind: input, shape index: {}]   ;;  %s3045_s14 = inlined_call_operand.hbm [shape: f32[2,32,32], index: 14, kind: output, shape index: {}]  }
   0x1   :  { %3063 = sst [smem:[#allocation36_spill]] %s3034_s3 }
   0x2   :  { %3064 = sst [smem:[#allocation37_spill]] %s3036_s5 }
   0x3   :  { %3065 = sst [smem:[#allocation38_spill]] %s3038_s7 }
   0x4   :  { %3066 = sst [smem:[#allocation39_spill]] %s3042_s11 }
   0x5   :  { %3067 = sst [smem:[#allocation40_spill]] %s3043_s12 }
   0x6   :  { %3068 = sst [smem:[#allocation41_spill]] %s3044_s13 }
   0x7   :  { %3069 = sst [smem:[#allocation42_spill]] %s3045_s14 }
   0x8   :  { %19 = vsyncpa [#allocation9], 0 }
   0x9   :  { %20 = vsyncpa [#allocation12], 0 }
   0xa   :  { %21 = vsyncpa [#allocation15], 0 }
   0xb   :  { %22 = vsyncpa [#allocation18], 0 }
   0xc   :  { %23 = vsyncpa [#allocation10], 0 }
   0xd   :  { %25 = vsyncpa [#allocation10 + $0x1], 0  ;;  %s2531_s29 = smov 0   ;;  %s2533_s30 = smov 0  }
   0xe   :  { %s2535_s15 = smov 0   ;;  %s2537_s16 = smov 0  }
   0xf   :  { %s2539_s17 = smov 0   ;;  %s2541_s18 = smov 0  }
  0x10   :  { %s2543_s19 = smov 0   ;;  %s2545_s20 = smov 0  }
  0x11 LB: > { %3070 = sst [smem:[#allocation26_spill]] %s2389_s29  ;;  %s1706_s21 = sadd.s32 4294967295, %s2417_s20   ;;  %s2417_s20 = sphi %s2545_s20, %s31_s20   ;;  %s2413_s19 = sphi %s2543_s19, %s3107_s19   ;;  %s2409_s18 = sphi %s2541_s18, %s3106_s18   ;;  %s2405_s17 = sphi %s2539_s17, %s3105_s17   ;;  %s2401_s16 = sphi %s2537_s16, %s3104_s16   ;;  %s2397_s15 = sphi %s2535_s15, %s3103_s15   ;;  %s2393_s30 = sphi %s2533_s30, %s3109_s30   ;;  %s2389_s29 = sphi %s2531_s29, %s3108_s29  }
  0x12   : > { %3071 = sst [smem:[#allocation27_spill]] %s2397_s15  ;;  %s1707_s22 = sadd.s32 4294967294, %s2417_s20  }
  0x13   : > { %3072 = sst [smem:[#allocation28_spill]] %s2409_s18  ;;  %s40_s23 = sadd.s32 1, %s2409_s18 }
  0x14   : > { %3073 = sst [smem:[#allocation29_spill]] %s2413_s19  ;;  %s43_s24 = sadd.s32 1, %s2413_s19 }
  0x15   : > { %3074 = sst [smem:[#allocation30_spill]] %s2417_s20  ;;  %p41_p0 = scmp.ge.s32.totalorder %s40_s23, 2 }
  0x16   : > { %s368_s25 = sadd.s32 1, %s2397_s15  ;;  %p378_p1 = scmp.ne.s32.totalorder %s2397_s15, %s2393_s30 }
  0x17   : > { %p379_p2 = scmp.eq.s32.totalorder %s1706_s21, 3  ;;  %s3111_s23 = smov (%p41_p0, %s40_s23), 0 }
  0x18   : > { %3075 = sst [smem:[#allocation31_spill]] %s3111_s23  ;;  %s3113_s24 = smov (!%p41_p0, %s43_s24), %s2413_s19 }
  0x19   : > { %s364_s26 = ssub.s32 %s2409_s18, %s3111_s23  ;;  %p2583_p3 = por %p379_p2, %p378_p1 }
  0x1a   : > { %p45_p4 = scmp.ge.s32.totalorder %s3113_s24, 2  ;;  %p384_p5 = scmp.ne.s32.totalorder %s2393_s30, %s2389_s29 }
  0x1b   : > { %s3076_s27 = scalar_select %p2583_p3, 1, 0 }
  0x1c   : > { %p385_p6 = scmp.eq.s32.totalorder %s1707_s22, 3  ;;  %p1710_p7 = scmp.ge.s32.totalorder %s2417_s20, 1 }
  0x1d   : > { %3077 = sst [smem:[#allocation32_spill]] %s3076_s27  ;;  %s3115_s24 = smov (%p45_p4, %s3113_s24), 0 }
  0x1e   : > { %3078 = sst [smem:[#allocation33_spill]] %s3115_s24  ;;  %p2592_p8 = por %p385_p6, %p384_p5 }
  0x1f   : > { %p392_p9 = scmp.lt.s32.totalorder %s2417_s20, 5  ;;  %s363_s14 = ssub.s32 %s2413_s19, %s3115_s24 }
  0x20   : > { %s3079_s28 = scalar_select %p2592_p8, 1, 0 }
  0x21   : > { %s365_s13 = sor.u32 %s364_s26, %s363_s14  ;;  %p2599_p10 = pnand %p1710_p7, %p392_p9 }
  0x22   : > { %3080 = sst [smem:[#allocation34_spill]] %s3079_s28  ;;  %p366_p11 = scmp.eq.s32.totalorder %s365_s13, 0 }
  0x23   : > { %s3081_s23 = scalar_select %p2599_p10, 1, 0 }
  0x24   : > { %p2603_p12 = scmp.eq.s32.totalorder %s1706_s21, 0  ;;  %p1887_p13 = pneg %p2599_p10 }
  0x25   : > { %s2610_s22 = scalar_select %p366_p11, %s2397_s15, %s368_s25  }
  0x26   : > { %s3082_s18 = scalar_select %p2603_p12, 1, 0 }
  0x27   : > { %3083 = sst [smem:[#allocation35_spill]] %s2610_s22  ;;  %p2614_p0 = pnand %p2603_p12, %p1887_p13 }
  0x28   : > { %s2427_s14 = smov [#allocation11]   ;;  %s2428_s24 = smov [#allocation14]  }
  0x29   : > { %s418_s26 = sshll.u32 %s2427_s14, 4  ;;  %s440_s13 = sshll.u32 %s2428_s24, 4  ;;  %s419_s26 = int_to_ptr.vmem [resolvable:$true] %s418_s26  ;;  %s441_s13 = int_to_ptr.vmem [resolvable:$true] %s440_s13 }
  0x2a   : > { %s3085_s3 = sld [smem:[#allocation36_spill]]  ;;  %p2626_p2 = pneg %p2614_p0 }
  0x30   : > { %s2103_s29 = scalar_lea.hbm %s3085_s3, 16 }
  0x31   : > { %p2104_p1 = scmp.ne.s32.totalorder %s3085_s3, %s2103_s29  ;;  %p2110_p6 = scmp.lt.u32.totalorder %s2103_s29, %s3085_s3 }
  0x33   : > { %p2106_p4 = pnand %p2626_p2, %p2104_p1 }
  0x35   : > { %p2107_p5 = pneg %p2106_p4 }
  0x37   : > { %p2112_p7 = pnand %p2110_p6, %p2107_p5 }
  0x39   : > { %2115 = shalt.err (!%p2112_p7)
}
  0x3a   : > { %s2116_s19 = scalar_lea.vmem %s419_s26, 16  ;;  %s2123_s20 = scalar_lea.vmem %s419_s26, 32 }
  0x3b   : > { %p2117_p9 = scmp.ne.s32.totalorder %s419_s26, %s2116_s19  ;;  %p2124_p8 = scmp.lt.s32.totalorder %s419_s26, %s419_s26 }
  0x3c   : > { %p2125_p3 = scmp.lt.s32.totalorder %s2123_s20, %s2116_s19 }
  0x3d   : > { %p2119_p11 = pnand %p2117_p9, %p2626_p2 }
  0x3e   : > { %p2126_p12 = por %p2125_p3, %p2124_p8 }
  0x3f   : > { %p2120_p13 = pneg %p2119_p11 }
  0x41   : > { %p2127_p10 = pnand %p2126_p12, %p2120_p13 }
  0x43   : > { %2130 = shalt.err (!%p2127_p10)
}
  0x44   : > { %1893 = dma.hbm_to_vmem [thread:$0]  (!%p2614_p0), %s3085_s3, 16, %s419_s26, [#allocation12]  }
  0x45   : > { %s3087_s5 = sld [smem:[#allocation37_spill]] }
  0x4b   : > { %s2131_s21 = scalar_lea.hbm %s3087_s5, 16 }
  0x4c   : > { %p2132_p1 = scmp.ne.s32.totalorder %s3087_s5, %s2131_s21  ;;  %p2138_p10 = scmp.lt.u32.totalorder %s2131_s21, %s3087_s5 }
  0x4e   : > { %p2134_p3 = pnand %p2132_p1, %p2626_p2 }
  0x50   : > { %p2135_p8 = pneg %p2134_p3 }
  0x52   : > { %p2140_p12 = pnand %p2138_p10, %p2135_p8 }
  0x54   : > { %2143 = shalt.err (!%p2140_p12)
}
  0x55   : > { %s2144_s24 = scalar_lea.vmem %s441_s13, 16  ;;  %s2151_s26 = scalar_lea.vmem %s441_s13, 32 }
  0x56   : > { %p2145_p4 = scmp.ne.s32.totalorder %s441_s13, %s2144_s24  ;;  %p2152_p7 = scmp.lt.s32.totalorder %s441_s13, %s441_s13 }
  0x57   : > { %p2153_p9 = scmp.lt.s32.totalorder %s2151_s26, %s2144_s24 }
  0x58   : > { %p2147_p5 = pnand %p2145_p4, %p2626_p2 }
  0x59   : > { %p2154_p11 = por %p2153_p9, %p2152_p7 }
  0x5a   : > { %p2148_p6 = pneg %p2147_p5 }
  0x5c   : > { %p2155_p13 = pnand %p2154_p11, %p2148_p6 }
  0x5e   : > { %2158 = shalt.err (!%p2155_p13)
}
  0x5f   : > { %1899 = dma.hbm_to_vmem [thread:$0]  (!%p2614_p0), %s3087_s5, 16, %s441_s13, [#allocation15]  }
  0x60   : > { %s2429_s29 = smov [#allocation17]   ;;  %s3088_s7 = sld [smem:[#allocation38_spill]] }
  0x61   : > { %s462_s22 = sshll.u32 %s2429_s29, 4  ;;  %s463_s22 = int_to_ptr.vmem [resolvable:$true] %s462_s22 }
  0x66   : > { %s2159_s19 = scalar_lea.hbm %s3088_s7, 16 }
  0x67   : > { %p2160_p1 = scmp.ne.s32.totalorder %s3088_s7, %s2159_s19  ;;  %p2166_p10 = scmp.lt.u32.totalorder %s2159_s19, %s3088_s7 }
  0x69   : > { %p2162_p3 = pnand %p2160_p1, %p2626_p2 }
  0x6b   : > { %p2163_p8 = pneg %p2162_p3 }
  0x6d   : > { %p2168_p12 = pnand %p2166_p10, %p2163_p8 }
  0x6f   : > { %2171 = shalt.err (!%p2168_p12)
}
  0x70   : > { %s2172_s13 = scalar_lea.vmem %s463_s22, 16  ;;  %s2179_s15 = scalar_lea.vmem %s463_s22, 32 }
  0x71   : > { %p2173_p4 = scmp.ne.s32.totalorder %s463_s22, %s2172_s13  ;;  %p2180_p7 = scmp.lt.s32.totalorder %s463_s22, %s463_s22 }
  0x72   : > { %p2181_p9 = scmp.lt.s32.totalorder %s2179_s15, %s2172_s13 }
  0x73   : > { %p2175_p5 = pnand %p2173_p4, %p2626_p2 }
  0x74   : > { %p2182_p11 = por %p2181_p9, %p2180_p7 }
  0x75   : > { %p2176_p6 = pneg %p2175_p5 }
  0x77   : > { %p2183_p13 = pnand %p2182_p11, %p2176_p6 }
  0x79   : > { %2186 = shalt.err (!%p2183_p13)
}
  0x7a   : > { %1905 = dma.hbm_to_vmem [thread:$0]  (!%p2614_p0), %s3088_s7, 16, %s463_s22, [#allocation18]  }
  0x7b   : > { %s2430_s29 = smov [#allocation8]   ;;  %s2187_s20 = scalar_lea.hbm %s3033_s2, 256 }
  0x7c   : > { %s404_s21 = sshll.u32 %s2430_s29, 4  ;;  %p2188_p1 = scmp.ne.s32.totalorder %s3033_s2, %s2187_s20  ;;  %s405_s21 = int_to_ptr.vmem [resolvable:$true] %s404_s21 }
  0x7d   : > { %p2194_p10 = scmp.lt.u32.totalorder %s2187_s20, %s3033_s2 }
  0x7e   : > { %p2190_p3 = pnand %p2188_p1, %p2626_p2 }
  0x80   : > { %p2191_p8 = pneg %p2190_p3 }
  0x82   : > { %p2196_p12 = pnand %p2194_p10, %p2191_p8 }
  0x84   : > { %2199 = shalt.err (!%p2196_p12)
}
  0x85   : > { %s2200_s22 = scalar_lea.vmem %s405_s21, 256  ;;  %p2208_p7 = scmp.lt.s32.totalorder %s405_s21, %s405_s21 }
  0x86   : > { %p2201_p4 = scmp.ne.s32.totalorder %s405_s21, %s2200_s22  ;;  %p2209_p9 = scmp.lt.s32.totalorder %s2200_s22, %s2200_s22 }
  0x88   : > { %p2203_p5 = pnand %p2201_p4, %p2626_p2  ;;  %p2210_p11 = por %p2209_p9, %p2208_p7 }
  0x8a   : > { %p2204_p6 = pneg %p2203_p5 }
  0x8c   : > { %p2211_p13 = pnand %p2210_p11, %p2204_p6 }
  0x8e   : > { %2214 = shalt.err (!%p2211_p13)
}
  0x8f   : > { %s2431_s3 = smov 64   ;;  %s2432_s27 = smov 4  }
  0x90   : > { %1890 = dma.hbm_to_vmem [thread:$0]  (!%p2614_p0), %s3033_s2, 256, %s405_s21, [#allocation9], %s2431_s3, %s2431_s3, %s2432_s27  }
  0x91   : > { %s2433_s19 = smov [#allocation13]   ;;  %s2434_s24 = smov [#allocation16]  }
  0x92   : > { %s429_s20 = sshll.u32 %s2433_s19, 4  ;;  %s451_s26 = sshll.u32 %s2434_s24, 4  ;;  %s430_s20 = int_to_ptr.vmem [resolvable:$true] %s429_s20  ;;  %s452_s26 = int_to_ptr.vmem [resolvable:$true] %s451_s26 }
  0x93   : > { %s2215_s22 = scalar_lea.hbm %s3035_s4, 64 }
  0x94   : > { %p2216_p1 = scmp.ne.s32.totalorder %s3035_s4, %s2215_s22  ;;  %p2222_p10 = scmp.lt.u32.totalorder %s2215_s22, %s3035_s4 }
  0x96   : > { %p2218_p3 = pnand %p2216_p1, %p2626_p2 }
  0x98   : > { %p2219_p8 = pneg %p2218_p3 }
  0x9a   : > { %p2224_p12 = pnand %p2222_p10, %p2219_p8 }
  0x9c   : > { %2227 = shalt.err (!%p2224_p12)
}
  0x9d   : > { %s2228_s21 = scalar_lea.vmem %s430_s20, 64  ;;  %p2236_p7 = scmp.lt.s32.totalorder %s430_s20, %s430_s20 }
  0x9e   : > { %p2229_p4 = scmp.ne.s32.totalorder %s430_s20, %s2228_s21  ;;  %p2237_p9 = scmp.lt.s32.totalorder %s2228_s21, %s2228_s21 }
  0xa0   : > { %p2231_p5 = pnand %p2229_p4, %p2626_p2  ;;  %p2238_p11 = por %p2237_p9, %p2236_p7 }
  0xa2   : > { %p2232_p6 = pneg %p2231_p5 }
  0xa4   : > { %p2239_p13 = pnand %p2238_p11, %p2232_p6 }
  0xa6   : > { %2242 = shalt.err (!%p2239_p13)
}
  0xa7   : > { %1896 = dma.hbm_to_vmem [thread:$0]  (!%p2614_p0), %s3035_s4, 64, %s430_s20, [#allocation12]  }
  0xa8   : > { %s2243_s3 = scalar_lea.hbm %s3037_s6, 128 }
  0xa9   : > { %p2244_p1 = scmp.ne.s32.totalorder %s3037_s6, %s2243_s3  ;;  %p2250_p10 = scmp.lt.u32.totalorder %s2243_s3, %s3037_s6 }
  0xab   : > { %p2246_p3 = pnand %p2244_p1, %p2626_p2 }
  0xad   : > { %p2247_p8 = pneg %p2246_p3 }
  0xaf   : > { %p2252_p12 = pnand %p2250_p10, %p2247_p8 }
  0xb1   : > { %2255 = shalt.err (!%p2252_p12)
}
  0xb2   : > { %s2256_s24 = scalar_lea.vmem %s452_s26, 128  ;;  %p2264_p7 = scmp.lt.s32.totalorder %s452_s26, %s452_s26 }
  0xb3   : > { %p2257_p4 = scmp.ne.s32.totalorder %s452_s26, %s2256_s24  ;;  %p2265_p9 = scmp.lt.s32.totalorder %s2256_s24, %s2256_s24 }
  0xb5   : > { %p2259_p5 = pnand %p2257_p4, %p2626_p2  ;;  %p2266_p11 = por %p2265_p9, %p2264_p7 }
  0xb7   : > { %p2260_p6 = pneg %p2259_p5 }
  0xb9   : > { %p2267_p13 = pnand %p2266_p11, %p2260_p6 }
  0xbb   : > { %2270 = shalt.err (!%p2267_p13)
}
  0xbc   : > { %1902 = dma.hbm_to_vmem [thread:$0]  (!%p2614_p0), %s3037_s6, 128, %s452_s26, [#allocation15]  }
  0xbd   : > { %s2435_s15 = smov [#allocation19]   ;;  %s2271_s7 = scalar_lea.hbm %s3039_s8, 1024 }
  0xbe   : > { %s472_s22 = sshll.u32 %s2435_s15, 4  ;;  %p2272_p1 = scmp.ne.s32.totalorder %s3039_s8, %s2271_s7  ;;  %s473_s22 = int_to_ptr.vmem [resolvable:$true] %s472_s22 }
  0xbf   : > { %p2278_p10 = scmp.lt.u32.totalorder %s2271_s7, %s3039_s8 }
  0xc0   : > { %p2274_p3 = pnand %p2272_p1, %p2626_p2 }
  0xc2   : > { %p2275_p8 = pneg %p2274_p3 }
  0xc4   : > { %p2280_p12 = pnand %p2278_p10, %p2275_p8 }
  0xc6   : > { %2283 = shalt.err (!%p2280_p12)
}
  0xc7   : > { %s2284_s26 = scalar_lea.vmem %s473_s22, 1024  ;;  %p2292_p7 = scmp.lt.s32.totalorder %s473_s22, %s473_s22 }
  0xc8   : > { %p2285_p4 = scmp.ne.s32.totalorder %s473_s22, %s2284_s26  ;;  %p2293_p9 = scmp.lt.s32.totalorder %s2284_s26, %s2284_s26 }
  0xca   : > { %p2287_p5 = pnand %p2285_p4, %p2626_p2  ;;  %p2294_p11 = por %p2293_p9, %p2292_p7 }
  0xcc   : > { %p2288_p6 = pneg %p2287_p5 }
  0xce   : > { %p2295_p13 = pnand %p2294_p11, %p2288_p6 }
  0xd0   : > { %2298 = shalt.err (!%p2295_p13)
}
  0xd1   : > { %s2436_s29 = smov 128   ;;  %s2437_s14 = smov 8  }
  0xd2   : > { %1908 = dma.hbm_to_vmem [thread:$0]  (!%p2614_p0), %s3039_s8, 1024, %s473_s22, [#allocation18], %s2436_s29, %s2436_s29, %s2437_s14  }
  0xd3   : > { %p3089_p1 = scmp.ne.s32.totalorder %s3081_s23, 0 }
  0xd4   : > { %p3090_p3 = scmp.ne.s32.totalorder (!%p3089_p1), %s3082_s18, 0 }
  0xd5   : > { %535 = sbr.rel (%p3089_p1) target bundleno = 1626 (0x65a), region = 76 }
  0xdc   : > { %2368 = dma.done.wait (%p3090_p3), [#allocation9], 256  }
  0xdd   : > { %2370 = vsyncadd (%p3090_p3), [#allocation9], 4294967040 }
  0xde   : > { %2372 = dma.done.wait (%p3090_p3), [#allocation12], 80  }
  0xdf   : > { %2374 = vsyncadd (%p3090_p3), [#allocation12], 4294967216 }
  0xe0   : > { %2376 = dma.done.wait (%p3090_p3), [#allocation15], 144  }
  0xe1   : > { %2378 = vsyncadd (%p3090_p3), [#allocation15], 4294967152 }
  0xe2   : > { %2380 = dma.done.wait (%p3090_p3), [#allocation18], 1040  }
  0xe3   : > { %2382 = vsyncadd (%p3090_p3), [#allocation18], 4294966256  ;;  %s618_s23 = sand.u32 1, %s2393_s30   ;;  %s2770_s28 = sshll.u32 %s2401_s16, 1 }
  0xe4   : > { %s1727_s25 = sshll.u32 %s618_s23, 4  ;;  %p622_p0 = scmp.lt.s32.totalorder %s2405_s17, 1 }
  0xe5   : > { %p624_p2 = scmp.lt.s32.totalorder %s2770_s28, 3  ;;  %s1790_s18 = sadd.s32 2, %s2770_s28 }
  0xe6   : > { %s623_s20 = scalar_select %p622_p0, %s2405_s17, 1 }
  0xe7   : > { %s625_s13 = scalar_select %p624_p2, %s2770_s28, 3 }
  0xe8   : > { %s1729_s15 = sshll.u32 %s623_s20, 2  ;;  %p633_p8 = scmp.lt.s32.totalorder %s1790_s18, 3 }
  0xe9   : > { %s627_s22 = sadd.s32 %s1729_s15, %s625_s13  ;;  %s2785_s14 = scalar_lea.vmem [#allocation20], %s1727_s25 }
  0xea   : > { %s1730_s21 = sshll.u32 %s627_s22, 3  ;;  %s3117_s18 = smov (!%p633_p8, %s1790_s18), 3 }
  0xeb   : > { %s629_s11 = scalar_lea.vmem %s3031_s0, %s1730_s21  ;;  %s3119_s18 = smov (!%p633_p8, %s3117_s18), 3 }
  0xec   : > { %s640_s12 = sadd.s32 %s1729_s15, %s3119_s18  ;;  %p1737_p10 = scmp.ne.s32.totalorder %s2401_s16, 0 }
  0xed   : > { %s1736_s3 = sshll.u32 %s640_s12, 3  ;;  %vm653_vm0 = vcmask (!%p1737_p10), 523264   ;;  %vm655_vm1 = vcmask (!%p1737_p10), 516096   ;;  %v2438_v0 = vmov (!%p1737_p10), 0.0  }
  0xee   : > { %s642_s29 = scalar_lea.vmem %s3032_s1, %s1736_s3  ;;  %652 = sbr.rel (%p1737_p10) target bundleno = 245 (0xf5), region = 108  ;;  %654 = vst.msk [vmem:[#allocation6] sm:$0xff] (!%p1737_p10), %vm653_vm0, %v2438_v0 }
  0xef   : > { %656 = vst.msk [vmem:[#allocation7] sm:$0x1] (!%p1737_p10), %vm655_vm1, %v2438_v0 }
  0xf5 PF: > { %v2036_v1 = vld [vmem:[#allocation8] sm:$0xff]   ;;  %v2037_v2 = vld [vmem:[#allocation8 + $0x8] sm:$0xff]   ;;  %v657_v3 = vld [vmem:[%s629_s11] sm:$0xff]  ;;  %vm685_vm2 = vcmask 261120   ;;  %v745_v8 = vlaneseq  ;;  %v2439_v16 = vmov 0   ;;  %v2440_v21 = vmov 0.0  }
  0xf6   : > { %1811 = vmatprep.subr.bf16.mxu1 %v2036_v1  ;;  %v658_v4 = vld [vmem:[%s629_s11 + $0x8] sm:$0xff]  ;;  %v659_v5 = vld [vmem:[%s642_s29] sm:$0xff]  ;;  %1819 = vmatprep.subr.bf16.mxu0 %v2440_v21  ;;  %v2052_v23 = vld [vmem:[%s3041_s10 + $0x10] sm:$0xff]   ;;  %p740_p12 = scmp.lt.s32.totalorder %s2401_s16, 1  ;;  %vm785_vm4 = vcmask 523271   ;;  %vm835_vm9 = vcmask 523264  }
  0xf7   : > { %1812 = vmatpush3.bf16.msra.mxu1 %v2036_v1  ;;  %v660_v6 = vpack.c.bf16 %v658_v4, %v657_v3  ;;  %v661_v7 = vpack.c.bf16 %v659_v5, %v659_v5  ;;  %v2790_v9 = vshrl.u32 %v745_v8, 7  ;;  %v2792_v10 = vand.u32 127, %v745_v8  ;;  %v2040_v11 = vld [vmem:[#allocation19 + $0x4] ss:$8 sps:$4 sm:$0xff]   ;;  %v2038_v12 = vld [vmem:[#allocation19] ss:$8 sps:$4 sm:$0xff]  }
  0xf8   : > { %1813 = vmatprep.subr.bf16.mxu1 %v2037_v2  ;;  %v2043_v13 = vld [vmem:[#allocation19 + $0x14] ss:$8 sps:$4 sm:$0xff]   ;;  %v2041_v14 = vld [vmem:[#allocation19 + $0x10] ss:$8 sps:$4 sm:$0xff]   ;;  %v2046_v15 = vld [vmem:[#allocation19 + $0x24] ss:$8 sps:$4 sm:$0xff]  }
  0xf9   : > { %1815 = vmatprep.mubr.msk.bf16.mxu1 %vm685_vm2, %v660_v6  ;;  %vm1100_vm3 = vcmp.eq.s32.totalorder %v2790_v9, %v2792_v10  ;;  %v2044_v17 = vld [vmem:[#allocation19 + $0x20] ss:$8 sps:$4 sm:$0xff]   ;;  %v2049_v18 = vld [vmem:[#allocation19 + $0x34] ss:$8 sps:$4 sm:$0xff]   ;;  %v2047_v19 = vld [vmem:[#allocation19 + $0x30] ss:$8 sps:$4 sm:$0xff]  }
  0xfa   : > { %v2050_v20 = vld [vmem:[%s3041_s10] sm:$0xff]   ;;  %v2051_v22 = vld [vmem:[%s3041_s10 + $0x8] sm:$0xff]   ;;  %v2053_v24 = vld [vmem:[%s3041_s10 + $0x18] sm:$0xff]   ;;  %s741_s12 = scalar_select %p740_p12, 1, 0  ;;  %v747_v32 = vadd.s32 8, %v2790_v9 }
  0xfb   : > { %1814 = vmatpush3.bf16.msra.mxu1 %v2037_v2  ;;  %1820 = vmatpush3.bf16.msra.mxu0 %v2050_v20  ;;  %v2054_v25 = vld [vmem:[%s3041_s10 + $0x20] sm:$0xff]   ;;  %v2055_v26 = vld [vmem:[%s3041_s10 + $0x28] sm:$0xff]   ;;  %v1738_v27 = vld [vmem:[#allocation11] ss:$0 sm:$0xff]  ;;  %v2824_v36 = vsub.s32 0, %v2790_v9  ;;  %vm759_vm5 = vcmp.eq.s32.totalorder %v2790_v9, 0 }
  0xfc   : > { %902 = vmatprep.subr.bf16.mxu1 %v2040_v11  ;;  %1821 = vmatprep.subr.bf16.mxu0 %v2440_v21  ;;  %s742_s3 = scvt.s32.f32 %s741_s12  ;;  %v1743_v38 = vld [vmem:[#allocation7] ss:$0 sm:$0xff]  ;;  %vm763_vm6 = vcmp.lt.s32.totalorder %v2790_v9, 1  ;;  %vm773_vm7 = vcmp.eq.s32.totalorder %v747_v32, 15  ;;  %vm776_vm8 = vcmp.lt.s32.totalorder %v2790_v9, 7  ;;  %vm2441_vm10 = vmmov 0  }
  0xfd   : > { %v1744_v44 = vld [vmem:[#allocation13] ss:$0 sm:$0xff]  ;;  %v1745_v46 = vld [vmem:[#allocation13 + $0x1] ss:$0 sm:$0xff]  ;;  %v1746_v47 = vld [vmem:[#allocation13 + $0x2] ss:$0 sm:$0xff]  ;;  %1835 = vmatprep.mubr.msk.bf16.mxu0 %vm2441_vm10, %v2440_v21 }
  0xfe   : > { %1816 = vmatmul.mubr.msk.bf16.vlgmr.msra.gmra.mrb[0].mxu1 %vm685_vm2, %v661_v7  ;;  %v743_v29 = vstv %s742_s3  ;;  %v1747_v62 = vld [vmem:[#allocation14] ss:$0 sm:$0xff]  ;;  %v2853_v32 = vld [vmem:[#allocation16] sm:$0xff]  ;;  %s3091_s13 = sld [smem:[#allocation39_spill]]  ;;  %s2862_s15 = smov 0  }
  0xff   : > { %903 = vmatpush1.bf16.msra.mxu1 %v2038_v12  ;;  %934 = vmatprep.mubr.bf16.mxu1 %v2439_v16  ;;  %v2056_v16 = vld [vmem:[%s3041_s10 + $0x30] sm:$0xff]  }
 0x100   : > { %904 = vmatprep.subr.bf16.mxu1 %v2043_v13  ;;  %1822 = vmatpush3.bf16.msra.mxu0 %v2051_v22 }
 0x101   : > { %1823 = vmatprep.subr.bf16.mxu0 %v2440_v21 }
 0x103   : > { %905 = vmatpush1.bf16.msra.mxu1 %v2041_v14 }
 0x104   : > { %906 = vmatprep.subr.bf16.mxu1 %v2046_v15  ;;  %1824 = vmatpush3.bf16.msra.mxu0 %v2052_v23 }
 0x105   : > { %1825 = vmatprep.subr.bf16.mxu0 %v2440_v21 }
 0x107   : > { %907 = vmatpush1.bf16.msra.mxu1 %v2044_v17  ;;  %v2057_v17 = vld [vmem:[%s3041_s10 + $0x38] sm:$0xff]  }
 0x108   : > { %908 = vmatprep.subr.bf16.mxu1 %v2049_v18  ;;  %1826 = vmatpush3.bf16.msra.mxu0 %v2053_v24  ;;  %v2846_v18 = vsub.s32 1, %v2790_v9 }
 0x109   : > { %1827 = vmatprep.subr.bf16.mxu0 %v2440_v21 }
 0x10b   : > { %909 = vmatpush1.bf16.msra.mxu1 %v2047_v19  ;;  %v847_v19 = vld [vmem:[%s3040_s9] sm:$0x3] }
 0x10c   : > { %1828 = vmatpush3.bf16.msra.mxu0 %v2054_v25  ;;  %v856_v20 = vrot.slane %v847_v19, %v2846_v18  ;;  %v852_v22 = vrot.slane %v847_v19, %v2824_v36 }
 0x10d   : > { %1829 = vmatprep.subr.bf16.mxu0 %v2440_v21 }
 0x110   : > { %1830 = vmatpush3.bf16.msra.mxu0 %v2055_v26 }
 0x111   : > { %1831 = vmatprep.subr.bf16.mxu0 %v2440_v21 }
 0x114   : > { %1832 = vmatpush3.bf16.msra.mxu0 %v2056_v16 }
 0x115   : > { %1833 = vmatprep.subr.bf16.mxu0 %v2440_v21 }
 0x118   : > { %1834 = vmatpush3.bf16.msra.mxu0 %v2057_v17 }
 0x1d1   : > { %v1817_v28 = vpop.f32.mrb[0].mxu1 }
 0x1d2   : > { %v735_v30 = vadd.f32 %v1817_v28, %v1738_v27  ;;  %v726_v31 = vpop.f32.mrb[1].mxu1 }
 0x1d3   : > { %v727_v33 = vadd.f32 %v1738_v27, %v726_v31  ;;  %v1818_v34 = vpop.f32.mrb[2].mxu1 }
 0x1d4   : > { %v744_v35 = vmul.f32 %v743_v29, %v735_v30  ;;  %v729_v37 = vpop.f32.mrb[3].mxu1  ;;  %v1759_v34 = vld [vmem:[%s3091_s13] ss:$0 sm:$0xff] }
 0x1d5   : > { %v730_v39 = vadd.f32 %v1738_v27, %v729_v37  ;;  %v761_v40 = vrot.slane %v727_v33, 7  ;;  %v774_v41 = vrot.slane %v727_v33, 1  ;;  %v799_v56 = vmul.f32 %v1745_v46, %v727_v33  ;;  %v1105_v33 = vld [vmem:[#allocation6] sm:$0xff]  }
 0x1d6   : > { %v758_v45 = vrot.slane %v744_v35, %v2824_v36 }
 0x1d7   : > { %v762_v42 = vrot.slane %v730_v39, 7  ;;  %v775_v43 = vrot.slane %v730_v39, 1  ;;  %786 = vst.msk [vmem:[#allocation7 - $0x7] sm:$0x80] %vm785_vm4, %v730_v39  ;;  %v800_v55 = vmul.f32 %v1745_v46, %v730_v39 }
 0x1d9   : > { %v764_v48 = vsel %vm763_vm6, %v761_v40, %v762_v42  ;;  %v765_v49 = vsel %vm763_vm6, %v762_v42, %v761_v40  ;;  %v777_v50 = vsel %vm776_vm8, %v774_v41, %v775_v43  ;;  %v778_v51 = vsel %vm776_vm8, %v775_v43, %v774_v41 }
 0x1da   : > { %v770_v52 = vsel %vm759_vm5, %v1743_v38, %v765_v49  ;;  %v784_v53 = vsel %vm773_vm7, %v758_v45, %v778_v51  ;;  %v793_v54 = vmul.f32 %v1744_v44, %v764_v48  ;;  %v808_v61 = vmul.f32 %v1746_v47, %v777_v50 }
 0x1db   : > { %v792_v57 = vmul.f32 %v1744_v44, %v770_v52  ;;  %v809_v58 = vmul.f32 %v1746_v47, %v784_v53 }
 0x1dc   : > { %v802_v59 = vadd.f32 %v800_v55, %v793_v54 }
 0x1dd   : > { %v801_v60 = vadd.f32 %v799_v56, %v792_v57 }
 0x1de   : > { %v811_v63 = vadd.f32 %v809_v58, %v802_v59 }
 0x1df   : > { %v810_v0 = vadd.f32 %v808_v61, %v801_v60 }
 0x1e0   : > { %v820_v1 = vadd.f32 %v1747_v62, %v811_v63 }
 0x1e1   : > { %v819_v2 = vadd.f32 %v1747_v62, %v810_v0 }
 0x1e2   : > { %v1749_v3 = vmul.f32 -1.442695, %v820_v1 }
 0x1e3   : > { %v1748_v4 = vmul.f32 -1.442695, %v819_v2 }
 0x1e4   : > { %2058 = vpow2.f32 %v1749_v3 }
 0x1e5   : > { %2060 = vpow2.f32 %v1748_v4 }
 0x1ee   : > { %v2059_v5 = vpop.eup %2058 }
 0x1ef   : > { %v2061_v6 = vpop.eup %2060  ;;  %v828_v7 = vadd.f32 1.0, %v2059_v5 }
 0x1f0   : > { %v827_v8 = vadd.f32 1.0, %v2061_v6 }
 0x1f1   : > { %2062 = vrcp.f32 %v828_v7 }
 0x1f2   : > { %2064 = vrcp.f32 %v827_v8 }
 0x1fb   : > { %v2063_v11 = vpop.eup %2062 }
 0x1fc   : > { %v2065_v12 = vpop.eup %2064  ;;  %v834_v13 = vmul.f32 %v2063_v11, %v820_v1 }
 0x1fd   : > { %v833_v14 = vmul.f32 %v2065_v12, %v819_v2 }
 0x1fe   : > { %837 = vst.msk [vmem:[#allocation2 + $0x8] sm:$0xff] %vm835_vm9, %v834_v13 }
 0x1ff   : > { %836 = vst.msk [vmem:[#allocation2] sm:$0xff] %vm835_vm9, %v833_v14  ;;  %v838_v15 = vpack.c.bf16 %v834_v13, %v833_v14 }
 0x201   : > { %1758 = vmatmul.mubr.msk.bf16.vlgmr.msra.gmra.mrb[4].mxu1 %vm835_vm9, %v838_v15 }
 0x2d4   : > { %v936_v23 = vpop.f32.mrb[4].mxu1 }
 0x2d5   : > { %v938_v24 = vpop.f32.mrb[5].mxu1  ;;  %v937_v27 = vadd.f32 %v936_v23, %v852_v22 }
 0x2d6   : > { %v939_v25 = vadd.f32 %v938_v24, %v856_v20  ;;  %v940_v26 = vpop.f32.mrb[6].mxu1 }
 0x2d7   : > { %v941_v28 = vadd.f32 %v940_v26, %v852_v22  ;;  %v942_v29 = vpop.f32.mrb[7].mxu1 }
 0x2d8   : > { %945 = vst [vmem:[#allocation4] sm:$0xff] %v939_v25  ;;  %v943_v30 = vadd.f32 %v942_v29, %v856_v20 }
 0x2d9   : > { %v947_v31 = vpack.c.bf16 %v941_v28, %v937_v27 }
 0x2da   : > { %946 = vst [vmem:[#allocation4 + $0x8] sm:$0xff] %v943_v30 }
 0x2db   : > { %1836 = vmatmul.mubr.bf16.vlgmr.msra.gmra.mrb[0].mxu0 %v947_v31 }
 0x3ae   : > { %v1053_v35 = vpop.f32.mrb[0].mxu0 }
 0x3af   : > { %v1054_v37 = vadd.f32 %v1759_v34, %v1053_v35  ;;  %v1837_v38 = vpop.f32.mrb[1].mxu0 }
 0x3b0   : > { %v1056_v39 = vpop.f32.mrb[2].mxu0 }
 0x3b1   : > { %v1066_v40 = vand.u32 2147483647, %v1054_v37  ;;  %v1057_v41 = vadd.f32 %v1759_v34, %v1056_v39  ;;  %v1838_v42 = vpop.f32.mrb[3].mxu0  ;;  %v1060_v62 = vmax.f32 %v1054_v37, 0.0  ;;  %vm1062_vm13 = vcmp.ne.f32.partialorder %v1054_v37, %v1054_v37 }
 0x3b3   : > { %v1068_v43 = vsub.f32 0.0, %v1066_v40  ;;  %v1067_v44 = vand.u32 2147483647, %v1057_v41  ;;  %v1061_v3 = vmax.f32 %v1057_v41, 0.0  ;;  %vm1063_vm14 = vcmp.ne.f32.partialorder %v1057_v41, %v1057_v41 }
 0x3b5   : > { %v1070_v45 = vmul.f32 1.442695, %v1068_v43  ;;  %v1069_v46 = vsub.f32 0.0, %v1067_v44 }
 0x3b7   : > { %2066 = vpow2.f32 %v1070_v45  ;;  %v1072_v47 = vmul.f32 1.442695, %v1069_v46 }
 0x3b9   : > { %2068 = vpow2.f32 %v1072_v47 }
 0x3c1   : > { %v2067_v48 = vpop.eup %2066 }
 0x3c2   : > { %v1074_v49 = vadd.f32 1.0, %v2067_v48  ;;  %v1077_v52 = vmul.f32 -0.5, %v2067_v48  ;;  %v1080_v55 = vand.u32 2147483647, %v2067_v48 }
 0x3c3   : > { %v2069_v50 = vpop.eup %2068 }
 0x3c4   : > { %2070 = vlog2.f32 %v1074_v49  ;;  %v1083_v51 = vadd.f32 1.0, %v2069_v50  ;;  %v1086_v53 = vmul.f32 -0.5, %v2069_v50  ;;  %v1078_v54 = vadd.f32 1.0, %v1077_v52 }
 0x3c5   : > { %v1089_v58 = vand.u32 2147483647, %v2069_v50  ;;  %vm1081_vm11 = vcmp.lt.f32.partialorder %v1080_v55, 0.0004427343 }
 0x3c6   : > { %2072 = vlog2.f32 %v1083_v51  ;;  %v1087_v56 = vadd.f32 1.0, %v1086_v53  ;;  %v1079_v60 = vmul.f32 %v2067_v48, %v1078_v54 }
 0x3c7   : > { %vm1090_vm12 = vcmp.lt.f32.partialorder %v1089_v58, 0.0004427343 }
 0x3c8   : > { %v1088_v1 = vmul.f32 %v2069_v50, %v1087_v56 }
 0x3ce   : > { %v2071_v57 = vpop.eup %2070 }
 0x3cf   : > { %v1076_v59 = vmul.f32 0.6931472, %v2071_v57 }
 0x3d0   : > { %v2073_v61 = vpop.eup %2072 }
 0x3d1   : > { %v1082_v63 = vsel %vm1081_vm11, %v1079_v60, %v1076_v59  ;;  %v1085_v0 = vmul.f32 0.6931472, %v2073_v61 }
 0x3d2   : > { %v1092_v2 = vadd.f32 %v1082_v63, %v1060_v62 }
 0x3d3   : > { %v1091_v4 = vsel %vm1090_vm12, %v1088_v1, %v1085_v0 }
 0x3d4   : > { %v1094_v5 = vsel %vm1062_vm13, %v1054_v37, %v1092_v2  ;;  %v1093_v6 = vadd.f32 %v1091_v4, %v1061_v3 }
 0x3d5   : > { %1096 = vst.msk [vmem:[#allocation3] sm:$0xff] %vm835_vm9, %v1094_v5 }
 0x3d6   : > { %v1095_v7 = vsel %vm1063_vm14, %v1057_v41, %v1093_v6 }
 0x3d7   : > { %1097 = vst.msk [vmem:[#allocation3 + $0x8] sm:$0xff] %vm835_vm9, %v1095_v7 }
 0x3d8 LB: >> { %v2442_v8 = vmov 0.0   ;;  %vm2443_vm15 = vmmov 0   ;;  %s2871_s18 = sshll.u32 %s2425_s15, 3  ;;  %v2444_v11 = vmov 2   ;;  %v2445_v12 = vmov 0   ;;  %vm1770_vm0 = vmpackc.low %vm1100_vm3, %vm1100_vm3  ;;  %s1111_s15 = sadd.s32 1, %s2425_s15   ;;  %s2425_s15 = sphi %s2862_s15, %s1111_s15   ;;  %v2421_v33 = vphi %v1105_v33, %v3092_v33  }
 0x3d9   : >> { %1839 = vmatprep.subr.bf16.mxu0 %v2442_v8  ;;  %1841 = vmatprep.mubr.msk.bf16.mxu0 %vm2443_vm15, %v2442_v8  ;;  %s1118_s22 = scalar_lea.vmem [#allocation4], %s2871_s18  ;;  %v2446_v15 = vmov 1.0|1.0   ;;  %v2447_v22 = vmov 3   ;;  %v2448_v23 = vmov 1   ;;  %v2449_v24 = vmov 4  }
 0x3da   : >> { %2076 = vset.pattern.permute.xlu1 %v2444_v11  ;;  %2074 = vset.pattern.permute.xlu0 %v2445_v12  ;;  %v1119_v13 = vld [vmem:[%s1118_s22] sm:$0xff]  ;;  %v2450_v25 = vmov 5   ;;  %v2451_v26 = vmov 6   ;;  %v2452_v27 = vmov 7   ;;  %s1114_s21 = scalar_lea.vmem [#allocation3], %s2871_s18  ;;  %v1221_v34 = vsub.s32 2, %v2790_v9 }
 0x3db   : >> { %v1120_v14 = vpack.c.bf16 %v1119_v13, %v1119_v13  ;;  %v1249_v39 = vsub.s32 3, %v2790_v9  ;;  %v1277_v44 = vsub.s32 4, %v2790_v9  ;;  %v1305_v46 = vsub.s32 5, %v2790_v9  ;;  %s1116_s5 = scalar_lea.vmem [#allocation2], %s2871_s18  ;;  %s1401_s7 = scalar_lea.vmem [#allocation5], %s2871_s18 }
 0x3dc   : >> { %v1333_v51 = vsub.s32 6, %v2790_v9  ;;  %v1117_v55 = vld [vmem:[%s1116_s5] sm:$0xff]  ;;  %v1361_v58 = vsub.s32 7, %v2790_v9  ;;  %vm1387_vm1 = vcmask 1040384   ;;  %vm1389_vm4 = vcmask 1041408   ;;  %p1108_p4 = scmp.ge.s32.totalorder %s1111_s15, 2  }
 0x3dd   : >> { %1840 = vmatpush3.bf16.xpose.msra.mxu0 %v1120_v14  ;;  %vm1391_vm5 = vcmask 1042432   ;;  %vm1393_vm6 = vcmask 1043456   ;;  %vm1395_vm7 = vcmask 1044480   ;;  %vm1397_vm8 = vcmask 1045504   ;;  %s3093_s3 = sld [smem:[#allocation40_spill]] (%p1108_p4)  ;;  %s1781_s25 = sshll.u32 (%p1108_p4), %s2405_s17, 2 }
 0x3de   : >> { %v1115_v28 = vld [vmem:[%s1114_s21] sm:$0xff]  ;;  %vm1399_vm11 = vcmask 1046528   ;;  %1845 = vmatprep.subr.bf16.mxu0 (%p1108_p4), %v2440_v21  ;;  %v1772_v9 = vld [vmem:[#allocation17] ss:$0 sm:$0xff] (%p1108_p4)  ;;  %s1518_s20 = sadd.s32 (%p1108_p4), %s1781_s25, %s2770_s28  ;;  %s3094_s18 = sld [smem:[#allocation41_spill]] (%p1108_p4) }
 0x3df   : >> { %v1165_v29 = vrot.slane %v1115_v28, %v2824_v36  ;;  %v1194_v31 = vrot.slane %v1115_v28, %v2846_v18  ;;  %v1222_v38 = vrot.slane %v1115_v28, %v1221_v34  ;;  %v1250_v43 = vrot.slane %v1115_v28, %v1249_v39  ;;  %s3095_s22 = sld [smem:[#allocation32_spill]] (%p1108_p4)  ;;  %s1782_s21 = sshll.u32 (%p1108_p4), %s1518_s20, 7 }
 0x3e0   : >> { %v1278_v49 = vrot.slane %v1115_v28, %v1277_v44  ;;  %v1306_v50 = vrot.slane %v1115_v28, %v1305_v46  ;;  %v1334_v57 = vrot.slane %v1115_v28, %v1333_v51  ;;  %v2900_v62 = vmul.f32 %v1117_v55, %v1115_v28  ;;  %s1521_s5 = sshll.u32 (%p1108_p4), %s2785_s14, 4  ;;  %s3096_s12 = sld [smem:[#allocation42_spill]] (%p1108_p4)  ;;  %s2971_s5 = int_to_ptr.vmem [resolvable:$true] %s1521_s5 }
 0x3e1   : >> { %v1166_v30 = vmul.f32 %v1165_v29, %v2853_v32  ;;  %v1195_v37 = vmul.f32 %v1194_v31, %v2853_v32  ;;  %v1223_v42 = vmul.f32 %v1222_v38, %v2853_v32  ;;  %v1251_v48 = vmul.f32 %v1250_v43, %v2853_v32  ;;  %s2979_s17 = scalar_lea.sflag (%p1108_p4), [#allocation10], %s618_s23  ;;  %s2299_s28 = scalar_lea.vmem (%p1108_p4), %s2971_s5, 256 }
 0x3e2   : >> { %v1279_v54 = vmul.f32 %v1278_v49, %v2853_v32  ;;  %v1307_v56 = vmul.f32 %v1306_v50, %v2853_v32  ;;  %v1335_v1 = vmul.f32 %v1334_v57, %v2853_v32  ;;  %v1362_v2 = vrot.slane %v1115_v28, %v1361_v58  ;;  %p2300_p5 = scmp.ne.s32.totalorder (%p1108_p4), %s2971_s5, %s2299_s28  ;;  %s2453_s27 = smov (%p1108_p4), [#allocation20]  }
 0x3e3   : >> { %v1167_v35 = vpack.c.bf16 %v1166_v30, %v1166_v30  ;;  %v1196_v41 = vpack.c.bf16 %v1195_v37, %v1195_v37  ;;  %v1224_v47 = vpack.c.bf16 %v1223_v42, %v1223_v42  ;;  %v1252_v53 = vpack.c.bf16 %v1251_v48, %v1251_v48  ;;  %v2101_v10 = vld [vmem:[%s3093_s3 + $0x10] sm:$0xff] (%p1108_p4)   ;;  %s2303_s26 = sshll.u32 (%p1108_p4), %s2453_s27, 4  ;;  %s2304_s26 = int_to_ptr.vmem [resolvable:$false] %s2303_s26 }
 0x3e4   : >> { %1842 = vmatmul.mubr.msk.bf16.vlgmr.msra.gmra.mrb[0].mxu0 %vm1770_vm0, %v2446_v15  ;;  %v1280_v61 = vpack.c.bf16 %v1279_v54, %v1279_v54  ;;  %v1308_v0 = vpack.c.bf16 %v1307_v56, %v1307_v56  ;;  %v1179_v4 = vrot.slane %v2900_v62, %v2824_v36  ;;  %v1336_v8 = vpack.c.bf16 %v1335_v1, %v1335_v1  ;;  %s2305_s29 = scalar_lea.vmem (%p1108_p4), %s2304_s26, 512  ;;  %p2306_p11 = scmp.lt.s32.totalorder (%p1108_p4), %s2971_s5, %s2304_s26 }
 0x3e5   : >> { %v1169_v40 = vmul.bf16 1069105081, %v1167_v35  ;;  %v1198_v45 = vmul.bf16 1069105081, %v1196_v41  ;;  %v1226_v52 = vmul.bf16 1069105081, %v1224_v47  ;;  %v1363_v11 = vmul.f32 %v1362_v2, %v2853_v32  ;;  %1853 = vmatprep.mubr.msk.bf16.mxu0 (%p1108_p4), %vm2441_vm10, %v2440_v21  ;;  %p2307_p13 = scmp.lt.s32.totalorder (%p1108_p4), %s2305_s29, %s2299_s28 }
 0x3e6   : >> { %v1254_v60 = vmul.bf16 1069105081, %v1252_v53  ;;  %v1282_v3 = vmul.bf16 1069105081, %v1280_v61  ;;  %v1310_v7 = vmul.bf16 1069105081, %v1308_v0  ;;  %v1207_v15 = vrot.slane %v2900_v62, %v2846_v18  ;;  %s2969_s16 = scalar_lea.hbm (%p1108_p4), %s3096_s12, %s1782_s21 }
 0x3e7   : >> { %2083 = vpow.bf16 %v1169_v40  ;;  %v1263_v35 = vrot.slane %v2900_v62, %v1249_v39  ;;  %v1291_v42 = vrot.slane %v2900_v62, %v1277_v44  ;;  %v1319_v54 = vrot.slane %v2900_v62, %v1305_v46  ;;  %p3097_p6 = scmp.ne.s32.totalorder (%p1108_p4), %s3095_s22, 0  ;;  %p2308_p1 = por (%p1108_p4), %p2307_p13, %p2306_p11 }
 0x3e8   : >> { %2085 = vpow.bf16 %v1198_v45 }
 0x3e9   : >> { %2087 = vpow.bf16 %v1226_v52  ;;  %p2301_p7 = pnand (%p1108_p4), %p2300_p5, %p3097_p6 }
 0x3ea   : >> { %2089 = vpow.bf16 %v1254_v60 }
 0x3eb   : >> { %2091 = vpow.bf16 %v1282_v3  ;;  %p2302_p9 = pneg (%p1108_p4), %p2301_p7 }
 0x3ec   : >> { %2093 = vpow.bf16 %v1310_v7 }
 0x3ed   : > { %p2309_p3 = pnand (%p1108_p4), %p2308_p1, %p2302_p9 }
 0x3f2   : >> { %v2084_v59 = vpop.eup %2083 }
 0x3f3   : >> { %v1181_v63 = vunpack.c.l.bf16 %v2084_v59  ;;  %v2086_v5 = vpop.eup %2085 }
 0x3f4   : >> { %v1209_v14 = vunpack.c.l.bf16 %v2086_v5 }
 0x3f5   : >> { %v1182_v6 = vmul.f32 %v2421_v33, %v1181_v63  ;;  %v1235_v33 = vrot.slane %v2900_v62, %v1221_v34 }
 0x4b7   : >> { %v1155_v16 = vpop.f32.mrb[0].mxu0 }
 0x4b8   : >> { %1229 = vperm.xlu1 %2076, %v1155_v16   ;;  %1173 = vperm.xlu0 %2074, %v1155_v16   ;;  %v1843_v17 = vpop.f32.mrb[1].mxu0 }
 0x4b9   : >> { %v1158_v19 = vpop.f32.mrb[2].mxu0 }
 0x4ba   : >> { %v1844_v20 = vpop.f32.mrb[3].mxu0 }
 0x4bb   : >> { %v1338_v20 = vmul.bf16 1069105081, %v1336_v8 }
 0x4bc   : >> { %2077 = vset.pattern.permute.xlu1 %v2447_v22  ;;  %2075 = vset.pattern.permute.xlu0 %v2448_v23  ;;  %v1364_v22 = vpack.c.bf16 %v1363_v11, %v1363_v11 }
 0x4bd   : >> { %1257 = vperm.xlu1 %2077, %v1155_v16   ;;  %1201 = vperm.xlu0 %2075, %v1155_v16   ;;  %2095 = vpow.bf16 %v1338_v20 }
 0x4be   : >> { %v1366_v28 = vmul.bf16 1069105081, %v1364_v22 }
 0x4c0   : >> { %2097 = vpow.bf16 %v1366_v28 }
 0x4c1   : >> { %2078 = vset.pattern.permute.xlu1 %v2449_v24  ;;  %2079 = vset.pattern.permute.xlu0 %v2450_v25 }
 0x4c2   : >> { %1285 = vperm.xlu1 %2078, %v1155_v16   ;;  %1313 = vperm.xlu0 %2079, %v1155_v16  }
 0x4c6   : >> { %2080 = vset.pattern.permute.xlu1 %v2451_v26  ;;  %2082 = vset.pattern.permute.xlu0 %v2452_v27 }
 0x4c7   : >> { %1341 = vperm.xlu1 %2080, %v1155_v16  }
 0x4cb   : >> { %2081 = vset.pattern.permute.xlu1 %v2452_v27 }
 0x4cc   : >> { %1369 = vperm.xlu1 %2081, %v1155_v16   ;;  %v2088_v16 = vpop.eup %2087 }
 0x4cd   : >> { %v1237_v26 = vunpack.c.l.bf16 %v2088_v16  ;;  %v2090_v27 = vpop.eup %2089 }
 0x4ce   : >> { %v1265_v38 = vunpack.c.l.bf16 %v2090_v27  ;;  %v2092_v40 = vpop.eup %2091 }
 0x4cf   : >> { %v2094_v34 = vpop.eup %2093  ;;  %v1293_v48 = vunpack.c.l.bf16 %v2092_v40 }
 0x4d0   : >> { %v1321_v55 = vunpack.c.l.bf16 %v2094_v34  ;;  %v2096_v56 = vpop.eup %2095 }
 0x4d1   : >> { %v1349_v5 = vunpack.c.l.bf16 %v2096_v56 }
 0x537   : >> { %v1174_v12 = vpop.permute.xlu0 %1173  ;;  %v1230_v17 = vpop.permute.xlu1 %1229 }
 0x538   : >> { %v1180_v13 = vmul.f32 %v1179_v4, %v1174_v12  ;;  %v1236_v31 = vmul.f32 %v1235_v33, %v1230_v17  ;;  %v1347_v4 = vrot.slane %v2900_v62, %v1333_v51 }
 0x53a   : >> { %v1183_v19 = vadd.f32 %v1182_v6, %v1180_v13  ;;  %v2098_v6 = vpop.eup %2097 }
 0x53b   : >> { %v1377_v20 = vunpack.c.l.bf16 %v2098_v6 }
 0x53c   : >> { %v1202_v23 = vpop.permute.xlu0 %1201  ;;  %v1210_v24 = vmul.f32 %v1209_v14, %v1183_v19  ;;  %v1258_v30 = vpop.permute.xlu1 %1257  ;;  %v1184_v39 = vsel %vm835_vm9, %v1183_v19, 0.0  ;;  %v1375_v19 = vrot.slane %v2900_v62, %v1361_v58 }
 0x53d   : >> { %v1208_v25 = vmul.f32 %v1207_v15, %v1202_v23  ;;  %v1264_v43 = vmul.f32 %v1263_v35, %v1258_v30  ;;  %v1185_v61 = vrot.slane %v1184_v39, 4 }
 0x53f   : >> { %v1211_v29 = vadd.f32 %v1210_v24, %v1208_v25  ;;  %v1186_v12 = vadd.f32 %v1185_v61, %v1184_v39 }
 0x541   : >> { %v1238_v37 = vmul.f32 %v1237_v26, %v1211_v29  ;;  %v1212_v45 = vsel %vm835_vm9, %v1211_v29, 0.0  ;;  %v1286_v50 = vpop.permute.xlu1 %1285  ;;  %v1314_v0 = vpop.permute.xlu0 %1313  ;;  %v1187_v33 = vrot.slane %v1186_v12, 2 }
 0x542   : >> { %v1213_v53 = vrot.slane %v1212_v45, 4  ;;  %v1292_v59 = vmul.f32 %v1291_v42, %v1286_v50  ;;  %v1320_v8 = vmul.f32 %v1319_v54, %v1314_v0 }
 0x543   : >> { %v1239_v41 = vadd.f32 %v1238_v37, %v1236_v31  ;;  %v1188_v58 = vadd.f32 %v1187_v33, %v1186_v12 }
 0x544   : >> { %v1214_v2 = vadd.f32 %v1213_v53, %v1212_v45 }
 0x545   : >> { %v1266_v47 = vmul.f32 %v1265_v38, %v1239_v41  ;;  %v1240_v49 = vsel %vm835_vm9, %v1239_v41, 0.0  ;;  %v1189_v39 = vrot.slane %v1188_v58, 1 }
 0x546   : >> { %v1241_v44 = vrot.slane %v1240_v49, 4  ;;  %v1342_v3 = vpop.permute.xlu1 %1341  ;;  %v1215_v16 = vrot.slane %v1214_v2, 2 }
 0x547   : >> { %v1267_v52 = vadd.f32 %v1266_v47, %v1264_v43  ;;  %v1348_v23 = vmul.f32 %v1347_v4, %v1342_v3  ;;  %v1190_v61 = vadd.f32 %v1189_v39, %v1188_v58 }
 0x548   : >> { %v1242_v46 = vadd.f32 %v1241_v44, %v1240_v49  ;;  %v1216_v30 = vadd.f32 %v1215_v16, %v1214_v2  ;;  %v2099_v16 = vld [vmem:[%s3093_s3] sm:$0xff] (%p1108_p4)  }
 0x549   : >> { %v1268_v57 = vsel %vm835_vm9, %v1267_v52, 0.0  ;;  %v1294_v60 = vmul.f32 %v1293_v48, %v1267_v52  ;;  %1846 = vmatpush3.bf16.msra.mxu0 (%p1108_p4), %v2099_v16 }
 0x54a   : >> { %v1269_v63 = vrot.slane %v1268_v57, 4  ;;  %v1243_v22 = vrot.slane %v1242_v46, 2  ;;  %v1217_v45 = vrot.slane %v1216_v30, 1  ;;  %1847 = vmatprep.subr.bf16.mxu0 (%p1108_p4), %v2440_v21 }
 0x54b   : >> { %v1295_v1 = vadd.f32 %v1294_v60, %v1292_v59  ;;  %v1370_v27 = vpop.permute.xlu1 %1369 }
 0x54c   : >> { %v1270_v13 = vadd.f32 %v1269_v63, %v1268_v57  ;;  %v1244_v35 = vadd.f32 %v1243_v22, %v1242_v46  ;;  %v1376_v38 = vmul.f32 %v1375_v19, %v1370_v27  ;;  %v1218_v56 = vadd.f32 %v1217_v45, %v1216_v30  ;;  %v1406_v19 = vld [vmem:[#allocation2] sm:$0xff] (%p1108_p4) }
 0x54d   : >> { %v1296_v7 = vsel %vm835_vm9, %v1295_v1, 0.0  ;;  %v1322_v11 = vmul.f32 %v1321_v55, %v1295_v1  ;;  %v1415_v32 = vmul.f32 (%p1108_p4), %v1772_v9, %v1406_v19 }
 0x54e   : >> { %v1297_v14 = vrot.slane %v1296_v7, 4  ;;  %v1271_v25 = vrot.slane %v1270_v13, 2  ;;  %v1245_v49 = vrot.slane %v1244_v35, 1  ;;  %v1388_v3 = vsel %vm1387_vm1, %v1190_v61, %v1218_v56 }
 0x54f   : >> { %v1323_v15 = vadd.f32 %v1322_v11, %v1320_v8 }
 0x550   : >> { %v1298_v17 = vadd.f32 %v1297_v14, %v1296_v7  ;;  %v1272_v62 = vadd.f32 %v1271_v25, %v1270_v13  ;;  %v1246_v60 = vadd.f32 %v1245_v49, %v1244_v35  ;;  %v1773_v25 = vld [vmem:[%s3094_s18] ss:$0 sm:$0xff] (%p1108_p4) }
 0x551   : >> { %v1324_v51 = vsel %vm835_vm9, %v1323_v15, 0.0  ;;  %v1350_v24 = vmul.f32 %v1349_v5, %v1323_v15 }
 0x552   : >> { %v1325_v26 = vrot.slane %v1324_v51, 4  ;;  %v1299_v28 = vrot.slane %v1298_v17, 2  ;;  %v1273_v52 = vrot.slane %v1272_v62, 1  ;;  %v1390_v6 = vsel %vm1389_vm4, %v1388_v3, %v1246_v60 }
 0x553   : >> { %v1351_v29 = vadd.f32 %v1350_v24, %v1348_v23  ;;  %v2102_v24 = vld [vmem:[%s3093_s3 + $0x18] sm:$0xff] (%p1108_p4)  }
 0x554   : >> { %v1326_v31 = vadd.f32 %v1325_v26, %v1324_v51  ;;  %v1300_v34 = vadd.f32 %v1299_v28, %v1298_v17  ;;  %v1274_v63 = vadd.f32 %v1273_v52, %v1272_v62  ;;  %v2100_v17 = vld [vmem:[%s3093_s3 + $0x8] sm:$0xff] (%p1108_p4)  }
 0x555   : >> { %v1352_v37 = vsel %vm835_vm9, %v1351_v29, 0.0  ;;  %v1378_v40 = vmul.f32 %v1377_v20, %v1351_v29  ;;  %v1407_v20 = vld [vmem:[#allocation2 + $0x8] sm:$0xff] (%p1108_p4)  ;;  %1848 = vmatpush3.bf16.msra.mxu0 (%p1108_p4), %v2100_v17 }
 0x556   : >> { %v1327_v41 = vrot.slane %v1326_v31, 2  ;;  %v1353_v42 = vrot.slane %v1352_v37, 4  ;;  %v1301_v55 = vrot.slane %v1300_v34, 1  ;;  %v1392_v7 = vsel %vm1391_vm5, %v1390_v6, %v1274_v63  ;;  %1849 = vmatprep.subr.bf16.mxu0 (%p1108_p4), %v2440_v21 }
 0x557   : >> { %v1379_v43 = vadd.f32 %v1378_v40, %v1376_v38   ;;  %v1416_v22 = vmul.f32 (%p1108_p4), %v1772_v9, %v1407_v20 }
 0x558   : >> { %v1328_v47 = vadd.f32 %v1327_v41, %v1326_v31  ;;  %v1354_v48 = vadd.f32 %v1353_v42, %v1352_v37  ;;  %v1302_v2 = vadd.f32 %v1301_v55, %v1300_v34 }
 0x559   : >> { %v1380_v50 = vsel %vm835_vm9, %v1379_v43, 0.0  ;;  %v3092_v33 = vmov %v1379_v43  ;;  %1403 = vst.msk [vmem:[#allocation6] sm:$0xff] (%p1108_p4), %vm835_vm9, %v1379_v43  ;;  %1850 = vmatpush3.bf16.msra.mxu0 (%p1108_p4), %v2101_v10 }
 0x55a   : >> { %v1355_v53 = vrot.slane %v1354_v48, 2  ;;  %v1381_v54 = vrot.slane %v1380_v50, 4  ;;  %v1329_v44 = vrot.slane %v1328_v47, 1  ;;  %v1394_v11 = vsel %vm1393_vm6, %v1392_v7, %v1302_v2  ;;  %1851 = vmatprep.subr.bf16.mxu0 (%p1108_p4), %v2440_v21 }
 0x55c   : >> { %v1356_v57 = vadd.f32 %v1355_v53, %v1354_v48  ;;  %v1382_v59 = vadd.f32 %v1381_v54, %v1380_v50  ;;  %v1330_v4 = vadd.f32 %v1329_v44, %v1328_v47 }
 0x55d   : > { %1852 = vmatpush3.bf16.msra.mxu0 (%p1108_p4), %v2102_v24 }
 0x55e   : >> { %v1357_v0 = vrot.slane %v1356_v57, 1  ;;  %v1383_v1 = vrot.slane %v1382_v59, 2  ;;  %v1396_v12 = vsel %vm1395_vm7, %v1394_v11, %v1330_v4 }
 0x560   : >> { %v1384_v5 = vadd.f32 %v1383_v1, %v1382_v59  ;;  %v1358_v46 = vadd.f32 %v1357_v0, %v1356_v57 }
 0x561   : > { %1110 = sbr.rel (!%p1108_p4) target bundleno = 984 (0x3d8), region = 158 }
 0x562   : >> { %v1385_v8 = vrot.slane %v1384_v5, 1  ;;  %v1398_v14 = vsel %vm1397_vm8, %v1396_v12, %v1358_v46 }
 0x564   : >> { %v1386_v13 = vadd.f32 %v1385_v8, %v1384_v5 }
 0x566   : >> { %v1400_v15 = vsel %vm1399_vm11, %v1398_v14, %v1386_v13 }
 0x567   : >> { %1402 = vst.msk [vmem:[%s1401_s7] sm:$0xff] %vm835_vm9, %v1400_v15 }
 0x56e   : > { %v1404_v36 = vld [vmem:[#allocation5] sm:$0xff]  ;;  %v1405_v18 = vld [vmem:[#allocation5 + $0x8] sm:$0xff] }
 0x56f   : > { %v1417_v51 = vadd.f32 %v1415_v32, %v1404_v36  ;;  %v1418_v23 = vadd.f32 %v1416_v22, %v1405_v18 }
 0x571   : > { %v1419_v33 = vpack.c.bf16 %v1418_v23, %v1417_v51 }
 0x573   : > { %1854 = vmatmul.mubr.msk.bf16.vlgmr.msra.gmra.mrb[0].mxu0 %vm835_vm9, %v1419_v33 }
 0x646   : > { %v1496_v26 = vpop.f32.mrb[0].mxu0 }
 0x647   : > { %v1497_v27 = vadd.f32 %v1773_v25, %v1496_v26  ;;  %v1855_v28 = vpop.f32.mrb[1].mxu0 }
 0x648   : > { %v1499_v29 = vpop.f32.mrb[2].mxu0 }
 0x649   : > { %1503 = vst.msk [vmem:[%s2785_s14] sm:$0xff] %vm685_vm2, %v1497_v27  ;;  %v1500_v21 = vadd.f32 %v1773_v25, %v1499_v29  ;;  %v1856_v30 = vpop.f32.mrb[3].mxu0 }
 0x64b   : > { %1504 = vst.msk [vmem:[%s2785_s14 + $0x8] sm:$0xff] %vm685_vm2, %v1500_v21 }
 0x64c   : > { %2312 = shalt.err (!%p2309_p3)
}
 0x64d   : > { %s2313_s23 = scalar_lea.hbm %s2969_s16, 256  ;;  %s2317_s24 = scalar_lea.hbm %s3096_s12, 1024 }
 0x64e   : > { %p2314_p0 = scmp.ne.s32.totalorder %s2969_s16, %s2313_s23  ;;  %p2318_p10 = scmp.lt.u32.totalorder %s2969_s16, %s3096_s12 }
 0x64f   : > { %p2319_p12 = scmp.lt.u32.totalorder %s2317_s24, %s2313_s23  ;;  %p2321_p5 = scmp.lt.u32.totalorder %s2313_s23, %s2969_s16 }
 0x650   : > { %p2315_p2 = pnand %p2314_p0, %p3097_p6 }
 0x651   : > { %p2320_p4 = por %p2319_p12, %p2318_p10 }
 0x652   : > { %p2316_p8 = pneg %p2315_p2 }
 0x653   : > { %p2322_p7 = por %p2321_p5, %p2320_p4 }
 0x655   : > { %p2323_p9 = pnand %p2322_p7, %p2316_p8 }
 0x657   : > { %2326 = shalt.err (!%p2323_p9)
}
 0x658   : > { %s2454_s13 = smov 128   ;;  %s2455_s15 = smov 8  }
 0x659   : > { %1885 = dma.vmem_to_hbm [thread:$0]  (%p3097_p6), %s2971_s5, 256, %s2969_s16, %s2979_s17, %s2454_s13, %s2454_s13, %s2455_s15  }
 0x65a PF: > { %s3098_s18 = sld [smem:[#allocation30_spill]]  ;;  %s3099_s21 = sld [smem:[#allocation26_spill]] }
 0x65b   : > { %s3100_s7 = sld [smem:[#allocation34_spill]] }
 0x660   : > { %p1927_p11 = scmp.ge.s32.totalorder %s3098_s18, 2  ;;  %s1536_s11 = sand.u32 1, %s3099_s21  }
 0x661   : > { %p3101_p13 = scmp.ne.s32.totalorder %s3100_s7, 0  ;;  %s1537_s28 = scalar_lea.sflag [#allocation10], %s1536_s11 }
 0x663   : > { %p1910_p1 = pnand %p1927_p11, %p3101_p13 }
 0x665   : > { %2384 = dma.done.wait (!%p1910_p1), %s1537_s28, 256  }
 0x666   : > { %2386 = vsyncadd (!%p1910_p1), %s1537_s28, 4294967040  ;;  %s31_s20 = sadd.s32 1, %s3098_s18   ;;  %s3102_s27 = sld [smem:[#allocation27_spill]] }
 0x667   : > { %p28_p3 = scmp.ge.s32.totalorder %s31_s20, 6   ;;  %s3103_s15 = sld [smem:[#allocation35_spill]] }
 0x668   : > { %s3104_s16 = sld [smem:[#allocation28_spill]]  ;;  %s3105_s17 = sld [smem:[#allocation29_spill]] }
 0x669   : > { %s3106_s18 = sld [smem:[#allocation31_spill]]  ;;  %s3107_s19 = sld [smem:[#allocation33_spill]] }
 0x66a   : > { %s3108_s29 = smov %s2393_s30  ;;  %30 = sbr.rel (!%p28_p3) target bundleno = 17 (0x11), region = 169 }
 0x66c   : > { %s3109_s30 = smov %s3102_s27 }
 0x671   :  { %1542 = vsyncpa [#allocation9], 1 }
 0x672   :  { %1544 = vsyncpa [#allocation9 + $0x1], 1 }
 0x673   :  { %1545 = vsyncpa [#allocation12], 1 }
 0x674   :  { %1546 = vsyncpa [#allocation15], 1 }
 0x675   :  { %1547 = vsyncpa [#allocation18], 1 }
 0x676   :  { %1548 = vsyncpa [#allocation10], 1 }
 0x677   :  { %1550 = vsyncpa [#allocation10 + $0x1], 1 }

// kernel: tpu_custom_call.1
= control target key start
LH: loop header
LB: loop body
LE: loop exit
PB: predicated region body
PF: predicated region fallthrough
CT: control target
= control target key end

     0   :  { %s3031_s0 = inlined_call_operand.vmem [shape: f32[2,32,32], index: 0, kind: input, shape index: {}]   ;;  %s3032_s1 = inlined_call_operand.vmem [shape: f32[2,32,32], index: 1, kind: input, shape index: {}]   ;;  %s3033_s2 = inlined_call_operand.hbm [shape: bf16[32,64], index: 2, kind: input, shape index: {}]   ;;  %s3034_s3 = inlined_call_operand.hbm [shape: f32[1,64], index: 3, kind: input, shape index: {}]   ;;  %s3035_s4 = inlined_call_operand.hbm [shape: f32[3,64], index: 4, kind: input, shape index: {}]   ;;  %s3036_s5 = inlined_call_operand.hbm [shape: f32[1,64], index: 5, kind: input, shape index: {}]   ;;  %s3037_s6 = inlined_call_operand.hbm [shape: f32[8,64], index: 6, kind: input, shape index: {}]   ;;  %s3038_s7 = inlined_call_operand.hbm [shape: f32[1,64], index: 7, kind: input, shape index: {}]   ;;  %s3039_s8 = inlined_call_operand.hbm [shape: bf16[64,256], index: 8, kind: input, shape index: {}]   ;;  %s3040_s9 = inlined_call_operand.vmem [shape: f32[1,256], index: 9, kind: input, shape index: {}]   ;;  %s3041_s10 = inlined_call_operand.vmem [shape: bf16[128,64], index: 10, kind: input, shape index: {}]   ;;  %s3042_s11 = inlined_call_operand.vmem [shape: f32[1,64], index: 11, kind: input, shape index: {}]   ;;  %s3043_s12 = inlined_call_operand.vmem [shape: bf16[64,32], index: 12, kind: input, shape index: {}]   ;;  %s3044_s13 = inlined_call_operand.vmem [shape: f32[1,32], index: 13, kind: input, shape index: {}]   ;;  %s3045_s14 = inlined_call_operand.hbm [shape: f32[2,32,32], index: 14, kind: output, shape index: {}]  }
   0x1   :  { %3063 = sst [smem:[#allocation36_spill]] %s3034_s3 }
   0x2   :  { %3064 = sst [smem:[#allocation37_spill]] %s3036_s5 }
   0x3   :  { %3065 = sst [smem:[#allocation38_spill]] %s3038_s7 }
   0x4   :  { %3066 = sst [smem:[#allocation39_spill]] %s3042_s11 }
   0x5   :  { %3067 = sst [smem:[#allocation40_spill]] %s3043_s12 }
   0x6   :  { %3068 = sst [smem:[#allocation41_spill]] %s3044_s13 }
   0x7   :  { %3069 = sst [smem:[#allocation42_spill]] %s3045_s14 }
   0x8   :  { %19 = vsyncpa [#allocation9], 0 }
   0x9   :  { %20 = vsyncpa [#allocation12], 0 }
   0xa   :  { %21 = vsyncpa [#allocation15], 0 }
   0xb   :  { %22 = vsyncpa [#allocation18], 0 }
   0xc   :  { %23 = vsyncpa [#allocation10], 0 }
   0xd   :  { %25 = vsyncpa [#allocation10 + $0x1], 0  ;;  %s2531_s29 = smov 0   ;;  %s2533_s30 = smov 0  }
   0xe   :  { %s2535_s15 = smov 0   ;;  %s2537_s16 = smov 0  }
   0xf   :  { %s2539_s17 = smov 0   ;;  %s2541_s18 = smov 0  }
  0x10   :  { %s2543_s19 = smov 0   ;;  %s2545_s20 = smov 0  }
  0x11 LB: > { %3070 = sst [smem:[#allocation26_spill]] %s2389_s29  ;;  %s1706_s21 = sadd.s32 4294967295, %s2417_s20   ;;  %s2417_s20 = sphi %s2545_s20, %s31_s20   ;;  %s2413_s19 = sphi %s2543_s19, %s3107_s19   ;;  %s2409_s18 = sphi %s2541_s18, %s3106_s18   ;;  %s2405_s17 = sphi %s2539_s17, %s3105_s17   ;;  %s2401_s16 = sphi %s2537_s16, %s3104_s16   ;;  %s2397_s15 = sphi %s2535_s15, %s3103_s15   ;;  %s2393_s30 = sphi %s2533_s30, %s3109_s30   ;;  %s2389_s29 = sphi %s2531_s29, %s3108_s29  }
  0x12   : > { %3071 = sst [smem:[#allocation27_spill]] %s2397_s15  ;;  %s1707_s22 = sadd.s32 4294967294, %s2417_s20  }
  0x13   : > { %3072 = sst [smem:[#allocation28_spill]] %s2409_s18  ;;  %s40_s23 = sadd.s32 1, %s2409_s18 }
  0x14   : > { %3073 = sst [smem:[#allocation29_spill]] %s2413_s19  ;;  %s43_s24 = sadd.s32 1, %s2413_s19 }
  0x15   : > { %3074 = sst [smem:[#allocation30_spill]] %s2417_s20  ;;  %p41_p0 = scmp.ge.s32.totalorder %s40_s23, 2 }
  0x16   : > { %s368_s25 = sadd.s32 1, %s2397_s15  ;;  %p378_p1 = scmp.ne.s32.totalorder %s2397_s15, %s2393_s30 }
  0x17   : > { %p379_p2 = scmp.eq.s32.totalorder %s1706_s21, 3  ;;  %s3111_s23 = smov (%p41_p0, %s40_s23), 0 }
  0x18   : > { %3075 = sst [smem:[#allocation31_spill]] %s3111_s23  ;;  %s3113_s24 = smov (!%p41_p0, %s43_s24), %s2413_s19 }
  0x19   : > { %s364_s26 = ssub.s32 %s2409_s18, %s3111_s23  ;;  %p2583_p3 = por %p379_p2, %p378_p1 }
  0x1a   : > { %p45_p4 = scmp.ge.s32.totalorder %s3113_s24, 2  ;;  %p384_p5 = scmp.ne.s32.totalorder %s2393_s30, %s2389_s29 }
  0x1b   : > { %s3076_s27 = scalar_select %p2583_p3, 1, 0 }
  0x1c   : > { %p385_p6 = scmp.eq.s32.totalorder %s1707_s22, 3  ;;  %p1710_p7 = scmp.ge.s32.totalorder %s2417_s20, 1 }
  0x1d   : > { %3077 = sst [smem:[#allocation32_spill]] %s3076_s27  ;;  %s3115_s24 = smov (%p45_p4, %s3113_s24), 0 }
  0x1e   : > { %3078 = sst [smem:[#allocation33_spill]] %s3115_s24  ;;  %p2592_p8 = por %p385_p6, %p384_p5 }
  0x1f   : > { %p392_p9 = scmp.lt.s32.totalorder %s2417_s20, 5  ;;  %s363_s14 = ssub.s32 %s2413_s19, %s3115_s24 }
  0x20   : > { %s3079_s28 = scalar_select %p2592_p8, 1, 0 }
  0x21   : > { %s365_s13 = sor.u32 %s364_s26, %s363_s14  ;;  %p2599_p10 = pnand %p1710_p7, %p392_p9 }
  0x22   : > { %3080 = sst [smem:[#allocation34_spill]] %s3079_s28  ;;  %p366_p11 = scmp.eq.s32.totalorder %s365_s13, 0 }
  0x23   : > { %s3081_s23 = scalar_select %p2599_p10, 1, 0 }
  0x24   : > { %p2603_p12 = scmp.eq.s32.totalorder %s1706_s21, 0  ;;  %p1887_p13 = pneg %p2599_p10 }
  0x25   : > { %s2610_s22 = scalar_select %p366_p11, %s2397_s15, %s368_s25  }
  0x26   : > { %s3082_s18 = scalar_select %p2603_p12, 1, 0 }
  0x27   : > { %3083 = sst [smem:[#allocation35_spill]] %s2610_s22  ;;  %p2614_p0 = pnand %p2603_p12, %p1887_p13 }
  0x28   : > { %s2427_s14 = smov [#allocation11]   ;;  %s2428_s24 = smov [#allocation14]  }
  0x29   : > { %s418_s26 = sshll.u32 %s2427_s14, 4  ;;  %s440_s13 = sshll.u32 %s2428_s24, 4  ;;  %s419_s26 = int_to_ptr.vmem [resolvable:$true] %s418_s26  ;;  %s441_s13 = int_to_ptr.vmem [resolvable:$true] %s440_s13 }
  0x2a   : > { %s3085_s3 = sld [smem:[#allocation36_spill]]  ;;  %p2626_p2 = pneg %p2614_p0 }
  0x30   : > { %s2103_s29 = scalar_lea.hbm %s3085_s3, 16 }
  0x31   : > { %p2104_p1 = scmp.ne.s32.totalorder %s3085_s3, %s2103_s29  ;;  %p2110_p6 = scmp.lt.u32.totalorder %s2103_s29, %s3085_s3 }
  0x33   : > { %p2106_p4 = pnand %p2626_p2, %p2104_p1 }
  0x35   : > { %p2107_p5 = pneg %p2106_p4 }
  0x37   : > { %p2112_p7 = pnand %p2110_p6, %p2107_p5 }
  0x39   : > { %2115 = shalt.err (!%p2112_p7)
}
  0x3a   : > { %s2116_s19 = scalar_lea.vmem %s419_s26, 16  ;;  %s2123_s20 = scalar_lea.vmem %s419_s26, 32 }
  0x3b   : > { %p2117_p9 = scmp.ne.s32.totalorder %s419_s26, %s2116_s19  ;;  %p2124_p8 = scmp.lt.s32.totalorder %s419_s26, %s419_s26 }
  0x3c   : > { %p2125_p3 = scmp.lt.s32.totalorder %s2123_s20, %s2116_s19 }
  0x3d   : > { %p2119_p11 = pnand %p2117_p9, %p2626_p2 }
  0x3e   : > { %p2126_p12 = por %p2125_p3, %p2124_p8 }
  0x3f   : > { %p2120_p13 = pneg %p2119_p11 }
  0x41   : > { %p2127_p10 = pnand %p2126_p12, %p2120_p13 }
  0x43   : > { %2130 = shalt.err (!%p2127_p10)
}
  0x44   : > { %1893 = dma.hbm_to_vmem [thread:$0]  (!%p2614_p0), %s3085_s3, 16, %s419_s26, [#allocation12]  }
  0x45   : > { %s3087_s5 = sld [smem:[#allocation37_spill]] }
  0x4b   : > { %s2131_s21 = scalar_lea.hbm %s3087_s5, 16 }
  0x4c   : > { %p2132_p1 = scmp.ne.s32.totalorder %s3087_s5, %s2131_s21  ;;  %p2138_p10 = scmp.lt.u32.totalorder %s2131_s21, %s3087_s5 }
  0x4e   : > { %p2134_p3 = pnand %p2132_p1, %p2626_p2 }
  0x50   : > { %p2135_p8 = pneg %p2134_p3 }
  0x52   : > { %p2140_p12 = pnand %p2138_p10, %p2135_p8 }
  0x54   : > { %2143 = shalt.err (!%p2140_p12)
}
  0x55   : > { %s2144_s24 = scalar_lea.vmem %s441_s13, 16  ;;  %s2151_s26 = scalar_lea.vmem %s441_s13, 32 }
  0x56   : > { %p2145_p4 = scmp.ne.s32.totalorder %s441_s13, %s2144_s24  ;;  %p2152_p7 = scmp.lt.s32.totalorder %s441_s13, %s441_s13 }
  0x57   : > { %p2153_p9 = scmp.lt.s32.totalorder %s2151_s26, %s2144_s24 }
  0x58   : > { %p2147_p5 = pnand %p2145_p4, %p2626_p2 }
  0x59   : > { %p2154_p11 = por %p2153_p9, %p2152_p7 }
  0x5a   : > { %p2148_p6 = pneg %p2147_p5 }
  0x5c   : > { %p2155_p13 = pnand %p2154_p11, %p2148_p6 }
  0x5e   : > { %2158 = shalt.err (!%p2155_p13)
}
  0x5f   : > { %1899 = dma.hbm_to_vmem [thread:$0]  (!%p2614_p0), %s3087_s5, 16, %s441_s13, [#allocation15]  }
  0x60   : > { %s2429_s29 = smov [#allocation17]   ;;  %s3088_s7 = sld [smem:[#allocation38_spill]] }
  0x61   : > { %s462_s22 = sshll.u32 %s2429_s29, 4  ;;  %s463_s22 = int_to_ptr.vmem [resolvable:$true] %s462_s22 }
  0x66   : > { %s2159_s19 = scalar_lea.hbm %s3088_s7, 16 }
  0x67   : > { %p2160_p1 = scmp.ne.s32.totalorder %s3088_s7, %s2159_s19  ;;  %p2166_p10 = scmp.lt.u32.totalorder %s2159_s19, %s3088_s7 }
  0x69   : > { %p2162_p3 = pnand %p2160_p1, %p2626_p2 }
  0x6b   : > { %p2163_p8 = pneg %p2162_p3 }
  0x6d   : > { %p2168_p12 = pnand %p2166_p10, %p2163_p8 }
  0x6f   : > { %2171 = shalt.err (!%p2168_p12)
}
  0x70   : > { %s2172_s13 = scalar_lea.vmem %s463_s22, 16  ;;  %s2179_s15 = scalar_lea.vmem %s463_s22, 32 }
  0x71   : > { %p2173_p4 = scmp.ne.s32.totalorder %s463_s22, %s2172_s13  ;;  %p2180_p7 = scmp.lt.s32.totalorder %s463_s22, %s463_s22 }
  0x72   : > { %p2181_p9 = scmp.lt.s32.totalorder %s2179_s15, %s2172_s13 }
  0x73   : > { %p2175_p5 = pnand %p2173_p4, %p2626_p2 }
  0x74   : > { %p2182_p11 = por %p2181_p9, %p2180_p7 }
  0x75   : > { %p2176_p6 = pneg %p2175_p5 }
  0x77   : > { %p2183_p13 = pnand %p2182_p11, %p2176_p6 }
  0x79   : > { %2186 = shalt.err (!%p2183_p13)
}
  0x7a   : > { %1905 = dma.hbm_to_vmem [thread:$0]  (!%p2614_p0), %s3088_s7, 16, %s463_s22, [#allocation18]  }
  0x7b   : > { %s2430_s29 = smov [#allocation8]   ;;  %s2187_s20 = scalar_lea.hbm %s3033_s2, 256 }
  0x7c   : > { %s404_s21 = sshll.u32 %s2430_s29, 4  ;;  %p2188_p1 = scmp.ne.s32.totalorder %s3033_s2, %s2187_s20  ;;  %s405_s21 = int_to_ptr.vmem [resolvable:$true] %s404_s21 }
  0x7d   : > { %p2194_p10 = scmp.lt.u32.totalorder %s2187_s20, %s3033_s2 }
  0x7e   : > { %p2190_p3 = pnand %p2188_p1, %p2626_p2 }
  0x80   : > { %p2191_p8 = pneg %p2190_p3 }
  0x82   : > { %p2196_p12 = pnand %p2194_p10, %p2191_p8 }
  0x84   : > { %2199 = shalt.err (!%p2196_p12)
}
  0x85   : > { %s2200_s22 = scalar_lea.vmem %s405_s21, 256  ;;  %p2208_p7 = scmp.lt.s32.totalorder %s405_s21, %s405_s21 }
  0x86   : > { %p2201_p4 = scmp.ne.s32.totalorder %s405_s21, %s2200_s22  ;;  %p2209_p9 = scmp.lt.s32.totalorder %s2200_s22, %s2200_s22 }
  0x88   : > { %p2203_p5 = pnand %p2201_p4, %p2626_p2  ;;  %p2210_p11 = por %p2209_p9, %p2208_p7 }
  0x8a   : > { %p2204_p6 = pneg %p2203_p5 }
  0x8c   : > { %p2211_p13 = pnand %p2210_p11, %p2204_p6 }
  0x8e   : > { %2214 = shalt.err (!%p2211_p13)
}
  0x8f   : > { %s2431_s3 = smov 64   ;;  %s2432_s27 = smov 4  }
  0x90   : > { %1890 = dma.hbm_to_vmem [thread:$0]  (!%p2614_p0), %s3033_s2, 256, %s405_s21, [#allocation9], %s2431_s3, %s2431_s3, %s2432_s27  }
  0x91   : > { %s2433_s19 = smov [#allocation13]   ;;  %s2434_s24 = smov [#allocation16]  }
  0x92   : > { %s429_s20 = sshll.u32 %s2433_s19, 4  ;;  %s451_s26 = sshll.u32 %s2434_s24, 4  ;;  %s430_s20 = int_to_ptr.vmem [resolvable:$true] %s429_s20  ;;  %s452_s26 = int_to_ptr.vmem [resolvable:$true] %s451_s26 }
  0x93   : > { %s2215_s22 = scalar_lea.hbm %s3035_s4, 64 }
  0x94   : > { %p2216_p1 = scmp.ne.s32.totalorder %s3035_s4, %s2215_s22  ;;  %p2222_p10 = scmp.lt.u32.totalorder %s2215_s22, %s3035_s4 }
  0x96   : > { %p2218_p3 = pnand %p2216_p1, %p2626_p2 }
  0x98   : > { %p2219_p8 = pneg %p2218_p3 }
  0x9a   : > { %p2224_p12 = pnand %p2222_p10, %p2219_p8 }
  0x9c   : > { %2227 = shalt.err (!%p2224_p12)
}
  0x9d   : > { %s2228_s21 = scalar_lea.vmem %s430_s20, 64  ;;  %p2236_p7 = scmp.lt.s32.totalorder %s430_s20, %s430_s20 }
  0x9e   : > { %p2229_p4 = scmp.ne.s32.totalorder %s430_s20, %s2228_s21  ;;  %p2237_p9 = scmp.lt.s32.totalorder %s2228_s21, %s2228_s21 }
  0xa0   : > { %p2231_p5 = pnand %p2229_p4, %p2626_p2  ;;  %p2238_p11 = por %p2237_p9, %p2236_p7 }
  0xa2   : > { %p2232_p6 = pneg %p2231_p5 }
  0xa4   : > { %p2239_p13 = pnand %p2238_p11, %p2232_p6 }
  0xa6   : > { %2242 = shalt.err (!%p2239_p13)
}
  0xa7   : > { %1896 = dma.hbm_to_vmem [thread:$0]  (!%p2614_p0), %s3035_s4, 64, %s430_s20, [#allocation12]  }
  0xa8   : > { %s2243_s3 = scalar_lea.hbm %s3037_s6, 128 }
  0xa9   : > { %p2244_p1 = scmp.ne.s32.totalorder %s3037_s6, %s2243_s3  ;;  %p2250_p10 = scmp.lt.u32.totalorder %s2243_s3, %s3037_s6 }
  0xab   : > { %p2246_p3 = pnand %p2244_p1, %p2626_p2 }
  0xad   : > { %p2247_p8 = pneg %p2246_p3 }
  0xaf   : > { %p2252_p12 = pnand %p2250_p10, %p2247_p8 }
  0xb1   : > { %2255 = shalt.err (!%p2252_p12)
}
  0xb2   : > { %s2256_s24 = scalar_lea.vmem %s452_s26, 128  ;;  %p2264_p7 = scmp.lt.s32.totalorder %s452_s26, %s452_s26 }
  0xb3   : > { %p2257_p4 = scmp.ne.s32.totalorder %s452_s26, %s2256_s24  ;;  %p2265_p9 = scmp.lt.s32.totalorder %s2256_s24, %s2256_s24 }
  0xb5   : > { %p2259_p5 = pnand %p2257_p4, %p2626_p2  ;;  %p2266_p11 = por %p2265_p9, %p2264_p7 }
  0xb7   : > { %p2260_p6 = pneg %p2259_p5 }
  0xb9   : > { %p2267_p13 = pnand %p2266_p11, %p2260_p6 }
  0xbb   : > { %2270 = shalt.err (!%p2267_p13)
}
  0xbc   : > { %1902 = dma.hbm_to_vmem [thread:$0]  (!%p2614_p0), %s3037_s6, 128, %s452_s26, [#allocation15]  }
  0xbd   : > { %s2435_s15 = smov [#allocation19]   ;;  %s2271_s7 = scalar_lea.hbm %s3039_s8, 1024 }
  0xbe   : > { %s472_s22 = sshll.u32 %s2435_s15, 4  ;;  %p2272_p1 = scmp.ne.s32.totalorder %s3039_s8, %s2271_s7  ;;  %s473_s22 = int_to_ptr.vmem [resolvable:$true] %s472_s22 }
  0xbf   : > { %p2278_p10 = scmp.lt.u32.totalorder %s2271_s7, %s3039_s8 }
  0xc0   : > { %p2274_p3 = pnand %p2272_p1, %p2626_p2 }
  0xc2   : > { %p2275_p8 = pneg %p2274_p3 }
  0xc4   : > { %p2280_p12 = pnand %p2278_p10, %p2275_p8 }
  0xc6   : > { %2283 = shalt.err (!%p2280_p12)
}
  0xc7   : > { %s2284_s26 = scalar_lea.vmem %s473_s22, 1024  ;;  %p2292_p7 = scmp.lt.s32.totalorder %s473_s22, %s473_s22 }
  0xc8   : > { %p2285_p4 = scmp.ne.s32.totalorder %s473_s22, %s2284_s26  ;;  %p2293_p9 = scmp.lt.s32.totalorder %s2284_s26, %s2284_s26 }
  0xca   : > { %p2287_p5 = pnand %p2285_p4, %p2626_p2  ;;  %p2294_p11 = por %p2293_p9, %p2292_p7 }
  0xcc   : > { %p2288_p6 = pneg %p2287_p5 }
  0xce   : > { %p2295_p13 = pnand %p2294_p11, %p2288_p6 }
  0xd0   : > { %2298 = shalt.err (!%p2295_p13)
}
  0xd1   : > { %s2436_s29 = smov 128   ;;  %s2437_s14 = smov 8  }
  0xd2   : > { %1908 = dma.hbm_to_vmem [thread:$0]  (!%p2614_p0), %s3039_s8, 1024, %s473_s22, [#allocation18], %s2436_s29, %s2436_s29, %s2437_s14  }
  0xd3   : > { %p3089_p1 = scmp.ne.s32.totalorder %s3081_s23, 0 }
  0xd4   : > { %p3090_p3 = scmp.ne.s32.totalorder (!%p3089_p1), %s3082_s18, 0 }
  0xd5   : > { %535 = sbr.rel (%p3089_p1) target bundleno = 1626 (0x65a), region = 76 }
  0xdc   : > { %2368 = dma.done.wait (%p3090_p3), [#allocation9], 256  }
  0xdd   : > { %2370 = vsyncadd (%p3090_p3), [#allocation9], 4294967040 }
  0xde   : > { %2372 = dma.done.wait (%p3090_p3), [#allocation12], 80  }
  0xdf   : > { %2374 = vsyncadd (%p3090_p3), [#allocation12], 4294967216 }
  0xe0   : > { %2376 = dma.done.wait (%p3090_p3), [#allocation15], 144  }
  0xe1   : > { %2378 = vsyncadd (%p3090_p3), [#allocation15], 4294967152 }
  0xe2   : > { %2380 = dma.done.wait (%p3090_p3), [#allocation18], 1040  }
  0xe3   : > { %2382 = vsyncadd (%p3090_p3), [#allocation18], 4294966256  ;;  %s618_s23 = sand.u32 1, %s2393_s30   ;;  %s2770_s28 = sshll.u32 %s2401_s16, 1 }
  0xe4   : > { %s1727_s25 = sshll.u32 %s618_s23, 4  ;;  %p622_p0 = scmp.lt.s32.totalorder %s2405_s17, 1 }
  0xe5   : > { %p624_p2 = scmp.lt.s32.totalorder %s2770_s28, 3  ;;  %s1790_s18 = sadd.s32 2, %s2770_s28 }
  0xe6   : > { %s623_s20 = scalar_select %p622_p0, %s2405_s17, 1 }
  0xe7   : > { %s625_s13 = scalar_select %p624_p2, %s2770_s28, 3 }
  0xe8   : > { %s1729_s15 = sshll.u32 %s623_s20, 2  ;;  %p633_p8 = scmp.lt.s32.totalorder %s1790_s18, 3 }
  0xe9   : > { %s627_s22 = sadd.s32 %s1729_s15, %s625_s13  ;;  %s2785_s14 = scalar_lea.vmem [#allocation20], %s1727_s25 }
  0xea   : > { %s1730_s21 = sshll.u32 %s627_s22, 3  ;;  %s3117_s18 = smov (!%p633_p8, %s1790_s18), 3 }
  0xeb   : > { %s629_s11 = scalar_lea.vmem %s3031_s0, %s1730_s21  ;;  %s3119_s18 = smov (!%p633_p8, %s3117_s18), 3 }
  0xec   : > { %s640_s12 = sadd.s32 %s1729_s15, %s3119_s18  ;;  %p1737_p10 = scmp.ne.s32.totalorder %s2401_s16, 0 }
  0xed   : > { %s1736_s3 = sshll.u32 %s640_s12, 3  ;;  %vm653_vm0 = vcmask (!%p1737_p10), 523264   ;;  %vm655_vm1 = vcmask (!%p1737_p10), 516096   ;;  %v2438_v0 = vmov (!%p1737_p10), 0.0  }
  0xee   : > { %s642_s29 = scalar_lea.vmem %s3032_s1, %s1736_s3  ;;  %652 = sbr.rel (%p1737_p10) target bundleno = 245 (0xf5), region = 108  ;;  %654 = vst.msk [vmem:[#allocation6] sm:$0xff] (!%p1737_p10), %vm653_vm0, %v2438_v0 }
  0xef   : > { %656 = vst.msk [vmem:[#allocation7] sm:$0x1] (!%p1737_p10), %vm655_vm1, %v2438_v0 }
  0xf5 PF: > { %v2036_v1 = vld [vmem:[#allocation8] sm:$0xff]   ;;  %v2037_v2 = vld [vmem:[#allocation8 + $0x8] sm:$0xff]   ;;  %v657_v3 = vld [vmem:[%s629_s11] sm:$0xff]  ;;  %vm685_vm2 = vcmask 261120   ;;  %v745_v8 = vlaneseq  ;;  %v2439_v16 = vmov 0   ;;  %v2440_v21 = vmov 0.0  }
  0xf6   : > { %1811 = vmatprep.subr.bf16.mxu1 %v2036_v1  ;;  %v658_v4 = vld [vmem:[%s629_s11 + $0x8] sm:$0xff]  ;;  %v659_v5 = vld [vmem:[%s642_s29] sm:$0xff]  ;;  %1819 = vmatprep.subr.bf16.mxu0 %v2440_v21  ;;  %v2052_v23 = vld [vmem:[%s3041_s10 + $0x10] sm:$0xff]   ;;  %p740_p12 = scmp.lt.s32.totalorder %s2401_s16, 1  ;;  %vm785_vm4 = vcmask 523271   ;;  %vm835_vm9 = vcmask 523264  }
  0xf7   : > { %1812 = vmatpush3.bf16.msra.mxu1 %v2036_v1  ;;  %v660_v6 = vpack.c.bf16 %v658_v4, %v657_v3  ;;  %v661_v7 = vpack.c.bf16 %v659_v5, %v659_v5  ;;  %v2790_v9 = vshrl.u32 %v745_v8, 7  ;;  %v2792_v10 = vand.u32 127, %v745_v8  ;;  %v2040_v11 = vld [vmem:[#allocation19 + $0x4] ss:$8 sps:$4 sm:$0xff]   ;;  %v2038_v12 = vld [vmem:[#allocation19] ss:$8 sps:$4 sm:$0xff]  }
  0xf8   : > { %1813 = vmatprep.subr.bf16.mxu1 %v2037_v2  ;;  %v2043_v13 = vld [vmem:[#allocation19 + $0x14] ss:$8 sps:$4 sm:$0xff]   ;;  %v2041_v14 = vld [vmem:[#allocation19 + $0x10] ss:$8 sps:$4 sm:$0xff]   ;;  %v2046_v15 = vld [vmem:[#allocation19 + $0x24] ss:$8 sps:$4 sm:$0xff]  }
  0xf9   : > { %1815 = vmatprep.mubr.msk.bf16.mxu1 %vm685_vm2, %v660_v6  ;;  %vm1100_vm3 = vcmp.eq.s32.totalorder %v2790_v9, %v2792_v10  ;;  %v2044_v17 = vld [vmem:[#allocation19 + $0x20] ss:$8 sps:$4 sm:$0xff]   ;;  %v2049_v18 = vld [vmem:[#allocation19 + $0x34] ss:$8 sps:$4 sm:$0xff]   ;;  %v2047_v19 = vld [vmem:[#allocation19 + $0x30] ss:$8 sps:$4 sm:$0xff]  }
  0xfa   : > { %v2050_v20 = vld [vmem:[%s3041_s10] sm:$0xff]   ;;  %v2051_v22 = vld [vmem:[%s3041_s10 + $0x8] sm:$0xff]   ;;  %v2053_v24 = vld [vmem:[%s3041_s10 + $0x18] sm:$0xff]   ;;  %s741_s12 = scalar_select %p740_p12, 1, 0  ;;  %v747_v32 = vadd.s32 8, %v2790_v9 }
  0xfb   : > { %1814 = vmatpush3.bf16.msra.mxu1 %v2037_v2  ;;  %1820 = vmatpush3.bf16.msra.mxu0 %v2050_v20  ;;  %v2054_v25 = vld [vmem:[%s3041_s10 + $0x20] sm:$0xff]   ;;  %v2055_v26 = vld [vmem:[%s3041_s10 + $0x28] sm:$0xff]   ;;  %v1738_v27 = vld [vmem:[#allocation11] ss:$0 sm:$0xff]  ;;  %v2824_v36 = vsub.s32 0, %v2790_v9  ;;  %vm759_vm5 = vcmp.eq.s32.totalorder %v2790_v9, 0 }
  0xfc   : > { %902 = vmatprep.subr.bf16.mxu1 %v2040_v11  ;;  %1821 = vmatprep.subr.bf16.mxu0 %v2440_v21  ;;  %s742_s3 = scvt.s32.f32 %s741_s12  ;;  %v1743_v38 = vld [vmem:[#allocation7] ss:$0 sm:$0xff]  ;;  %vm763_vm6 = vcmp.lt.s32.totalorder %v2790_v9, 1  ;;  %vm773_vm7 = vcmp.eq.s32.totalorder %v747_v32, 15  ;;  %vm776_vm8 = vcmp.lt.s32.totalorder %v2790_v9, 7  ;;  %vm2441_vm10 = vmmov 0  }
  0xfd   : > { %v1744_v44 = vld [vmem:[#allocation13] ss:$0 sm:$0xff]  ;;  %v1745_v46 = vld [vmem:[#allocation13 + $0x1] ss:$0 sm:$0xff]  ;;  %v1746_v47 = vld [vmem:[#allocation13 + $0x2] ss:$0 sm:$0xff]  ;;  %1835 = vmatprep.mubr.msk.bf16.mxu0 %vm2441_vm10, %v2440_v21 }
  0xfe   : > { %1816 = vmatmul.mubr.msk.bf16.vlgmr.msra.gmra.mrb[0].mxu1 %vm685_vm2, %v661_v7  ;;  %v743_v29 = vstv %s742_s3  ;;  %v1747_v62 = vld [vmem:[#allocation14] ss:$0 sm:$0xff]  ;;  %v2853_v32 = vld [vmem:[#allocation16] sm:$0xff]  ;;  %s3091_s13 = sld [smem:[#allocation39_spill]]  ;;  %s2862_s15 = smov 0  }
  0xff   : > { %903 = vmatpush1.bf16.msra.mxu1 %v2038_v12  ;;  %934 = vmatprep.mubr.bf16.mxu1 %v2439_v16  ;;  %v2056_v16 = vld [vmem:[%s3041_s10 + $0x30] sm:$0xff]  }
 0x100   : > { %904 = vmatprep.subr.bf16.mxu1 %v2043_v13  ;;  %1822 = vmatpush3.bf16.msra.mxu0 %v2051_v22 }
 0x101   : > { %1823 = vmatprep.subr.bf16.mxu0 %v2440_v21 }
 0x103   : > { %905 = vmatpush1.bf16.msra.mxu1 %v2041_v14 }
 0x104   : > { %906 = vmatprep.subr.bf16.mxu1 %v2046_v15  ;;  %1824 = vmatpush3.bf16.msra.mxu0 %v2052_v23 }
 0x105   : > { %1825 = vmatprep.subr.bf16.mxu0 %v2440_v21 }
 0x107   : > { %907 = vmatpush1.bf16.msra.mxu1 %v2044_v17  ;;  %v2057_v17 = vld [vmem:[%s3041_s10 + $0x38] sm:$0xff]  }
 0x108   : > { %908 = vmatprep.subr.bf16.mxu1 %v2049_v18  ;;  %1826 = vmatpush3.bf16.msra.mxu0 %v2053_v24  ;;  %v2846_v18 = vsub.s32 1, %v2790_v9 }
 0x109   : > { %1827 = vmatprep.subr.bf16.mxu0 %v2440_v21 }
 0x10b   : > { %909 = vmatpush1.bf16.msra.mxu1 %v2047_v19  ;;  %v847_v19 = vld [vmem:[%s3040_s9] sm:$0x3] }
 0x10c   : > { %1828 = vmatpush3.bf16.msra.mxu0 %v2054_v25  ;;  %v856_v20 = vrot.slane %v847_v19, %v2846_v18  ;;  %v852_v22 = vrot.slane %v847_v19, %v2824_v36 }
 0x10d   : > { %1829 = vmatprep.subr.bf16.mxu0 %v2440_v21 }
 0x110   : > { %1830 = vmatpush3.bf16.msra.mxu0 %v2055_v26 }
 0x111   : > { %1831 = vmatprep.subr.bf16.mxu0 %v2440_v21 }
 0x114   : > { %1832 = vmatpush3.bf16.msra.mxu0 %v2056_v16 }
 0x115   : > { %1833 = vmatprep.subr.bf16.mxu0 %v2440_v21 }
 0x118   : > { %1834 = vmatpush3.bf16.msra.mxu0 %v2057_v17 }
 0x1d1   : > { %v1817_v28 = vpop.f32.mrb[0].mxu1 }
 0x1d2   : > { %v735_v30 = vadd.f32 %v1817_v28, %v1738_v27  ;;  %v726_v31 = vpop.f32.mrb[1].mxu1 }
 0x1d3   : > { %v727_v33 = vadd.f32 %v1738_v27, %v726_v31  ;;  %v1818_v34 = vpop.f32.mrb[2].mxu1 }
 0x1d4   : > { %v744_v35 = vmul.f32 %v743_v29, %v735_v30  ;;  %v729_v37 = vpop.f32.mrb[3].mxu1  ;;  %v1759_v34 = vld [vmem:[%s3091_s13] ss:$0 sm:$0xff] }
 0x1d5   : > { %v730_v39 = vadd.f32 %v1738_v27, %v729_v37  ;;  %v761_v40 = vrot.slane %v727_v33, 7  ;;  %v774_v41 = vrot.slane %v727_v33, 1  ;;  %v799_v56 = vmul.f32 %v1745_v46, %v727_v33  ;;  %v1105_v33 = vld [vmem:[#allocation6] sm:$0xff]  }
 0x1d6   : > { %v758_v45 = vrot.slane %v744_v35, %v2824_v36 }
 0x1d7   : > { %v762_v42 = vrot.slane %v730_v39, 7  ;;  %v775_v43 = vrot.slane %v730_v39, 1  ;;  %786 = vst.msk [vmem:[#allocation7 - $0x7] sm:$0x80] %vm785_vm4, %v730_v39  ;;  %v800_v55 = vmul.f32 %v1745_v46, %v730_v39 }
 0x1d9   : > { %v764_v48 = vsel %vm763_vm6, %v761_v40, %v762_v42  ;;  %v765_v49 = vsel %vm763_vm6, %v762_v42, %v761_v40  ;;  %v777_v50 = vsel %vm776_vm8, %v774_v41, %v775_v43  ;;  %v778_v51 = vsel %vm776_vm8, %v775_v43, %v774_v41 }
 0x1da   : > { %v770_v52 = vsel %vm759_vm5, %v1743_v38, %v765_v49  ;;  %v784_v53 = vsel %vm773_vm7, %v758_v45, %v778_v51  ;;  %v793_v54 = vmul.f32 %v1744_v44, %v764_v48  ;;  %v808_v61 = vmul.f32 %v1746_v47, %v777_v50 }
 0x1db   : > { %v792_v57 = vmul.f32 %v1744_v44, %v770_v52  ;;  %v809_v58 = vmul.f32 %v1746_v47, %v784_v53 }
 0x1dc   : > { %v802_v59 = vadd.f32 %v800_v55, %v793_v54 }
 0x1dd   : > { %v801_v60 = vadd.f32 %v799_v56, %v792_v57 }
 0x1de   : > { %v811_v63 = vadd.f32 %v809_v58, %v802_v59 }
 0x1df   : > { %v810_v0 = vadd.f32 %v808_v61, %v801_v60 }
 0x1e0   : > { %v820_v1 = vadd.f32 %v1747_v62, %v811_v63 }
 0x1e1   : > { %v819_v2 = vadd.f32 %v1747_v62, %v810_v0 }
 0x1e2   : > { %v1749_v3 = vmul.f32 -1.442695, %v820_v1 }
 0x1e3   : > { %v1748_v4 = vmul.f32 -1.442695, %v819_v2 }
 0x1e4   : > { %2058 = vpow2.f32 %v1749_v3 }
 0x1e5   : > { %2060 = vpow2.f32 %v1748_v4 }
 0x1ee   : > { %v2059_v5 = vpop.eup %2058 }
 0x1ef   : > { %v2061_v6 = vpop.eup %2060  ;;  %v828_v7 = vadd.f32 1.0, %v2059_v5 }
 0x1f0   : > { %v827_v8 = vadd.f32 1.0, %v2061_v6 }
 0x1f1   : > { %2062 = vrcp.f32 %v828_v7 }
 0x1f2   : > { %2064 = vrcp.f32 %v827_v8 }
 0x1fb   : > { %v2063_v11 = vpop.eup %2062 }
 0x1fc   : > { %v2065_v12 = vpop.eup %2064  ;;  %v834_v13 = vmul.f32 %v2063_v11, %v820_v1 }
 0x1fd   : > { %v833_v14 = vmul.f32 %v2065_v12, %v819_v2 }
 0x1fe   : > { %837 = vst.msk [vmem:[#allocation2 + $0x8] sm:$0xff] %vm835_vm9, %v834_v13 }
 0x1ff   : > { %836 = vst.msk [vmem:[#allocation2] sm:$0xff] %vm835_vm9, %v833_v14  ;;  %v838_v15 = vpack.c.bf16 %v834_v13, %v833_v14 }
 0x201   : > { %1758 = vmatmul.mubr.msk.bf16.vlgmr.msra.gmra.mrb[4].mxu1 %vm835_vm9, %v838_v15 }
 0x2d4   : > { %v936_v23 = vpop.f32.mrb[4].mxu1 }
 0x2d5   : > { %v938_v24 = vpop.f32.mrb[5].mxu1  ;;  %v937_v27 = vadd.f32 %v936_v23, %v852_v22 }
 0x2d6   : > { %v939_v25 = vadd.f32 %v938_v24, %v856_v20  ;;  %v940_v26 = vpop.f32.mrb[6].mxu1 }
 0x2d7   : > { %v941_v28 = vadd.f32 %v940_v26, %v852_v22  ;;  %v942_v29 = vpop.f32.mrb[7].mxu1 }
 0x2d8   : > { %945 = vst [vmem:[#allocation4] sm:$0xff] %v939_v25  ;;  %v943_v30 = vadd.f32 %v942_v29, %v856_v20 }
 0x2d9   : > { %v947_v31 = vpack.c.bf16 %v941_v28, %v937_v27 }
 0x2da   : > { %946 = vst [vmem:[#allocation4 + $0x8] sm:$0xff] %v943_v30 }
 0x2db   : > { %1836 = vmatmul.mubr.bf16.vlgmr.msra.gmra.mrb[0].mxu0 %v947_v31 }
 0x3ae   : > { %v1053_v35 = vpop.f32.mrb[0].mxu0 }
 0x3af   : > { %v1054_v37 = vadd.f32 %v1759_v34, %v1053_v35  ;;  %v1837_v38 = vpop.f32.mrb[1].mxu0 }
 0x3b0   : > { %v1056_v39 = vpop.f32.mrb[2].mxu0 }
 0x3b1   : > { %v1066_v40 = vand.u32 2147483647, %v1054_v37  ;;  %v1057_v41 = vadd.f32 %v1759_v34, %v1056_v39  ;;  %v1838_v42 = vpop.f32.mrb[3].mxu0  ;;  %v1060_v62 = vmax.f32 %v1054_v37, 0.0  ;;  %vm1062_vm13 = vcmp.ne.f32.partialorder %v1054_v37, %v1054_v37 }
 0x3b3   : > { %v1068_v43 = vsub.f32 0.0, %v1066_v40  ;;  %v1067_v44 = vand.u32 2147483647, %v1057_v41  ;;  %v1061_v3 = vmax.f32 %v1057_v41, 0.0  ;;  %vm1063_vm14 = vcmp.ne.f32.partialorder %v1057_v41, %v1057_v41 }
 0x3b5   : > { %v1070_v45 = vmul.f32 1.442695, %v1068_v43  ;;  %v1069_v46 = vsub.f32 0.0, %v1067_v44 }
 0x3b7   : > { %2066 = vpow2.f32 %v1070_v45  ;;  %v1072_v47 = vmul.f32 1.442695, %v1069_v46 }
 0x3b9   : > { %2068 = vpow2.f32 %v1072_v47 }
 0x3c1   : > { %v2067_v48 = vpop.eup %2066 }
 0x3c2   : > { %v1074_v49 = vadd.f32 1.0, %v2067_v48  ;;  %v1077_v52 = vmul.f32 -0.5, %v2067_v48  ;;  %v1080_v55 = vand.u32 2147483647, %v2067_v48 }
 0x3c3   : > { %v2069_v50 = vpop.eup %2068 }
 0x3c4   : > { %2070 = vlog2.f32 %v1074_v49  ;;  %v1083_v51 = vadd.f32 1.0, %v2069_v50  ;;  %v1086_v53 = vmul.f32 -0.5, %v2069_v50  ;;  %v1078_v54 = vadd.f32 1.0, %v1077_v52 }
 0x3c5   : > { %v1089_v58 = vand.u32 2147483647, %v2069_v50  ;;  %vm1081_vm11 = vcmp.lt.f32.partialorder %v1080_v55, 0.0004427343 }
 0x3c6   : > { %2072 = vlog2.f32 %v1083_v51  ;;  %v1087_v56 = vadd.f32 1.0, %v1086_v53  ;;  %v1079_v60 = vmul.f32 %v2067_v48, %v1078_v54 }
 0x3c7   : > { %vm1090_vm12 = vcmp.lt.f32.partialorder %v1089_v58, 0.0004427343 }
 0x3c8   : > { %v1088_v1 = vmul.f32 %v2069_v50, %v1087_v56 }
 0x3ce   : > { %v2071_v57 = vpop.eup %2070 }
 0x3cf   : > { %v1076_v59 = vmul.f32 0.6931472, %v2071_v57 }
 0x3d0   : > { %v2073_v61 = vpop.eup %2072 }
 0x3d1   : > { %v1082_v63 = vsel %vm1081_vm11, %v1079_v60, %v1076_v59  ;;  %v1085_v0 = vmul.f32 0.6931472, %v2073_v61 }
 0x3d2   : > { %v1092_v2 = vadd.f32 %v1082_v63, %v1060_v62 }
 0x3d3   : > { %v1091_v4 = vsel %vm1090_vm12, %v1088_v1, %v1085_v0 }
 0x3d4   : > { %v1094_v5 = vsel %vm1062_vm13, %v1054_v37, %v1092_v2  ;;  %v1093_v6 = vadd.f32 %v1091_v4, %v1061_v3 }
 0x3d5   : > { %1096 = vst.msk [vmem:[#allocation3] sm:$0xff] %vm835_vm9, %v1094_v5 }
 0x3d6   : > { %v1095_v7 = vsel %vm1063_vm14, %v1057_v41, %v1093_v6 }
 0x3d7   : > { %1097 = vst.msk [vmem:[#allocation3 + $0x8] sm:$0xff] %vm835_vm9, %v1095_v7 }
 0x3d8 LB: >> { %v2442_v8 = vmov 0.0   ;;  %vm2443_vm15 = vmmov 0   ;;  %s2871_s18 = sshll.u32 %s2425_s15, 3  ;;  %v2444_v11 = vmov 2   ;;  %v2445_v12 = vmov 0   ;;  %vm1770_vm0 = vmpackc.low %vm1100_vm3, %vm1100_vm3  ;;  %s1111_s15 = sadd.s32 1, %s2425_s15   ;;  %s2425_s15 = sphi %s2862_s15, %s1111_s15   ;;  %v2421_v33 = vphi %v1105_v33, %v3092_v33  }
 0x3d9   : >> { %1839 = vmatprep.subr.bf16.mxu0 %v2442_v8  ;;  %1841 = vmatprep.mubr.msk.bf16.mxu0 %vm2443_vm15, %v2442_v8  ;;  %s1118_s22 = scalar_lea.vmem [#allocation4], %s2871_s18  ;;  %v2446_v15 = vmov 1.0|1.0   ;;  %v2447_v22 = vmov 3   ;;  %v2448_v23 = vmov 1   ;;  %v2449_v24 = vmov 4  }
 0x3da   : >> { %2076 = vset.pattern.permute.xlu1 %v2444_v11  ;;  %2074 = vset.pattern.permute.xlu0 %v2445_v12  ;;  %v1119_v13 = vld [vmem:[%s1118_s22] sm:$0xff]  ;;  %v2450_v25 = vmov 5   ;;  %v2451_v26 = vmov 6   ;;  %v2452_v27 = vmov 7   ;;  %s1114_s21 = scalar_lea.vmem [#allocation3], %s2871_s18  ;;  %v1221_v34 = vsub.s32 2, %v2790_v9 }
 0x3db   : >> { %v1120_v14 = vpack.c.bf16 %v1119_v13, %v1119_v13  ;;  %v1249_v39 = vsub.s32 3, %v2790_v9  ;;  %v1277_v44 = vsub.s32 4, %v2790_v9  ;;  %v1305_v46 = vsub.s32 5, %v2790_v9  ;;  %s1116_s5 = scalar_lea.vmem [#allocation2], %s2871_s18  ;;  %s1401_s7 = scalar_lea.vmem [#allocation5], %s2871_s18 }
 0x3dc   : >> { %v1333_v51 = vsub.s32 6, %v2790_v9  ;;  %v1117_v55 = vld [vmem:[%s1116_s5] sm:$0xff]  ;;  %v1361_v58 = vsub.s32 7, %v2790_v9  ;;  %vm1387_vm1 = vcmask 1040384   ;;  %vm1389_vm4 = vcmask 1041408   ;;  %p1108_p4 = scmp.ge.s32.totalorder %s1111_s15, 2  }
 0x3dd   : >> { %1840 = vmatpush3.bf16.xpose.msra.mxu0 %v1120_v14  ;;  %vm1391_vm5 = vcmask 1042432   ;;  %vm1393_vm6 = vcmask 1043456   ;;  %vm1395_vm7 = vcmask 1044480   ;;  %vm1397_vm8 = vcmask 1045504   ;;  %s3093_s3 = sld [smem:[#allocation40_spill]] (%p1108_p4)  ;;  %s1781_s25 = sshll.u32 (%p1108_p4), %s2405_s17, 2 }
 0x3de   : >> { %v1115_v28 = vld [vmem:[%s1114_s21] sm:$0xff]  ;;  %vm1399_vm11 = vcmask 1046528   ;;  %1845 = vmatprep.subr.bf16.mxu0 (%p1108_p4), %v2440_v21  ;;  %v1772_v9 = vld [vmem:[#allocation17] ss:$0 sm:$0xff] (%p1108_p4)  ;;  %s1518_s20 = sadd.s32 (%p1108_p4), %s1781_s25, %s2770_s28  ;;  %s3094_s18 = sld [smem:[#allocation41_spill]] (%p1108_p4) }
 0x3df   : >> { %v1165_v29 = vrot.slane %v1115_v28, %v2824_v36  ;;  %v1194_v31 = vrot.slane %v1115_v28, %v2846_v18  ;;  %v1222_v38 = vrot.slane %v1115_v28, %v1221_v34  ;;  %v1250_v43 = vrot.slane %v1115_v28, %v1249_v39  ;;  %s3095_s22 = sld [smem:[#allocation32_spill]] (%p1108_p4)  ;;  %s1782_s21 = sshll.u32 (%p1108_p4), %s1518_s20, 7 }
 0x3e0   : >> { %v1278_v49 = vrot.slane %v1115_v28, %v1277_v44  ;;  %v1306_v50 = vrot.slane %v1115_v28, %v1305_v46  ;;  %v1334_v57 = vrot.slane %v1115_v28, %v1333_v51  ;;  %v2900_v62 = vmul.f32 %v1117_v55, %v1115_v28  ;;  %s1521_s5 = sshll.u32 (%p1108_p4), %s2785_s14, 4  ;;  %s3096_s12 = sld [smem:[#allocation42_spill]] (%p1108_p4)  ;;  %s2971_s5 = int_to_ptr.vmem [resolvable:$true] %s1521_s5 }
 0x3e1   : >> { %v1166_v30 = vmul.f32 %v1165_v29, %v2853_v32  ;;  %v1195_v37 = vmul.f32 %v1194_v31, %v2853_v32  ;;  %v1223_v42 = vmul.f32 %v1222_v38, %v2853_v32  ;;  %v1251_v48 = vmul.f32 %v1250_v43, %v2853_v32  ;;  %s2979_s17 = scalar_lea.sflag (%p1108_p4), [#allocation10], %s618_s23  ;;  %s2299_s28 = scalar_lea.vmem (%p1108_p4), %s2971_s5, 256 }
 0x3e2   : >> { %v1279_v54 = vmul.f32 %v1278_v49, %v2853_v32  ;;  %v1307_v56 = vmul.f32 %v1306_v50, %v2853_v32  ;;  %v1335_v1 = vmul.f32 %v1334_v57, %v2853_v32  ;;  %v1362_v2 = vrot.slane %v1115_v28, %v1361_v58  ;;  %p2300_p5 = scmp.ne.s32.totalorder (%p1108_p4), %s2971_s5, %s2299_s28  ;;  %s2453_s27 = smov (%p1108_p4), [#allocation20]  }
 0x3e3   : >> { %v1167_v35 = vpack.c.bf16 %v1166_v30, %v1166_v30  ;;  %v1196_v41 = vpack.c.bf16 %v1195_v37, %v1195_v37  ;;  %v1224_v47 = vpack.c.bf16 %v1223_v42, %v1223_v42  ;;  %v1252_v53 = vpack.c.bf16 %v1251_v48, %v1251_v48  ;;  %v2101_v10 = vld [vmem:[%s3093_s3 + $0x10] sm:$0xff] (%p1108_p4)   ;;  %s2303_s26 = sshll.u32 (%p1108_p4), %s2453_s27, 4  ;;  %s2304_s26 = int_to_ptr.vmem [resolvable:$false] %s2303_s26 }
 0x3e4   : >> { %1842 = vmatmul.mubr.msk.bf16.vlgmr.msra.gmra.mrb[0].mxu0 %vm1770_vm0, %v2446_v15  ;;  %v1280_v61 = vpack.c.bf16 %v1279_v54, %v1279_v54  ;;  %v1308_v0 = vpack.c.bf16 %v1307_v56, %v1307_v56  ;;  %v1179_v4 = vrot.slane %v2900_v62, %v2824_v36  ;;  %v1336_v8 = vpack.c.bf16 %v1335_v1, %v1335_v1  ;;  %s2305_s29 = scalar_lea.vmem (%p1108_p4), %s2304_s26, 512  ;;  %p2306_p11 = scmp.lt.s32.totalorder (%p1108_p4), %s2971_s5, %s2304_s26 }
 0x3e5   : >> { %v1169_v40 = vmul.bf16 1069105081, %v1167_v35  ;;  %v1198_v45 = vmul.bf16 1069105081, %v1196_v41  ;;  %v1226_v52 = vmul.bf16 1069105081, %v1224_v47  ;;  %v1363_v11 = vmul.f32 %v1362_v2, %v2853_v32  ;;  %1853 = vmatprep.mubr.msk.bf16.mxu0 (%p1108_p4), %vm2441_vm10, %v2440_v21  ;;  %p2307_p13 = scmp.lt.s32.totalorder (%p1108_p4), %s2305_s29, %s2299_s28 }
 0x3e6   : >> { %v1254_v60 = vmul.bf16 1069105081, %v1252_v53  ;;  %v1282_v3 = vmul.bf16 1069105081, %v1280_v61  ;;  %v1310_v7 = vmul.bf16 1069105081, %v1308_v0  ;;  %v1207_v15 = vrot.slane %v2900_v62, %v2846_v18  ;;  %s2969_s16 = scalar_lea.hbm (%p1108_p4), %s3096_s12, %s1782_s21 }
 0x3e7   : >> { %2083 = vpow.bf16 %v1169_v40  ;;  %v1263_v35 = vrot.slane %v2900_v62, %v1249_v39  ;;  %v1291_v42 = vrot.slane %v2900_v62, %v1277_v44  ;;  %v1319_v54 = vrot.slane %v2900_v62, %v1305_v46  ;;  %p3097_p6 = scmp.ne.s32.totalorder (%p1108_p4), %s3095_s22, 0  ;;  %p2308_p1 = por (%p1108_p4), %p2307_p13, %p2306_p11 }
 0x3e8   : >> { %2085 = vpow.bf16 %v1198_v45 }
 0x3e9   : >> { %2087 = vpow.bf16 %v1226_v52  ;;  %p2301_p7 = pnand (%p1108_p4), %p2300_p5, %p3097_p6 }
 0x3ea   : >> { %2089 = vpow.bf16 %v1254_v60 }
 0x3eb   : >> { %2091 = vpow.bf16 %v1282_v3  ;;  %p2302_p9 = pneg (%p1108_p4), %p2301_p7 }
 0x3ec   : >> { %2093 = vpow.bf16 %v1310_v7 }
 0x3ed   : > { %p2309_p3 = pnand (%p1108_p4), %p2308_p1, %p2302_p9 }
 0x3f2   : >> { %v2084_v59 = vpop.eup %2083 }
 0x3f3   : >> { %v1181_v63 = vunpack.c.l.bf16 %v2084_v59  ;;  %v2086_v5 = vpop.eup %2085 }
 0x3f4   : >> { %v1209_v14 = vunpack.c.l.bf16 %v2086_v5 }
 0x3f5   : >> { %v1182_v6 = vmul.f32 %v2421_v33, %v1181_v63  ;;  %v1235_v33 = vrot.slane %v2900_v62, %v1221_v34 }
 0x4b7   : >> { %v1155_v16 = vpop.f32.mrb[0].mxu0 }
 0x4b8   : >> { %1229 = vperm.xlu1 %2076, %v1155_v16   ;;  %1173 = vperm.xlu0 %2074, %v1155_v16   ;;  %v1843_v17 = vpop.f32.mrb[1].mxu0 }
 0x4b9   : >> { %v1158_v19 = vpop.f32.mrb[2].mxu0 }
 0x4ba   : >> { %v1844_v20 = vpop.f32.mrb[3].mxu0 }
 0x4bb   : >> { %v1338_v20 = vmul.bf16 1069105081, %v1336_v8 }
 0x4bc   : >> { %2077 = vset.pattern.permute.xlu1 %v2447_v22  ;;  %2075 = vset.pattern.permute.xlu0 %v2448_v23  ;;  %v1364_v22 = vpack.c.bf16 %v1363_v11, %v1363_v11 }
 0x4bd   : >> { %1257 = vperm.xlu1 %2077, %v1155_v16   ;;  %1201 = vperm.xlu0 %2075, %v1155_v16   ;;  %2095 = vpow.bf16 %v1338_v20 }
 0x4be   : >> { %v1366_v28 = vmul.bf16 1069105081, %v1364_v22 }
 0x4c0   : >> { %2097 = vpow.bf16 %v1366_v28 }
 0x4c1   : >> { %2078 = vset.pattern.permute.xlu1 %v2449_v24  ;;  %2079 = vset.pattern.permute.xlu0 %v2450_v25 }
 0x4c2   : >> { %1285 = vperm.xlu1 %2078, %v1155_v16   ;;  %1313 = vperm.xlu0 %2079, %v1155_v16  }
 0x4c6   : >> { %2080 = vset.pattern.permute.xlu1 %v2451_v26  ;;  %2082 = vset.pattern.permute.xlu0 %v2452_v27 }
 0x4c7   : >> { %1341 = vperm.xlu1 %2080, %v1155_v16  }
 0x4cb   : >> { %2081 = vset.pattern.permute.xlu1 %v2452_v27 }
 0x4cc   : >> { %1369 = vperm.xlu1 %2081, %v1155_v16   ;;  %v2088_v16 = vpop.eup %2087 }
 0x4cd   : >> { %v1237_v26 = vunpack.c.l.bf16 %v2088_v16  ;;  %v2090_v27 = vpop.eup %2089 }
 0x4ce   : >> { %v1265_v38 = vunpack.c.l.bf16 %v2090_v27  ;;  %v2092_v40 = vpop.eup %2091 }
 0x4cf   : >> { %v2094_v34 = vpop.eup %2093  ;;  %v1293_v48 = vunpack.c.l.bf16 %v2092_v40 }
 0x4d0   : >> { %v1321_v55 = vunpack.c.l.bf16 %v2094_v34  ;;  %v2096_v56 = vpop.eup %2095 }
 0x4d1   : >> { %v1349_v5 = vunpack.c.l.bf16 %v2096_v56 }
 0x537   : >> { %v1174_v12 = vpop.permute.xlu0 %1173  ;;  %v1230_v17 = vpop.permute.xlu1 %1229 }
 0x538   : >> { %v1180_v13 = vmul.f32 %v1179_v4, %v1174_v12  ;;  %v1236_v31 = vmul.f32 %v1235_v33, %v1230_v17  ;;  %v1347_v4 = vrot.slane %v2900_v62, %v1333_v51 }
 0x53a   : >> { %v1183_v19 = vadd.f32 %v1182_v6, %v1180_v13  ;;  %v2098_v6 = vpop.eup %2097 }
 0x53b   : >> { %v1377_v20 = vunpack.c.l.bf16 %v2098_v6 }
 0x53c   : >> { %v1202_v23 = vpop.permute.xlu0 %1201  ;;  %v1210_v24 = vmul.f32 %v1209_v14, %v1183_v19  ;;  %v1258_v30 = vpop.permute.xlu1 %1257  ;;  %v1184_v39 = vsel %vm835_vm9, %v1183_v19, 0.0  ;;  %v1375_v19 = vrot.slane %v2900_v62, %v1361_v58 }
 0x53d   : >> { %v1208_v25 = vmul.f32 %v1207_v15, %v1202_v23  ;;  %v1264_v43 = vmul.f32 %v1263_v35, %v1258_v30  ;;  %v1185_v61 = vrot.slane %v1184_v39, 4 }
 0x53f   : >> { %v1211_v29 = vadd.f32 %v1210_v24, %v1208_v25  ;;  %v1186_v12 = vadd.f32 %v1185_v61, %v1184_v39 }
 0x541   : >> { %v1238_v37 = vmul.f32 %v1237_v26, %v1211_v29  ;;  %v1212_v45 = vsel %vm835_vm9, %v1211_v29, 0.0  ;;  %v1286_v50 = vpop.permute.xlu1 %1285  ;;  %v1314_v0 = vpop.permute.xlu0 %1313  ;;  %v1187_v33 = vrot.slane %v1186_v12, 2 }
 0x542   : >> { %v1213_v53 = vrot.slane %v1212_v45, 4  ;;  %v1292_v59 = vmul.f32 %v1291_v42, %v1286_v50  ;;  %v1320_v8 = vmul.f32 %v1319_v54, %v1314_v0 }
 0x543   : >> { %v1239_v41 = vadd.f32 %v1238_v37, %v1236_v31  ;;  %v1188_v58 = vadd.f32 %v1187_v33, %v1186_v12 }
 0x544   : >> { %v1214_v2 = vadd.f32 %v1213_v53, %v1212_v45 }
 0x545   : >> { %v1266_v47 = vmul.f32 %v1265_v38, %v1239_v41  ;;  %v1240_v49 = vsel %vm835_vm9, %v1239_v41, 0.0  ;;  %v1189_v39 = vrot.slane %v1188_v58, 1 }
 0x546   : >> { %v1241_v44 = vrot.slane %v1240_v49, 4  ;;  %v1342_v3 = vpop.permute.xlu1 %1341  ;;  %v1215_v16 = vrot.slane %v1214_v2, 2 }
 0x547   : >> { %v1267_v52 = vadd.f32 %v1266_v47, %v1264_v43  ;;  %v1348_v23 = vmul.f32 %v1347_v4, %v1342_v3  ;;  %v1190_v61 = vadd.f32 %v1189_v39, %v1188_v58 }
 0x548   : >> { %v1242_v46 = vadd.f32 %v1241_v44, %v1240_v49  ;;  %v1216_v30 = vadd.f32 %v1215_v16, %v1214_v2  ;;  %v2099_v16 = vld [vmem:[%s3093_s3] sm:$0xff] (%p1108_p4)  }
 0x549   : >> { %v1268_v57 = vsel %vm835_vm9, %v1267_v52, 0.0  ;;  %v1294_v60 = vmul.f32 %v1293_v48, %v1267_v52  ;;  %1846 = vmatpush3.bf16.msra.mxu0 (%p1108_p4), %v2099_v16 }
 0x54a   : >> { %v1269_v63 = vrot.slane %v1268_v57, 4  ;;  %v1243_v22 = vrot.slane %v1242_v46, 2  ;;  %v1217_v45 = vrot.slane %v1216_v30, 1  ;;  %1847 = vmatprep.subr.bf16.mxu0 (%p1108_p4), %v2440_v21 }
 0x54b   : >> { %v1295_v1 = vadd.f32 %v1294_v60, %v1292_v59  ;;  %v1370_v27 = vpop.permute.xlu1 %1369 }
 0x54c   : >> { %v1270_v13 = vadd.f32 %v1269_v63, %v1268_v57  ;;  %v1244_v35 = vadd.f32 %v1243_v22, %v1242_v46  ;;  %v1376_v38 = vmul.f32 %v1375_v19, %v1370_v27  ;;  %v1218_v56 = vadd.f32 %v1217_v45, %v1216_v30  ;;  %v1406_v19 = vld [vmem:[#allocation2] sm:$0xff] (%p1108_p4) }
 0x54d   : >> { %v1296_v7 = vsel %vm835_vm9, %v1295_v1, 0.0  ;;  %v1322_v11 = vmul.f32 %v1321_v55, %v1295_v1  ;;  %v1415_v32 = vmul.f32 (%p1108_p4), %v1772_v9, %v1406_v19 }
 0x54e   : >> { %v1297_v14 = vrot.slane %v1296_v7, 4  ;;  %v1271_v25 = vrot.slane %v1270_v13, 2  ;;  %v1245_v49 = vrot.slane %v1244_v35, 1  ;;  %v1388_v3 = vsel %vm1387_vm1, %v1190_v61, %v1218_v56 }
 0x54f   : >> { %v1323_v15 = vadd.f32 %v1322_v11, %v1320_v8 }
 0x550   : >> { %v1298_v17 = vadd.f32 %v1297_v14, %v1296_v7  ;;  %v1272_v62 = vadd.f32 %v1271_v25, %v1270_v13  ;;  %v1246_v60 = vadd.f32 %v1245_v49, %v1244_v35  ;;  %v1773_v25 = vld [vmem:[%s3094_s18] ss:$0 sm:$0xff] (%p1108_p4) }
 0x551   : >> { %v1324_v51 = vsel %vm835_vm9, %v1323_v15, 0.0  ;;  %v1350_v24 = vmul.f32 %v1349_v5, %v1323_v15 }
 0x552   : >> { %v1325_v26 = vrot.slane %v1324_v51, 4  ;;  %v1299_v28 = vrot.slane %v1298_v17, 2  ;;  %v1273_v52 = vrot.slane %v1272_v62, 1  ;;  %v1390_v6 = vsel %vm1389_vm4, %v1388_v3, %v1246_v60 }
 0x553   : >> { %v1351_v29 = vadd.f32 %v1350_v24, %v1348_v23  ;;  %v2102_v24 = vld [vmem:[%s3093_s3 + $0x18] sm:$0xff] (%p1108_p4)  }
 0x554   : >> { %v1326_v31 = vadd.f32 %v1325_v26, %v1324_v51  ;;  %v1300_v34 = vadd.f32 %v1299_v28, %v1298_v17  ;;  %v1274_v63 = vadd.f32 %v1273_v52, %v1272_v62  ;;  %v2100_v17 = vld [vmem:[%s3093_s3 + $0x8] sm:$0xff] (%p1108_p4)  }
 0x555   : >> { %v1352_v37 = vsel %vm835_vm9, %v1351_v29, 0.0  ;;  %v1378_v40 = vmul.f32 %v1377_v20, %v1351_v29  ;;  %v1407_v20 = vld [vmem:[#allocation2 + $0x8] sm:$0xff] (%p1108_p4)  ;;  %1848 = vmatpush3.bf16.msra.mxu0 (%p1108_p4), %v2100_v17 }
 0x556   : >> { %v1327_v41 = vrot.slane %v1326_v31, 2  ;;  %v1353_v42 = vrot.slane %v1352_v37, 4  ;;  %v1301_v55 = vrot.slane %v1300_v34, 1  ;;  %v1392_v7 = vsel %vm1391_vm5, %v1390_v6, %v1274_v63  ;;  %1849 = vmatprep.subr.bf16.mxu0 (%p1108_p4), %v2440_v21 }
 0x557   : >> { %v1379_v43 = vadd.f32 %v1378_v40, %v1376_v38   ;;  %v1416_v22 = vmul.f32 (%p1108_p4), %v1772_v9, %v1407_v20 }
 0x558   : >> { %v1328_v47 = vadd.f32 %v1327_v41, %v1326_v31  ;;  %v1354_v48 = vadd.f32 %v1353_v42, %v1352_v37  ;;  %v1302_v2 = vadd.f32 %v1301_v55, %v1300_v34 }
 0x559   : >> { %v1380_v50 = vsel %vm835_vm9, %v1379_v43, 0.0  ;;  %v3092_v33 = vmov %v1379_v43  ;;  %1403 = vst.msk [vmem:[#allocation6] sm:$0xff] (%p1108_p4), %vm835_vm9, %v1379_v43  ;;  %1850 = vmatpush3.bf16.msra.mxu0 (%p1108_p4), %v2101_v10 }
 0x55a   : >> { %v1355_v53 = vrot.slane %v1354_v48, 2  ;;  %v1381_v54 = vrot.slane %v1380_v50, 4  ;;  %v1329_v44 = vrot.slane %v1328_v47, 1  ;;  %v1394_v11 = vsel %vm1393_vm6, %v1392_v7, %v1302_v2  ;;  %1851 = vmatprep.subr.bf16.mxu0 (%p1108_p4), %v2440_v21 }
 0x55c   : >> { %v1356_v57 = vadd.f32 %v1355_v53, %v1354_v48  ;;  %v1382_v59 = vadd.f32 %v1381_v54, %v1380_v50  ;;  %v1330_v4 = vadd.f32 %v1329_v44, %v1328_v47 }
 0x55d   : > { %1852 = vmatpush3.bf16.msra.mxu0 (%p1108_p4), %v2102_v24 }
 0x55e   : >> { %v1357_v0 = vrot.slane %v1356_v57, 1  ;;  %v1383_v1 = vrot.slane %v1382_v59, 2  ;;  %v1396_v12 = vsel %vm1395_vm7, %v1394_v11, %v1330_v4 }
 0x560   : >> { %v1384_v5 = vadd.f32 %v1383_v1, %v1382_v59  ;;  %v1358_v46 = vadd.f32 %v1357_v0, %v1356_v57 }
 0x561   : > { %1110 = sbr.rel (!%p1108_p4) target bundleno = 984 (0x3d8), region = 158 }
 0x562   : >> { %v1385_v8 = vrot.slane %v1384_v5, 1  ;;  %v1398_v14 = vsel %vm1397_vm8, %v1396_v12, %v1358_v46 }
 0x564   : >> { %v1386_v13 = vadd.f32 %v1385_v8, %v1384_v5 }
 0x566   : >> { %v1400_v15 = vsel %vm1399_vm11, %v1398_v14, %v1386_v13 }
 0x567   : >> { %1402 = vst.msk [vmem:[%s1401_s7] sm:$0xff] %vm835_vm9, %v1400_v15 }
 0x56e   : > { %v1404_v36 = vld [vmem:[#allocation5] sm:$0xff]  ;;  %v1405_v18 = vld [vmem:[#allocation5 + $0x8] sm:$0xff] }
 0x56f   : > { %v1417_v51 = vadd.f32 %v1415_v32, %v1404_v36  ;;  %v1418_v23 = vadd.f32 %v1416_v22, %v1405_v18 }
 0x571   : > { %v1419_v33 = vpack.c.bf16 %v1418_v23, %v1417_v51 }
 0x573   : > { %1854 = vmatmul.mubr.msk.bf16.vlgmr.msra.gmra.mrb[0].mxu0 %vm835_vm9, %v1419_v33 }
 0x646   : > { %v1496_v26 = vpop.f32.mrb[0].mxu0 }
 0x647   : > { %v1497_v27 = vadd.f32 %v1773_v25, %v1496_v26  ;;  %v1855_v28 = vpop.f32.mrb[1].mxu0 }
 0x648   : > { %v1499_v29 = vpop.f32.mrb[2].mxu0 }
 0x649   : > { %1503 = vst.msk [vmem:[%s2785_s14] sm:$0xff] %vm685_vm2, %v1497_v27  ;;  %v1500_v21 = vadd.f32 %v1773_v25, %v1499_v29  ;;  %v1856_v30 = vpop.f32.mrb[3].mxu0 }
 0x64b   : > { %1504 = vst.msk [vmem:[%s2785_s14 + $0x8] sm:$0xff] %vm685_vm2, %v1500_v21 }
 0x64c   : > { %2312 = shalt.err (!%p2309_p3)
}
 0x64d   : > { %s2313_s23 = scalar_lea.hbm %s2969_s16, 256  ;;  %s2317_s24 = scalar_lea.hbm %s3096_s12, 1024 }
 0x64e   : > { %p2314_p0 = scmp.ne.s32.totalorder %s2969_s16, %s2313_s23  ;;  %p2318_p10 = scmp.lt.u32.totalorder %s2969_s16, %s3096_s12 }
 0x64f   : > { %p2319_p12 = scmp.lt.u32.totalorder %s2317_s24, %s2313_s23  ;;  %p2321_p5 = scmp.lt.u32.totalorder %s2313_s23, %s2969_s16 }
 0x650   : > { %p2315_p2 = pnand %p2314_p0, %p3097_p6 }
 0x651   : > { %p2320_p4 = por %p2319_p12, %p2318_p10 }
 0x652   : > { %p2316_p8 = pneg %p2315_p2 }
 0x653   : > { %p2322_p7 = por %p2321_p5, %p2320_p4 }
 0x655   : > { %p2323_p9 = pnand %p2322_p7, %p2316_p8 }
 0x657   : > { %2326 = shalt.err (!%p2323_p9)
}
 0x658   : > { %s2454_s13 = smov 128   ;;  %s2455_s15 = smov 8  }
 0x659   : > { %1885 = dma.vmem_to_hbm [thread:$0]  (%p3097_p6), %s2971_s5, 256, %s2969_s16, %s2979_s17, %s2454_s13, %s2454_s13, %s2455_s15  }
 0x65a PF: > { %s3098_s18 = sld [smem:[#allocation30_spill]]  ;;  %s3099_s21 = sld [smem:[#allocation26_spill]] }
 0x65b   : > { %s3100_s7 = sld [smem:[#allocation34_spill]] }
 0x660   : > { %p1927_p11 = scmp.ge.s32.totalorder %s3098_s18, 2  ;;  %s1536_s11 = sand.u32 1, %s3099_s21  }
 0x661   : > { %p3101_p13 = scmp.ne.s32.totalorder %s3100_s7, 0  ;;  %s1537_s28 = scalar_lea.sflag [#allocation10], %s1536_s11 }
 0x663   : > { %p1910_p1 = pnand %p1927_p11, %p3101_p13 }
 0x665   : > { %2384 = dma.done.wait (!%p1910_p1), %s1537_s28, 256  }
 0x666   : > { %2386 = vsyncadd (!%p1910_p1), %s1537_s28, 4294967040  ;;  %s31_s20 = sadd.s32 1, %s3098_s18   ;;  %s3102_s27 = sld [smem:[#allocation27_spill]] }
 0x667   : > { %p28_p3 = scmp.ge.s32.totalorder %s31_s20, 6   ;;  %s3103_s15 = sld [smem:[#allocation35_spill]] }
 0x668   : > { %s3104_s16 = sld [smem:[#allocation28_spill]]  ;;  %s3105_s17 = sld [smem:[#allocation29_spill]] }
 0x669   : > { %s3106_s18 = sld [smem:[#allocation31_spill]]  ;;  %s3107_s19 = sld [smem:[#allocation33_spill]] }
 0x66a   : > { %s3108_s29 = smov %s2393_s30  ;;  %30 = sbr.rel (!%p28_p3) target bundleno = 17 (0x11), region = 169 }
 0x66c   : > { %s3109_s30 = smov %s3102_s27 }
 0x671   :  { %1542 = vsyncpa [#allocation9], 1 }
 0x672   :  { %1544 = vsyncpa [#allocation9 + $0x1], 1 }
 0x673   :  { %1545 = vsyncpa [#allocation12], 1 }
 0x674   :  { %1546 = vsyncpa [#allocation15], 1 }
 0x675   :  { %1547 = vsyncpa [#allocation18], 1 }
 0x676   :  { %1548 = vsyncpa [#allocation10], 1 }
 0x677   :  { %1550 = vsyncpa [#allocation10 + $0x1], 1 }

</bundles_post_ra>
